<compile_context>
chip_gen: v7x
topology: tpu7x:2x2x1
jax: 0.10.0
libtpu: 0.0.40
codegen_flags: <defaults>
</compile_context>

<pallas_src>
import jax
import jax.numpy as jnp
from jax import lax
from jax.experimental import pallas as pl
from jax.experimental.pallas import tpu as pltpu

# --- small synthetic GPT-2 config ----------------------------------------
VOCAB = 64      # vocab size
MAXPOS = 32     # max positions
H = 32          # hidden size
NH = 4          # attention heads
HD = H // NH    # head dim
FF = 4 * H      # MLP inner dim
NLAYERS = 2     # transformer blocks
EPS = 1e-5
DTYPE = jnp.float32

# rows of the packed (NVEC, H) "vector" slab, per layer
(V_LN1W, V_LN1B, V_BQ, V_BK, V_BV, V_BP, V_LN2W, V_LN2B, V_BFP) = range(9)
VEC_PER_LAYER = 9
NVEC = NLAYERS * VEC_PER_LAYER + 2            # + final-LN weight, bias
V_LNFW = NLAYERS * VEC_PER_LAYER
V_LNFB = V_LNFW + 1


# --- in-kernel helpers ----------------------------------------------------
def _layer_norm(x, w, b):
    mu = jnp.mean(x, axis=-1, keepdims=True)
    var = jnp.mean((x - mu) ** 2, axis=-1, keepdims=True)
    return (x - mu) * lax.rsqrt(var + EPS) * w + b


def _gelu_new(x):
    # GPT-2 "gelu_new" (tanh approximation), kept in f32
    return 0.5 * x * (1.0 + jnp.tanh(0.7978845608028654 * (x + 0.044715 * x * x * x)))


# --- fused full-forward kernel ---------------------------------------------
def _make_kernel(B, S):
    M = B * S

    def kernel(ids_ref, wte_ref, wpe_ref, attn_w_ref, wfc_ref, wfp_ref,
               bfc_ref, vec_ref, o_ref, x_scr):
        # ---- fused embedding gather: token + position embeddings ----------
        for b in range(B):
            for s in range(S):
                tok = ids_ref[b, s]                       # scalar from SMEM
                x_scr[pl.ds(b * S + s, 1), :] = (
                    wte_ref[pl.ds(tok, 1), :] + wpe_ref[pl.ds(s, 1), :])
        x = x_scr[...]                                    # (M, H) f32

        # additive causal mask, built ONCE and reused by every layer
        row = lax.broadcasted_iota(jnp.int32, (S, S), 0)
        col = lax.broadcasted_iota(jnp.int32, (S, S), 1)
        mask_add = jnp.where(col <= row, 0.0, -1e9).astype(jnp.float32)[None]  # (1,S,S)
        scale = jnp.float32(1.0 / (HD ** 0.5))

        def vec(l, i):                                    # (1, H) slab row
            return vec_ref[pl.ds(l * VEC_PER_LAYER + i, 1), :]

        def split_heads(t):                               # (M, H) -> (B*NH, S, HD)
            return (t.reshape(B, S, NH, HD)
                     .transpose(0, 2, 1, 3)
                     .reshape(B * NH, S, HD))

        for l in range(NLAYERS):                          # static layer loop
            aw = attn_w_ref[l]                            # (4, H, H): q, k, v, proj

            # ---- causal multi-head self-attention (pre-LN) ----
            h = _layer_norm(x, vec(l, V_LN1W), vec(l, V_LN1B))          # (M, H)
            q = jnp.dot(h, aw[0], preferred_element_type=jnp.float32) + vec(l, V_BQ)
            k = jnp.dot(h, aw[1], preferred_element_type=jnp.float32) + vec(l, V_BK)
            v = jnp.dot(h, aw[2], preferred_element_type=jnp.float32) + vec(l, V_BV)
            qh, kh, vh = split_heads(q), split_heads(k), split_heads(v)  # (B*NH,S,HD)

            scores = jnp.einsum('bqd,bkd->bqk', qh, kh,
                                preferred_element_type=jnp.float32)
            scores = scores * scale + mask_add                           # (B*NH,S,S)

            # explicit softmax; divide moved to the EUP via approx reciprocal
            m = jnp.max(scores, axis=-1, keepdims=True)
            e = jnp.exp(scores - m)
            p = e * pl.reciprocal(jnp.sum(e, axis=-1, keepdims=True), approx=True)

            o = jnp.einsum('bqk,bkd->bqd', p, vh,
                           preferred_element_type=jnp.float32)           # (B*NH,S,HD)
            o = (o.reshape(B, NH, S, HD)
                  .transpose(0, 2, 1, 3)
                  .reshape(M, H))                                        # concat heads
            attn = jnp.dot(o, aw[3], preferred_element_type=jnp.float32) + vec(l, V_BP)
            x = x + attn

            # ---- MLP (pre-LN) ----
            h2 = _layer_norm(x, vec(l, V_LN2W), vec(l, V_LN2B))
            ff = (jnp.dot(h2, wfc_ref[l], preferred_element_type=jnp.float32)
                  + bfc_ref[pl.ds(l, 1), :])
            ff = _gelu_new(ff)
            ff = (jnp.dot(ff, wfp_ref[l], preferred_element_type=jnp.float32)
                  + vec(l, V_BFP))
            x = x + ff

        # final LayerNorm on the LAST sequence position only -> (B, H)
        last = x.reshape(B, S, H)[:, S - 1, :]
        lnf_w = vec_ref[pl.ds(V_LNFW, 1), :]
        lnf_b = vec_ref[pl.ds(V_LNFB, 1), :]
        o_ref[...] = _layer_norm(last, lnf_w, lnf_b).astype(o_ref.dtype)

    return kernel


# --- wrapper -----------------------------------------------------------------
@jax.jit
def text_encoder_forward(token_ids, params):
    B, S = token_ids.shape
    kernel = _make_kernel(B, S)
    vmem = pl.BlockSpec(memory_space=pltpu.MemorySpace.VMEM)
    smem = pl.BlockSpec(memory_space=pltpu.MemorySpace.SMEM)
    out = pl.pallas_call(
        kernel,
        out_shape=jax.ShapeDtypeStruct((B, H), DTYPE),
        in_specs=[smem,               # token ids -> SMEM scalars
                  vmem, vmem,         # wte, wpe
                  vmem, vmem, vmem,   # attn_w, wfc, wfp
                  vmem, vmem],        # bfc, vec slab
        out_specs=vmem,
        scratch_shapes=[pltpu.VMEM((B * S, H), jnp.float32)],
    )(token_ids, params["wte"], params["wpe"], params["attn_w"],
      params["wfc"], params["wfp"], params["bfc"], params["vec"])
    return out      # equivalent of outputs.last_hidden_state[:, -1, :]


# --- deterministic parameter init (packed layout) ----------------------------
def init_params(key):
    def normal(k, shape, std=0.02):
        return (std * jax.random.normal(k, shape)).astype(DTYPE)

    keys = jax.random.split(key, 2 + 6 * NLAYERS)
    attn_w, wfc, wfp = [], [], []
    for l in range(NLAYERS):
        ks = keys[2 + 6 * l: 2 + 6 * (l + 1)]
        attn_w.append(jnp.stack([normal(ks[0], (H, H)),    # Wq
                                 normal(ks[1], (H, H)),    # Wk
                                 normal(ks[2], (H, H)),    # Wv
                                 normal(ks[3], (H, H))]))  # Wproj
        wfc.append(normal(ks[4], (H, FF)))
        wfp.append(normal(ks[5], (FF, H)))

    # packed (NVEC, H) slab: per layer [ln1_w, ln1_b, bq, bk, bv, bp,
    # ln2_w, ln2_b, bfp], then lnf_w, lnf_b.  Biases 0, LN weights 1 (GPT-2 init).
    vec = jnp.zeros((NVEC, H), DTYPE)
    for l in range(NLAYERS):
        vec = vec.at[l * VEC_PER_LAYER + V_LN1W].set(1.0)
        vec = vec.at[l * VEC_PER_LAYER + V_LN2W].set(1.0)
    vec = vec.at[V_LNFW].set(1.0)

    return {
        "wte": normal(keys[0], (VOCAB, H)),
        "wpe": normal(keys[1], (MAXPOS, H)),
        "attn_w": jnp.stack(attn_w),                 # (NLAYERS, 4, H, H)
        "wfc": jnp.stack(wfc),                       # (NLAYERS, H, FF)
        "wfp": jnp.stack(wfp),                       # (NLAYERS, FF, H)
        "bfc": jnp.zeros((NLAYERS, FF), DTYPE),      # (NLAYERS, FF)
        "vec": vec,                                  # (NVEC, H)
    }


if __name__ == "__main__":
    key = jax.random.PRNGKey(0)
    pkey, ikey = jax.random.split(key)
    params = init_params(pkey)

    B, S = 2, 8
    token_ids = jax.random.randint(ikey, (B, S), 0, VOCAB, dtype=jnp.int32)

    out = jax.block_until_ready(text_encoder_forward(token_ids, params))
    assert out.shape == (B, H), out.shape
    assert bool(jnp.all(jnp.isfinite(out)))
    print("KERNEL_OK")
</pallas_src>

<mosaic_0001>
module attributes {stable_mosaic.version = 11 : i64} {
  func.func @kernel(%arg0: memref<2x8xi32, #tpu.memory_space<smem>>, %arg1: memref<64x32xf32, #tpu.memory_space<vmem>>, %arg2: memref<32x32xf32, #tpu.memory_space<vmem>>, %arg3: memref<2x4x32x32xf32, #tpu.memory_space<vmem>>, %arg4: memref<2x32x128xf32, #tpu.memory_space<vmem>>, %arg5: memref<2x128x32xf32, #tpu.memory_space<vmem>>, %arg6: memref<2x128xf32, #tpu.memory_space<vmem>>, %arg7: memref<20x32xf32, #tpu.memory_space<vmem>>, %arg8: memref<2x32xf32, #tpu.memory_space<vmem>>, %arg9: memref<16x32xf32, #tpu.memory_space<vmem>>) attributes {dimension_semantics = [], scalar_prefetch = 0 : i64, scratch_operands = 1 : i64, tpu.core_type = #tpu.core_type<tc>} {
    %c0 = arith.constant 0 : index
    %c0_0 = arith.constant 0 : index
    %0 = memref.load %arg0[%c0, %c0_0] : memref<2x8xi32, #tpu.memory_space<smem>>
    %1 = arith.index_cast %0 : i32 to index
    %c0_1 = arith.constant 0 : index
    %2 = vector.load %arg1[%1, %c0_1] : memref<64x32xf32, #tpu.memory_space<vmem>>, vector<1x32xf32>
    %c0_2 = arith.constant 0 : index
    %c0_3 = arith.constant 0 : index
    %3 = vector.load %arg2[%c0_2, %c0_3] : memref<32x32xf32, #tpu.memory_space<vmem>>, vector<1x32xf32>
    %4 = arith.addf %2, %3 : vector<1x32xf32>
    %c0_4 = arith.constant 0 : index
    %c0_5 = arith.constant 0 : index
    %5 = vector.load %arg9[%c0_4, %c0_5] : memref<16x32xf32, #tpu.memory_space<vmem>>, vector<1x32xf32>
    tpu.vector_store %arg9[%c0_4, %c0_5], %4 {strides = array<i32>} : memref<16x32xf32, #tpu.memory_space<vmem>>, vector<1x32xf32>,
    %c0_6 = arith.constant 0 : index
    %c1 = arith.constant 1 : index
    %6 = memref.load %arg0[%c0_6, %c1] : memref<2x8xi32, #tpu.memory_space<smem>>
    %7 = arith.index_cast %6 : i32 to index
    %c0_7 = arith.constant 0 : index
    %8 = vector.load %arg1[%7, %c0_7] : memref<64x32xf32, #tpu.memory_space<vmem>>, vector<1x32xf32>
    %c1_8 = arith.constant 1 : index
    %c0_9 = arith.constant 0 : index
    %9 = vector.load %arg2[%c1_8, %c0_9] : memref<32x32xf32, #tpu.memory_space<vmem>>, vector<1x32xf32>
    %10 = arith.addf %8, %9 : vector<1x32xf32>
    %c1_10 = arith.constant 1 : index
    %c0_11 = arith.constant 0 : index
    %11 = vector.load %arg9[%c1_10, %c0_11] : memref<16x32xf32, #tpu.memory_space<vmem>>, vector<1x32xf32>
    tpu.vector_store %arg9[%c1_10, %c0_11], %10 {strides = array<i32>} : memref<16x32xf32, #tpu.memory_space<vmem>>, vector<1x32xf32>,
    %c0_12 = arith.constant 0 : index
    %c2 = arith.constant 2 : index
    %12 = memref.load %arg0[%c0_12, %c2] : memref<2x8xi32, #tpu.memory_space<smem>>
    %13 = arith.index_cast %12 : i32 to index
    %c0_13 = arith.constant 0 : index
    %14 = vector.load %arg1[%13, %c0_13] : memref<64x32xf32, #tpu.memory_space<vmem>>, vector<1x32xf32>
    %c2_14 = arith.constant 2 : index
    %c0_15 = arith.constant 0 : index
    %15 = vector.load %arg2[%c2_14, %c0_15] : memref<32x32xf32, #tpu.memory_space<vmem>>, vector<1x32xf32>
    %16 = arith.addf %14, %15 : vector<1x32xf32>
    %c2_16 = arith.constant 2 : index
    %c0_17 = arith.constant 0 : index
    %17 = vector.load %arg9[%c2_16, %c0_17] : memref<16x32xf32, #tpu.memory_space<vmem>>, vector<1x32xf32>
    tpu.vector_store %arg9[%c2_16, %c0_17], %16 {strides = array<i32>} : memref<16x32xf32, #tpu.memory_space<vmem>>, vector<1x32xf32>,
    %c0_18 = arith.constant 0 : index
    %c3 = arith.constant 3 : index
    %18 = memref.load %arg0[%c0_18, %c3] : memref<2x8xi32, #tpu.memory_space<smem>>
    %19 = arith.index_cast %18 : i32 to index
    %c0_19 = arith.constant 0 : index
    %20 = vector.load %arg1[%19, %c0_19] : memref<64x32xf32, #tpu.memory_space<vmem>>, vector<1x32xf32>
    %c3_20 = arith.constant 3 : index
    %c0_21 = arith.constant 0 : index
    %21 = vector.load %arg2[%c3_20, %c0_21] : memref<32x32xf32, #tpu.memory_space<vmem>>, vector<1x32xf32>
    %22 = arith.addf %20, %21 : vector<1x32xf32>
    %c3_22 = arith.constant 3 : index
    %c0_23 = arith.constant 0 : index
    %23 = vector.load %arg9[%c3_22, %c0_23] : memref<16x32xf32, #tpu.memory_space<vmem>>, vector<1x32xf32>
    tpu.vector_store %arg9[%c3_22, %c0_23], %22 {strides = array<i32>} : memref<16x32xf32, #tpu.memory_space<vmem>>, vector<1x32xf32>,
    %c0_24 = arith.constant 0 : index
    %c4 = arith.constant 4 : index
    %24 = memref.load %arg0[%c0_24, %c4] : memref<2x8xi32, #tpu.memory_space<smem>>
    %25 = arith.index_cast %24 : i32 to index
    %c0_25 = arith.constant 0 : index
    %26 = vector.load %arg1[%25, %c0_25] : memref<64x32xf32, #tpu.memory_space<vmem>>, vector<1x32xf32>
    %c4_26 = arith.constant 4 : index
    %c0_27 = arith.constant 0 : index
    %27 = vector.load %arg2[%c4_26, %c0_27] : memref<32x32xf32, #tpu.memory_space<vmem>>, vector<1x32xf32>
    %28 = arith.addf %26, %27 : vector<1x32xf32>
    %c4_28 = arith.constant 4 : index
    %c0_29 = arith.constant 0 : index
    %29 = vector.load %arg9[%c4_28, %c0_29] : memref<16x32xf32, #tpu.memory_space<vmem>>, vector<1x32xf32>
    tpu.vector_store %arg9[%c4_28, %c0_29], %28 {strides = array<i32>} : memref<16x32xf32, #tpu.memory_space<vmem>>, vector<1x32xf32>,
    %c0_30 = arith.constant 0 : index
    %c5 = arith.constant 5 : index
    %30 = memref.load %arg0[%c0_30, %c5] : memref<2x8xi32, #tpu.memory_space<smem>>
    %31 = arith.index_cast %30 : i32 to index
    %c0_31 = arith.constant 0 : index
    %32 = vector.load %arg1[%31, %c0_31] : memref<64x32xf32, #tpu.memory_space<vmem>>, vector<1x32xf32>
    %c5_32 = arith.constant 5 : index
    %c0_33 = arith.constant 0 : index
    %33 = vector.load %arg2[%c5_32, %c0_33] : memref<32x32xf32, #tpu.memory_space<vmem>>, vector<1x32xf32>
    %34 = arith.addf %32, %33 : vector<1x32xf32>
    %c5_34 = arith.constant 5 : index
    %c0_35 = arith.constant 0 : index
    %35 = vector.load %arg9[%c5_34, %c0_35] : memref<16x32xf32, #tpu.memory_space<vmem>>, vector<1x32xf32>
    tpu.vector_store %arg9[%c5_34, %c0_35], %34 {strides = array<i32>} : memref<16x32xf32, #tpu.memory_space<vmem>>, vector<1x32xf32>,
    %c0_36 = arith.constant 0 : index
    %c6 = arith.constant 6 : index
    %36 = memref.load %arg0[%c0_36, %c6] : memref<2x8xi32, #tpu.memory_space<smem>>
    %37 = arith.index_cast %36 : i32 to index
    %c0_37 = arith.constant 0 : index
    %38 = vector.load %arg1[%37, %c0_37] : memref<64x32xf32, #tpu.memory_space<vmem>>, vector<1x32xf32>
    %c6_38 = arith.constant 6 : index
    %c0_39 = arith.constant 0 : index
    %39 = vector.load %arg2[%c6_38, %c0_39] : memref<32x32xf32, #tpu.memory_space<vmem>>, vector<1x32xf32>
    %40 = arith.addf %38, %39 : vector<1x32xf32>
    %c6_40 = arith.constant 6 : index
    %c0_41 = arith.constant 0 : index
    %41 = vector.load %arg9[%c6_40, %c0_41] : memref<16x32xf32, #tpu.memory_space<vmem>>, vector<1x32xf32>
    tpu.vector_store %arg9[%c6_40, %c0_41], %40 {strides = array<i32>} : memref<16x32xf32, #tpu.memory_space<vmem>>, vector<1x32xf32>,
    %c0_42 = arith.constant 0 : index
    %c7 = arith.constant 7 : index
    %42 = memref.load %arg0[%c0_42, %c7] : memref<2x8xi32, #tpu.memory_space<smem>>
    %43 = arith.index_cast %42 : i32 to index
    %c0_43 = arith.constant 0 : index
    %44 = vector.load %arg1[%43, %c0_43] : memref<64x32xf32, #tpu.memory_space<vmem>>, vector<1x32xf32>
    %c7_44 = arith.constant 7 : index
    %c0_45 = arith.constant 0 : index
    %45 = vector.load %arg2[%c7_44, %c0_45] : memref<32x32xf32, #tpu.memory_space<vmem>>, vector<1x32xf32>
    %46 = arith.addf %44, %45 : vector<1x32xf32>
    %c7_46 = arith.constant 7 : index
    %c0_47 = arith.constant 0 : index
    %47 = vector.load %arg9[%c7_46, %c0_47] : memref<16x32xf32, #tpu.memory_space<vmem>>, vector<1x32xf32>
    tpu.vector_store %arg9[%c7_46, %c0_47], %46 {strides = array<i32>} : memref<16x32xf32, #tpu.memory_space<vmem>>, vector<1x32xf32>,
    %c1_48 = arith.constant 1 : index
    %c0_49 = arith.constant 0 : index
    %48 = memref.load %arg0[%c1_48, %c0_49] : memref<2x8xi32, #tpu.memory_space<smem>>
    %49 = arith.index_cast %48 : i32 to index
    %c0_50 = arith.constant 0 : index
    %50 = vector.load %arg1[%49, %c0_50] : memref<64x32xf32, #tpu.memory_space<vmem>>, vector<1x32xf32>
    %c0_51 = arith.constant 0 : index
    %c0_52 = arith.constant 0 : index
    %51 = vector.load %arg2[%c0_51, %c0_52] : memref<32x32xf32, #tpu.memory_space<vmem>>, vector<1x32xf32>
    %52 = arith.addf %50, %51 : vector<1x32xf32>
    %c8 = arith.constant 8 : index
    %c0_53 = arith.constant 0 : index
    %53 = vector.load %arg9[%c8, %c0_53] : memref<16x32xf32, #tpu.memory_space<vmem>>, vector<1x32xf32>
    tpu.vector_store %arg9[%c8, %c0_53], %52 {strides = array<i32>} : memref<16x32xf32, #tpu.memory_space<vmem>>, vector<1x32xf32>,
    %c1_54 = arith.constant 1 : index
    %c1_55 = arith.constant 1 : index
    %54 = memref.load %arg0[%c1_54, %c1_55] : memref<2x8xi32, #tpu.memory_space<smem>>
    %55 = arith.index_cast %54 : i32 to index
    %c0_56 = arith.constant 0 : index
    %56 = vector.load %arg1[%55, %c0_56] : memref<64x32xf32, #tpu.memory_space<vmem>>, vector<1x32xf32>
    %c1_57 = arith.constant 1 : index
    %c0_58 = arith.constant 0 : index
    %57 = vector.load %arg2[%c1_57, %c0_58] : memref<32x32xf32, #tpu.memory_space<vmem>>, vector<1x32xf32>
    %58 = arith.addf %56, %57 : vector<1x32xf32>
    %c9 = arith.constant 9 : index
    %c0_59 = arith.constant 0 : index
    %59 = vector.load %arg9[%c9, %c0_59] : memref<16x32xf32, #tpu.memory_space<vmem>>, vector<1x32xf32>
    tpu.vector_store %arg9[%c9, %c0_59], %58 {strides = array<i32>} : memref<16x32xf32, #tpu.memory_space<vmem>>, vector<1x32xf32>,
    %c1_60 = arith.constant 1 : index
    %c2_61 = arith.constant 2 : index
    %60 = memref.load %arg0[%c1_60, %c2_61] : memref<2x8xi32, #tpu.memory_space<smem>>
    %61 = arith.index_cast %60 : i32 to index
    %c0_62 = arith.constant 0 : index
    %62 = vector.load %arg1[%61, %c0_62] : memref<64x32xf32, #tpu.memory_space<vmem>>, vector<1x32xf32>
    %c2_63 = arith.constant 2 : index
    %c0_64 = arith.constant 0 : index
    %63 = vector.load %arg2[%c2_63, %c0_64] : memref<32x32xf32, #tpu.memory_space<vmem>>, vector<1x32xf32>
    %64 = arith.addf %62, %63 : vector<1x32xf32>
    %c10 = arith.constant 10 : index
    %c0_65 = arith.constant 0 : index
    %65 = vector.load %arg9[%c10, %c0_65] : memref<16x32xf32, #tpu.memory_space<vmem>>, vector<1x32xf32>
    tpu.vector_store %arg9[%c10, %c0_65], %64 {strides = array<i32>} : memref<16x32xf32, #tpu.memory_space<vmem>>, vector<1x32xf32>,
    %c1_66 = arith.constant 1 : index
    %c3_67 = arith.constant 3 : index
    %66 = memref.load %arg0[%c1_66, %c3_67] : memref<2x8xi32, #tpu.memory_space<smem>>
    %67 = arith.index_cast %66 : i32 to index
    %c0_68 = arith.constant 0 : index
    %68 = vector.load %arg1[%67, %c0_68] : memref<64x32xf32, #tpu.memory_space<vmem>>, vector<1x32xf32>
    %c3_69 = arith.constant 3 : index
    %c0_70 = arith.constant 0 : index
    %69 = vector.load %arg2[%c3_69, %c0_70] : memref<32x32xf32, #tpu.memory_space<vmem>>, vector<1x32xf32>
    %70 = arith.addf %68, %69 : vector<1x32xf32>
    %c11 = arith.constant 11 : index
    %c0_71 = arith.constant 0 : index
    %71 = vector.load %arg9[%c11, %c0_71] : memref<16x32xf32, #tpu.memory_space<vmem>>, vector<1x32xf32>
    tpu.vector_store %arg9[%c11, %c0_71], %70 {strides = array<i32>} : memref<16x32xf32, #tpu.memory_space<vmem>>, vector<1x32xf32>,
    %c1_72 = arith.constant 1 : index
    %c4_73 = arith.constant 4 : index
    %72 = memref.load %arg0[%c1_72, %c4_73] : memref<2x8xi32, #tpu.memory_space<smem>>
    %73 = arith.index_cast %72 : i32 to index
    %c0_74 = arith.constant 0 : index
    %74 = vector.load %arg1[%73, %c0_74] : memref<64x32xf32, #tpu.memory_space<vmem>>, vector<1x32xf32>
    %c4_75 = arith.constant 4 : index
    %c0_76 = arith.constant 0 : index
    %75 = vector.load %arg2[%c4_75, %c0_76] : memref<32x32xf32, #tpu.memory_space<vmem>>, vector<1x32xf32>
    %76 = arith.addf %74, %75 : vector<1x32xf32>
    %c12 = arith.constant 12 : index
    %c0_77 = arith.constant 0 : index
    %77 = vector.load %arg9[%c12, %c0_77] : memref<16x32xf32, #tpu.memory_space<vmem>>, vector<1x32xf32>
    tpu.vector_store %arg9[%c12, %c0_77], %76 {strides = array<i32>} : memref<16x32xf32, #tpu.memory_space<vmem>>, vector<1x32xf32>,
    %c1_78 = arith.constant 1 : index
    %c5_79 = arith.constant 5 : index
    %78 = memref.load %arg0[%c1_78, %c5_79] : memref<2x8xi32, #tpu.memory_space<smem>>
    %79 = arith.index_cast %78 : i32 to index
    %c0_80 = arith.constant 0 : index
    %80 = vector.load %arg1[%79, %c0_80] : memref<64x32xf32, #tpu.memory_space<vmem>>, vector<1x32xf32>
    %c5_81 = arith.constant 5 : index
    %c0_82 = arith.constant 0 : index
    %81 = vector.load %arg2[%c5_81, %c0_82] : memref<32x32xf32, #tpu.memory_space<vmem>>, vector<1x32xf32>
    %82 = arith.addf %80, %81 : vector<1x32xf32>
    %c13 = arith.constant 13 : index
    %c0_83 = arith.constant 0 : index
    %83 = vector.load %arg9[%c13, %c0_83] : memref<16x32xf32, #tpu.memory_space<vmem>>, vector<1x32xf32>
    tpu.vector_store %arg9[%c13, %c0_83], %82 {strides = array<i32>} : memref<16x32xf32, #tpu.memory_space<vmem>>, vector<1x32xf32>,
    %c1_84 = arith.constant 1 : index
    %c6_85 = arith.constant 6 : index
    %84 = memref.load %arg0[%c1_84, %c6_85] : memref<2x8xi32, #tpu.memory_space<smem>>
    %85 = arith.index_cast %84 : i32 to index
    %c0_86 = arith.constant 0 : index
    %86 = vector.load %arg1[%85, %c0_86] : memref<64x32xf32, #tpu.memory_space<vmem>>, vector<1x32xf32>
    %c6_87 = arith.constant 6 : index
    %c0_88 = arith.constant 0 : index
    %87 = vector.load %arg2[%c6_87, %c0_88] : memref<32x32xf32, #tpu.memory_space<vmem>>, vector<1x32xf32>
    %88 = arith.addf %86, %87 : vector<1x32xf32>
    %c14 = arith.constant 14 : index
    %c0_89 = arith.constant 0 : index
    %89 = vector.load %arg9[%c14, %c0_89] : memref<16x32xf32, #tpu.memory_space<vmem>>, vector<1x32xf32>
    tpu.vector_store %arg9[%c14, %c0_89], %88 {strides = array<i32>} : memref<16x32xf32, #tpu.memory_space<vmem>>, vector<1x32xf32>,
    %c1_90 = arith.constant 1 : index
    %c7_91 = arith.constant 7 : index
    %90 = memref.load %arg0[%c1_90, %c7_91] : memref<2x8xi32, #tpu.memory_space<smem>>
    %91 = arith.index_cast %90 : i32 to index
    %c0_92 = arith.constant 0 : index
    %92 = vector.load %arg1[%91, %c0_92] : memref<64x32xf32, #tpu.memory_space<vmem>>, vector<1x32xf32>
    %c7_93 = arith.constant 7 : index
    %c0_94 = arith.constant 0 : index
    %93 = vector.load %arg2[%c7_93, %c0_94] : memref<32x32xf32, #tpu.memory_space<vmem>>, vector<1x32xf32>
    %94 = arith.addf %92, %93 : vector<1x32xf32>
    %c15 = arith.constant 15 : index
    %c0_95 = arith.constant 0 : index
    %95 = vector.load %arg9[%c15, %c0_95] : memref<16x32xf32, #tpu.memory_space<vmem>>, vector<1x32xf32>
    tpu.vector_store %arg9[%c15, %c0_95], %94 {strides = array<i32>} : memref<16x32xf32, #tpu.memory_space<vmem>>, vector<1x32xf32>,
    %c0_96 = arith.constant 0 : index
    %c0_97 = arith.constant 0 : index
    %96 = vector.load %arg9[%c0_96, %c0_97] : memref<16x32xf32, #tpu.memory_space<vmem>>, vector<16x32xf32>
    %97 = tpu.iota {dimensions = array<i32: 0>} : vector<8x8xi32>
    %98 = tpu.iota {dimensions = array<i32: 1>} : vector<8x8xi32>
    %99 = arith.cmpi sle, %98, %97 : vector<8x8xi32>
    %cst = arith.constant 0.000000e+00 : f32
    %cst_98 = arith.constant -1.000000e+09 : f32
    %100 = vector.broadcast %cst : f32 to vector<8x8xf32>
    %101 = vector.broadcast %cst_98 : f32 to vector<8x8xf32>
    %102 = arith.select %99, %100, %101 : vector<8x8xi1>, vector<8x8xf32>
    %103 = vector.shape_cast %102 : vector<8x8xf32> to vector<1x8x8xf32>
    %c0_99 = arith.constant 0 : index
    %c0_100 = arith.constant 0 : index
    %c0_101 = arith.constant 0 : index
    %c0_102 = arith.constant 0 : index
    %104 = vector.load %arg3[%c0_99, %c0_100, %c0_101, %c0_102] : memref<2x4x32x32xf32, #tpu.memory_space<vmem>>, vector<1x4x32x32xf32>
    %105 = vector.shape_cast %104 : vector<1x4x32x32xf32> to vector<4x32x32xf32>
    %c0_103 = arith.constant 0 : index
    %c0_104 = arith.constant 0 : index
    %106 = vector.load %arg7[%c0_103, %c0_104] : memref<20x32xf32, #tpu.memory_space<vmem>>, vector<1x32xf32>
    %c1_105 = arith.constant 1 : index
    %c0_106 = arith.constant 0 : index
    %107 = vector.load %arg7[%c1_105, %c0_106] : memref<20x32xf32, #tpu.memory_space<vmem>>, vector<1x32xf32>
    %cst_107 = arith.constant dense<0.000000e+00> : vector<16xf32>
    %108 = vector.multi_reduction <add>, %96, %cst_107 [1] : vector<16x32xf32> to vector<16xf32>
    %109 = vector.shape_cast %108 : vector<16xf32> to vector<16x1xf32>
    %cst_108 = arith.constant 3.200000e+01 : f32
    %110 = vector.broadcast %cst_108 : f32 to vector<16x1xf32>
    %111 = arith.divf %109, %110 : vector<16x1xf32>
    %112 = vector.broadcast %111 : vector<16x1xf32> to vector<16x32xf32>
    %113 = arith.subf %96, %112 : vector<16x32xf32>
    %114 = arith.mulf %113, %113 : vector<16x32xf32>
    %cst_109 = arith.constant dense<0.000000e+00> : vector<16xf32>
    %115 = vector.multi_reduction <add>, %114, %cst_109 [1] : vector<16x32xf32> to vector<16xf32>
    %116 = vector.shape_cast %115 : vector<16xf32> to vector<16x1xf32>
    %cst_110 = arith.constant 3.200000e+01 : f32
    %117 = vector.broadcast %cst_110 : f32 to vector<16x1xf32>
    %118 = arith.divf %116, %117 : vector<16x1xf32>
    %119 = vector.broadcast %111 : vector<16x1xf32> to vector<16x32xf32>
    %120 = arith.subf %96, %119 : vector<16x32xf32>
    %cst_111 = arith.constant 9.99999974E-6 : f32
    %121 = vector.broadcast %cst_111 : f32 to vector<16x1xf32>
    %122 = arith.addf %118, %121 : vector<16x1xf32>
    %123 = math.rsqrt %122 : vector<16x1xf32>
    %124 = vector.broadcast %123 : vector<16x1xf32> to vector<16x32xf32>
    %125 = arith.mulf %120, %124 : vector<16x32xf32>
    %126 = vector.broadcast %106 : vector<1x32xf32> to vector<16x32xf32>
    %127 = arith.mulf %125, %126 : vector<16x32xf32>
    %128 = vector.broadcast %107 : vector<1x32xf32> to vector<16x32xf32>
    %129 = arith.addf %127, %128 : vector<16x32xf32>
    %130 = vector.extract_strided_slice %105 {offsets = [0, 0, 0], sizes = [1, 32, 32], strides = [1, 1, 1]} : vector<4x32x32xf32> to vector<1x32x32xf32>
    %131 = vector.shape_cast %130 : vector<1x32x32xf32> to vector<32x32xf32>
    %cst_112 = arith.constant dense<0.000000e+00> : vector<16x32xf32>
    %132 = tpu.matmul %129, %131, %cst_112 {dimension_numbers = #tpu.dot_dimension_numbers<[1], [0], [0], [1], [0, 0, 1, 1], [], []>} : vector<16x32xf32>, vector<32x32xf32>, vector<16x32xf32> -> vector<16x32xf32>
    %c2_113 = arith.constant 2 : index
    %c0_114 = arith.constant 0 : index
    %133 = vector.load %arg7[%c2_113, %c0_114] : memref<20x32xf32, #tpu.memory_space<vmem>>, vector<1x32xf32>
    %134 = vector.broadcast %133 : vector<1x32xf32> to vector<16x32xf32>
    %135 = arith.addf %132, %134 : vector<16x32xf32>
    %136 = vector.extract_strided_slice %105 {offsets = [1, 0, 0], sizes = [1, 32, 32], strides = [1, 1, 1]} : vector<4x32x32xf32> to vector<1x32x32xf32>
    %137 = vector.shape_cast %136 : vector<1x32x32xf32> to vector<32x32xf32>
    %cst_115 = arith.constant dense<0.000000e+00> : vector<16x32xf32>
    %138 = tpu.matmul %129, %137, %cst_115 {dimension_numbers = #tpu.dot_dimension_numbers<[1], [0], [0], [1], [0, 0, 1, 1], [], []>} : vector<16x32xf32>, vector<32x32xf32>, vector<16x32xf32> -> vector<16x32xf32>
    %c3_116 = arith.constant 3 : index
    %c0_117 = arith.constant 0 : index
    %139 = vector.load %arg7[%c3_116, %c0_117] : memref<20x32xf32, #tpu.memory_space<vmem>>, vector<1x32xf32>
    %140 = vector.broadcast %139 : vector<1x32xf32> to vector<16x32xf32>
    %141 = arith.addf %138, %140 : vector<16x32xf32>
    %142 = vector.extract_strided_slice %105 {offsets = [2, 0, 0], sizes = [1, 32, 32], strides = [1, 1, 1]} : vector<4x32x32xf32> to vector<1x32x32xf32>
    %143 = vector.shape_cast %142 : vector<1x32x32xf32> to vector<32x32xf32>
    %cst_118 = arith.constant dense<0.000000e+00> : vector<16x32xf32>
    %144 = tpu.matmul %129, %143, %cst_118 {dimension_numbers = #tpu.dot_dimension_numbers<[1], [0], [0], [1], [0, 0, 1, 1], [], []>} : vector<16x32xf32>, vector<32x32xf32>, vector<16x32xf32> -> vector<16x32xf32>
    %c4_119 = arith.constant 4 : index
    %c0_120 = arith.constant 0 : index
    %145 = vector.load %arg7[%c4_119, %c0_120] : memref<20x32xf32, #tpu.memory_space<vmem>>, vector<1x32xf32>
    %146 = vector.broadcast %145 : vector<1x32xf32> to vector<16x32xf32>
    %147 = arith.addf %144, %146 : vector<16x32xf32>
    %148 = vector.shape_cast %135 : vector<16x32xf32> to vector<2x8x4x8xf32>
    %149 = tpu.transpose %148, [0, 2, 1, 3] : vector<2x8x4x8xf32> -> vector<2x4x8x8xf32>
    %150 = vector.shape_cast %149 : vector<2x4x8x8xf32> to vector<8x8x8xf32>
    %151 = vector.shape_cast %141 : vector<16x32xf32> to vector<2x8x4x8xf32>
    %152 = tpu.transpose %151, [0, 2, 1, 3] : vector<2x8x4x8xf32> -> vector<2x4x8x8xf32>
    %153 = vector.shape_cast %152 : vector<2x4x8x8xf32> to vector<8x8x8xf32>
    %154 = vector.shape_cast %147 : vector<16x32xf32> to vector<2x8x4x8xf32>
    %155 = tpu.transpose %154, [0, 2, 1, 3] : vector<2x8x4x8xf32> -> vector<2x4x8x8xf32>
    %156 = vector.shape_cast %155 : vector<2x4x8x8xf32> to vector<8x8x8xf32>
    "tpu.trace_start"() <{level = 10 : i32, message = "bqd,bkd->bqk"}> : () -> ()
    %cst_121 = arith.constant dense<0.000000e+00> : vector<8x8x8xf32>
    %157 = tpu.matmul %150, %153, %cst_121 {dimension_numbers = #tpu.dot_dimension_numbers<[2], [2], [1], [1], [0, 0, 0, 1, 1, 1], [0], [0]>} : vector<8x8x8xf32>, vector<8x8x8xf32>, vector<8x8x8xf32> -> vector<8x8x8xf32>
    "tpu.trace_stop"() : () -> ()
    %cst_122 = arith.constant 0.353553385 : f32
    %158 = vector.broadcast %cst_122 : f32 to vector<8x8x8xf32>
    %159 = arith.mulf %157, %158 : vector<8x8x8xf32>
    %160 = vector.broadcast %103 : vector<1x8x8xf32> to vector<8x8x8xf32>
    %161 = arith.addf %159, %160 : vector<8x8x8xf32>
    %cst_123 = arith.constant dense<0xFF800000> : vector<8x8xf32>
    %162 = vector.multi_reduction <maximumf>, %161, %cst_123 [2] : vector<8x8x8xf32> to vector<8x8xf32>
    %163 = vector.shape_cast %162 : vector<8x8xf32> to vector<8x8x1xf32>
    %164 = vector.broadcast %163 : vector<8x8x1xf32> to vector<8x8x8xf32>
    %165 = arith.subf %161, %164 : vector<8x8x8xf32>
    %166 = math.exp %165 : vector<8x8x8xf32>
    %cst_124 = arith.constant dense<0.000000e+00> : vector<8x8xf32>
    %167 = vector.multi_reduction <add>, %166, %cst_124 [2] : vector<8x8x8xf32> to vector<8x8xf32>
    %168 = vector.shape_cast %167 : vector<8x8xf32> to vector<8x8x1xf32>
    %169 = tpu.reciprocal %168 {approx = true} : vector<8x8x1xf32> -> vector<8x8x1xf32>
    %170 = vector.broadcast %169 : vector<8x8x1xf32> to vector<8x8x8xf32>
    %171 = arith.mulf %166, %170 : vector<8x8x8xf32>
    "tpu.trace_start"() <{level = 10 : i32, message = "bqk,bkd->bqd"}> : () -> ()
    %cst_125 = arith.constant dense<0.000000e+00> : vector<8x8x8xf32>
    %172 = tpu.matmul %171, %156, %cst_125 {dimension_numbers = #tpu.dot_dimension_numbers<[2], [1], [1], [2], [0, 0, 0, 1, 1, 2], [0], [0]>} : vector<8x8x8xf32>, vector<8x8x8xf32>, vector<8x8x8xf32> -> vector<8x8x8xf32>
    "tpu.trace_stop"() : () -> ()
    %173 = vector.shape_cast %172 : vector<8x8x8xf32> to vector<2x4x8x8xf32>
    %174 = tpu.transpose %173, [0, 2, 1, 3] : vector<2x4x8x8xf32> -> vector<2x8x4x8xf32>
    %175 = vector.shape_cast %174 : vector<2x8x4x8xf32> to vector<16x32xf32>
    %176 = vector.extract_strided_slice %105 {offsets = [3, 0, 0], sizes = [1, 32, 32], strides = [1, 1, 1]} : vector<4x32x32xf32> to vector<1x32x32xf32>
    %177 = vector.shape_cast %176 : vector<1x32x32xf32> to vector<32x32xf32>
    %cst_126 = arith.constant dense<0.000000e+00> : vector<16x32xf32>
    %178 = tpu.matmul %175, %177, %cst_126 {dimension_numbers = #tpu.dot_dimension_numbers<[1], [0], [0], [1], [0, 0, 1, 1], [], []>} : vector<16x32xf32>, vector<32x32xf32>, vector<16x32xf32> -> vector<16x32xf32>
    %c5_127 = arith.constant 5 : index
    %c0_128 = arith.constant 0 : index
    %179 = vector.load %arg7[%c5_127, %c0_128] : memref<20x32xf32, #tpu.memory_space<vmem>>, vector<1x32xf32>
    %180 = vector.broadcast %179 : vector<1x32xf32> to vector<16x32xf32>
    %181 = arith.addf %178, %180 : vector<16x32xf32>
    %182 = arith.addf %96, %181 : vector<16x32xf32>
    %c6_129 = arith.constant 6 : index
    %c0_130 = arith.constant 0 : index
    %183 = vector.load %arg7[%c6_129, %c0_130] : memref<20x32xf32, #tpu.memory_space<vmem>>, vector<1x32xf32>
    %c7_131 = arith.constant 7 : index
    %c0_132 = arith.constant 0 : index
    %184 = vector.load %arg7[%c7_131, %c0_132] : memref<20x32xf32, #tpu.memory_space<vmem>>, vector<1x32xf32>
    %cst_133 = arith.constant dense<0.000000e+00> : vector<16xf32>
    %185 = vector.multi_reduction <add>, %182, %cst_133 [1] : vector<16x32xf32> to vector<16xf32>
    %186 = vector.shape_cast %185 : vector<16xf32> to vector<16x1xf32>
    %cst_134 = arith.constant 3.200000e+01 : f32
    %187 = vector.broadcast %cst_134 : f32 to vector<16x1xf32>
    %188 = arith.divf %186, %187 : vector<16x1xf32>
    %189 = vector.broadcast %188 : vector<16x1xf32> to vector<16x32xf32>
    %190 = arith.subf %182, %189 : vector<16x32xf32>
    %191 = arith.mulf %190, %190 : vector<16x32xf32>
    %cst_135 = arith.constant dense<0.000000e+00> : vector<16xf32>
    %192 = vector.multi_reduction <add>, %191, %cst_135 [1] : vector<16x32xf32> to vector<16xf32>
    %193 = vector.shape_cast %192 : vector<16xf32> to vector<16x1xf32>
    %cst_136 = arith.constant 3.200000e+01 : f32
    %194 = vector.broadcast %cst_136 : f32 to vector<16x1xf32>
    %195 = arith.divf %193, %194 : vector<16x1xf32>
    %196 = vector.broadcast %188 : vector<16x1xf32> to vector<16x32xf32>
    %197 = arith.subf %182, %196 : vector<16x32xf32>
    %cst_137 = arith.constant 9.99999974E-6 : f32
    %198 = vector.broadcast %cst_137 : f32 to vector<16x1xf32>
    %199 = arith.addf %195, %198 : vector<16x1xf32>
    %200 = math.rsqrt %199 : vector<16x1xf32>
    %201 = vector.broadcast %200 : vector<16x1xf32> to vector<16x32xf32>
    %202 = arith.mulf %197, %201 : vector<16x32xf32>
    %203 = vector.broadcast %183 : vector<1x32xf32> to vector<16x32xf32>
    %204 = arith.mulf %202, %203 : vector<16x32xf32>
    %205 = vector.broadcast %184 : vector<1x32xf32> to vector<16x32xf32>
    %206 = arith.addf %204, %205 : vector<16x32xf32>
    %c0_138 = arith.constant 0 : index
    %c0_139 = arith.constant 0 : index
    %c0_140 = arith.constant 0 : index
    %207 = vector.load %arg4[%c0_138, %c0_139, %c0_140] : memref<2x32x128xf32, #tpu.memory_space<vmem>>, vector<1x32x128xf32>
    %208 = vector.shape_cast %207 : vector<1x32x128xf32> to vector<32x128xf32>
    %cst_141 = arith.constant dense<0.000000e+00> : vector<16x128xf32>
    %209 = tpu.matmul %206, %208, %cst_141 {dimension_numbers = #tpu.dot_dimension_numbers<[1], [0], [0], [1], [0, 0, 1, 1], [], []>} : vector<16x32xf32>, vector<32x128xf32>, vector<16x128xf32> -> vector<16x128xf32>
    %c0_142 = arith.constant 0 : index
    %c0_143 = arith.constant 0 : index
    %210 = vector.load %arg6[%c0_142, %c0_143] : memref<2x128xf32, #tpu.memory_space<vmem>>, vector<1x128xf32>
    %211 = vector.broadcast %210 : vector<1x128xf32> to vector<16x128xf32>
    %212 = arith.addf %209, %211 : vector<16x128xf32>
    %cst_144 = arith.constant 5.000000e-01 : f32
    %213 = vector.broadcast %cst_144 : f32 to vector<16x128xf32>
    %214 = arith.mulf %213, %212 : vector<16x128xf32>
    %cst_145 = arith.constant 4.471500e-02 : f32
    %215 = vector.broadcast %cst_145 : f32 to vector<16x128xf32>
    %216 = arith.mulf %215, %212 : vector<16x128xf32>
    %217 = arith.mulf %216, %212 : vector<16x128xf32>
    %218 = arith.mulf %217, %212 : vector<16x128xf32>
    %219 = arith.addf %212, %218 : vector<16x128xf32>
    %cst_146 = arith.constant 0.797884583 : f32
    %220 = vector.broadcast %cst_146 : f32 to vector<16x128xf32>
    %221 = arith.mulf %220, %219 : vector<16x128xf32>
    %222 = math.tanh %221 : vector<16x128xf32>
    %cst_147 = arith.constant 1.000000e+00 : f32
    %223 = vector.broadcast %cst_147 : f32 to vector<16x128xf32>
    %224 = arith.addf %223, %222 : vector<16x128xf32>
    %225 = arith.mulf %214, %224 : vector<16x128xf32>
    %c0_148 = arith.constant 0 : index
    %c0_149 = arith.constant 0 : index
    %c0_150 = arith.constant 0 : index
    %226 = vector.load %arg5[%c0_148, %c0_149, %c0_150] : memref<2x128x32xf32, #tpu.memory_space<vmem>>, vector<1x128x32xf32>
    %227 = vector.shape_cast %226 : vector<1x128x32xf32> to vector<128x32xf32>
    %cst_151 = arith.constant dense<0.000000e+00> : vector<16x32xf32>
    %228 = tpu.matmul %225, %227, %cst_151 {dimension_numbers = #tpu.dot_dimension_numbers<[1], [0], [0], [1], [0, 0, 1, 1], [], []>} : vector<16x128xf32>, vector<128x32xf32>, vector<16x32xf32> -> vector<16x32xf32>
    %c8_152 = arith.constant 8 : index
    %c0_153 = arith.constant 0 : index
    %229 = vector.load %arg7[%c8_152, %c0_153] : memref<20x32xf32, #tpu.memory_space<vmem>>, vector<1x32xf32>
    %230 = vector.broadcast %229 : vector<1x32xf32> to vector<16x32xf32>
    %231 = arith.addf %228, %230 : vector<16x32xf32>
    %232 = arith.addf %182, %231 : vector<16x32xf32>
    %c1_154 = arith.constant 1 : index
    %c0_155 = arith.constant 0 : index
    %c0_156 = arith.constant 0 : index
    %c0_157 = arith.constant 0 : index
    %233 = vector.load %arg3[%c1_154, %c0_155, %c0_156, %c0_157] : memref<2x4x32x32xf32, #tpu.memory_space<vmem>>, vector<1x4x32x32xf32>
    %234 = vector.shape_cast %233 : vector<1x4x32x32xf32> to vector<4x32x32xf32>
    %c9_158 = arith.constant 9 : index
    %c0_159 = arith.constant 0 : index
    %235 = vector.load %arg7[%c9_158, %c0_159] : memref<20x32xf32, #tpu.memory_space<vmem>>, vector<1x32xf32>
    %c10_160 = arith.constant 10 : index
    %c0_161 = arith.constant 0 : index
    %236 = vector.load %arg7[%c10_160, %c0_161] : memref<20x32xf32, #tpu.memory_space<vmem>>, vector<1x32xf32>
    %cst_162 = arith.constant dense<0.000000e+00> : vector<16xf32>
    %237 = vector.multi_reduction <add>, %232, %cst_162 [1] : vector<16x32xf32> to vector<16xf32>
    %238 = vector.shape_cast %237 : vector<16xf32> to vector<16x1xf32>
    %cst_163 = arith.constant 3.200000e+01 : f32
    %239 = vector.broadcast %cst_163 : f32 to vector<16x1xf32>
    %240 = arith.divf %238, %239 : vector<16x1xf32>
    %241 = vector.broadcast %240 : vector<16x1xf32> to vector<16x32xf32>
    %242 = arith.subf %232, %241 : vector<16x32xf32>
    %243 = arith.mulf %242, %242 : vector<16x32xf32>
    %cst_164 = arith.constant dense<0.000000e+00> : vector<16xf32>
    %244 = vector.multi_reduction <add>, %243, %cst_164 [1] : vector<16x32xf32> to vector<16xf32>
    %245 = vector.shape_cast %244 : vector<16xf32> to vector<16x1xf32>
    %cst_165 = arith.constant 3.200000e+01 : f32
    %246 = vector.broadcast %cst_165 : f32 to vector<16x1xf32>
    %247 = arith.divf %245, %246 : vector<16x1xf32>
    %248 = vector.broadcast %240 : vector<16x1xf32> to vector<16x32xf32>
    %249 = arith.subf %232, %248 : vector<16x32xf32>
    %cst_166 = arith.constant 9.99999974E-6 : f32
    %250 = vector.broadcast %cst_166 : f32 to vector<16x1xf32>
    %251 = arith.addf %247, %250 : vector<16x1xf32>
    %252 = math.rsqrt %251 : vector<16x1xf32>
    %253 = vector.broadcast %252 : vector<16x1xf32> to vector<16x32xf32>
    %254 = arith.mulf %249, %253 : vector<16x32xf32>
    %255 = vector.broadcast %235 : vector<1x32xf32> to vector<16x32xf32>
    %256 = arith.mulf %254, %255 : vector<16x32xf32>
    %257 = vector.broadcast %236 : vector<1x32xf32> to vector<16x32xf32>
    %258 = arith.addf %256, %257 : vector<16x32xf32>
    %259 = vector.extract_strided_slice %234 {offsets = [0, 0, 0], sizes = [1, 32, 32], strides = [1, 1, 1]} : vector<4x32x32xf32> to vector<1x32x32xf32>
    %260 = vector.shape_cast %259 : vector<1x32x32xf32> to vector<32x32xf32>
    %cst_167 = arith.constant dense<0.000000e+00> : vector<16x32xf32>
    %261 = tpu.matmul %258, %260, %cst_167 {dimension_numbers = #tpu.dot_dimension_numbers<[1], [0], [0], [1], [0, 0, 1, 1], [], []>} : vector<16x32xf32>, vector<32x32xf32>, vector<16x32xf32> -> vector<16x32xf32>
    %c11_168 = arith.constant 11 : index
    %c0_169 = arith.constant 0 : index
    %262 = vector.load %arg7[%c11_168, %c0_169] : memref<20x32xf32, #tpu.memory_space<vmem>>, vector<1x32xf32>
    %263 = vector.broadcast %262 : vector<1x32xf32> to vector<16x32xf32>
    %264 = arith.addf %261, %263 : vector<16x32xf32>
    %265 = vector.extract_strided_slice %234 {offsets = [1, 0, 0], sizes = [1, 32, 32], strides = [1, 1, 1]} : vector<4x32x32xf32> to vector<1x32x32xf32>
    %266 = vector.shape_cast %265 : vector<1x32x32xf32> to vector<32x32xf32>
    %cst_170 = arith.constant dense<0.000000e+00> : vector<16x32xf32>
    %267 = tpu.matmul %258, %266, %cst_170 {dimension_numbers = #tpu.dot_dimension_numbers<[1], [0], [0], [1], [0, 0, 1, 1], [], []>} : vector<16x32xf32>, vector<32x32xf32>, vector<16x32xf32> -> vector<16x32xf32>
    %c12_171 = arith.constant 12 : index
    %c0_172 = arith.constant 0 : index
    %268 = vector.load %arg7[%c12_171, %c0_172] : memref<20x32xf32, #tpu.memory_space<vmem>>, vector<1x32xf32>
    %269 = vector.broadcast %268 : vector<1x32xf32> to vector<16x32xf32>
    %270 = arith.addf %267, %269 : vector<16x32xf32>
    %271 = vector.extract_strided_slice %234 {offsets = [2, 0, 0], sizes = [1, 32, 32], strides = [1, 1, 1]} : vector<4x32x32xf32> to vector<1x32x32xf32>
    %272 = vector.shape_cast %271 : vector<1x32x32xf32> to vector<32x32xf32>
    %cst_173 = arith.constant dense<0.000000e+00> : vector<16x32xf32>
    %273 = tpu.matmul %258, %272, %cst_173 {dimension_numbers = #tpu.dot_dimension_numbers<[1], [0], [0], [1], [0, 0, 1, 1], [], []>} : vector<16x32xf32>, vector<32x32xf32>, vector<16x32xf32> -> vector<16x32xf32>
    %c13_174 = arith.constant 13 : index
    %c0_175 = arith.constant 0 : index
    %274 = vector.load %arg7[%c13_174, %c0_175] : memref<20x32xf32, #tpu.memory_space<vmem>>, vector<1x32xf32>
    %275 = vector.broadcast %274 : vector<1x32xf32> to vector<16x32xf32>
    %276 = arith.addf %273, %275 : vector<16x32xf32>
    %277 = vector.shape_cast %264 : vector<16x32xf32> to vector<2x8x4x8xf32>
    %278 = tpu.transpose %277, [0, 2, 1, 3] : vector<2x8x4x8xf32> -> vector<2x4x8x8xf32>
    %279 = vector.shape_cast %278 : vector<2x4x8x8xf32> to vector<8x8x8xf32>
    %280 = vector.shape_cast %270 : vector<16x32xf32> to vector<2x8x4x8xf32>
    %281 = tpu.transpose %280, [0, 2, 1, 3] : vector<2x8x4x8xf32> -> vector<2x4x8x8xf32>
    %282 = vector.shape_cast %281 : vector<2x4x8x8xf32> to vector<8x8x8xf32>
    %283 = vector.shape_cast %276 : vector<16x32xf32> to vector<2x8x4x8xf32>
    %284 = tpu.transpose %283, [0, 2, 1, 3] : vector<2x8x4x8xf32> -> vector<2x4x8x8xf32>
    %285 = vector.shape_cast %284 : vector<2x4x8x8xf32> to vector<8x8x8xf32>
    "tpu.trace_start"() <{level = 10 : i32, message = "bqd,bkd->bqk"}> : () -> ()
    %cst_176 = arith.constant dense<0.000000e+00> : vector<8x8x8xf32>
    %286 = tpu.matmul %279, %282, %cst_176 {dimension_numbers = #tpu.dot_dimension_numbers<[2], [2], [1], [1], [0, 0, 0, 1, 1, 1], [0], [0]>} : vector<8x8x8xf32>, vector<8x8x8xf32>, vector<8x8x8xf32> -> vector<8x8x8xf32>
    "tpu.trace_stop"() : () -> ()
    %cst_177 = arith.constant 0.353553385 : f32
    %287 = vector.broadcast %cst_177 : f32 to vector<8x8x8xf32>
    %288 = arith.mulf %286, %287 : vector<8x8x8xf32>
    %289 = vector.broadcast %103 : vector<1x8x8xf32> to vector<8x8x8xf32>
    %290 = arith.addf %288, %289 : vector<8x8x8xf32>
    %cst_178 = arith.constant dense<0xFF800000> : vector<8x8xf32>
    %291 = vector.multi_reduction <maximumf>, %290, %cst_178 [2] : vector<8x8x8xf32> to vector<8x8xf32>
    %292 = vector.shape_cast %291 : vector<8x8xf32> to vector<8x8x1xf32>
    %293 = vector.broadcast %292 : vector<8x8x1xf32> to vector<8x8x8xf32>
    %294 = arith.subf %290, %293 : vector<8x8x8xf32>
    %295 = math.exp %294 : vector<8x8x8xf32>
    %cst_179 = arith.constant dense<0.000000e+00> : vector<8x8xf32>
    %296 = vector.multi_reduction <add>, %295, %cst_179 [2] : vector<8x8x8xf32> to vector<8x8xf32>
    %297 = vector.shape_cast %296 : vector<8x8xf32> to vector<8x8x1xf32>
    %298 = tpu.reciprocal %297 {approx = true} : vector<8x8x1xf32> -> vector<8x8x1xf32>
    %299 = vector.broadcast %298 : vector<8x8x1xf32> to vector<8x8x8xf32>
    %300 = arith.mulf %295, %299 : vector<8x8x8xf32>
    "tpu.trace_start"() <{level = 10 : i32, message = "bqk,bkd->bqd"}> : () -> ()
    %cst_180 = arith.constant dense<0.000000e+00> : vector<8x8x8xf32>
    %301 = tpu.matmul %300, %285, %cst_180 {dimension_numbers = #tpu.dot_dimension_numbers<[2], [1], [1], [2], [0, 0, 0, 1, 1, 2], [0], [0]>} : vector<8x8x8xf32>, vector<8x8x8xf32>, vector<8x8x8xf32> -> vector<8x8x8xf32>
    "tpu.trace_stop"() : () -> ()
    %302 = vector.shape_cast %301 : vector<8x8x8xf32> to vector<2x4x8x8xf32>
    %303 = tpu.transpose %302, [0, 2, 1, 3] : vector<2x4x8x8xf32> -> vector<2x8x4x8xf32>
    %304 = vector.shape_cast %303 : vector<2x8x4x8xf32> to vector<16x32xf32>
    %305 = vector.extract_strided_slice %234 {offsets = [3, 0, 0], sizes = [1, 32, 32], strides = [1, 1, 1]} : vector<4x32x32xf32> to vector<1x32x32xf32>
    %306 = vector.shape_cast %305 : vector<1x32x32xf32> to vector<32x32xf32>
    %cst_181 = arith.constant dense<0.000000e+00> : vector<16x32xf32>
    %307 = tpu.matmul %304, %306, %cst_181 {dimension_numbers = #tpu.dot_dimension_numbers<[1], [0], [0], [1], [0, 0, 1, 1], [], []>} : vector<16x32xf32>, vector<32x32xf32>, vector<16x32xf32> -> vector<16x32xf32>
    %c14_182 = arith.constant 14 : index
    %c0_183 = arith.constant 0 : index
    %308 = vector.load %arg7[%c14_182, %c0_183] : memref<20x32xf32, #tpu.memory_space<vmem>>, vector<1x32xf32>
    %309 = vector.broadcast %308 : vector<1x32xf32> to vector<16x32xf32>
    %310 = arith.addf %307, %309 : vector<16x32xf32>
    %311 = arith.addf %232, %310 : vector<16x32xf32>
    %c15_184 = arith.constant 15 : index
    %c0_185 = arith.constant 0 : index
    %312 = vector.load %arg7[%c15_184, %c0_185] : memref<20x32xf32, #tpu.memory_space<vmem>>, vector<1x32xf32>
    %c16 = arith.constant 16 : index
    %c0_186 = arith.constant 0 : index
    %313 = vector.load %arg7[%c16, %c0_186] : memref<20x32xf32, #tpu.memory_space<vmem>>, vector<1x32xf32>
    %cst_187 = arith.constant dense<0.000000e+00> : vector<16xf32>
    %314 = vector.multi_reduction <add>, %311, %cst_187 [1] : vector<16x32xf32> to vector<16xf32>
    %315 = vector.shape_cast %314 : vector<16xf32> to vector<16x1xf32>
    %cst_188 = arith.constant 3.200000e+01 : f32
    %316 = vector.broadcast %cst_188 : f32 to vector<16x1xf32>
    %317 = arith.divf %315, %316 : vector<16x1xf32>
    %318 = vector.broadcast %317 : vector<16x1xf32> to vector<16x32xf32>
    %319 = arith.subf %311, %318 : vector<16x32xf32>
    %320 = arith.mulf %319, %319 : vector<16x32xf32>
    %cst_189 = arith.constant dense<0.000000e+00> : vector<16xf32>
    %321 = vector.multi_reduction <add>, %320, %cst_189 [1] : vector<16x32xf32> to vector<16xf32>
    %322 = vector.shape_cast %321 : vector<16xf32> to vector<16x1xf32>
    %cst_190 = arith.constant 3.200000e+01 : f32
    %323 = vector.broadcast %cst_190 : f32 to vector<16x1xf32>
    %324 = arith.divf %322, %323 : vector<16x1xf32>
    %325 = vector.broadcast %317 : vector<16x1xf32> to vector<16x32xf32>
    %326 = arith.subf %311, %325 : vector<16x32xf32>
    %cst_191 = arith.constant 9.99999974E-6 : f32
    %327 = vector.broadcast %cst_191 : f32 to vector<16x1xf32>
    %328 = arith.addf %324, %327 : vector<16x1xf32>
    %329 = math.rsqrt %328 : vector<16x1xf32>
    %330 = vector.broadcast %329 : vector<16x1xf32> to vector<16x32xf32>
    %331 = arith.mulf %326, %330 : vector<16x32xf32>
    %332 = vector.broadcast %312 : vector<1x32xf32> to vector<16x32xf32>
    %333 = arith.mulf %331, %332 : vector<16x32xf32>
    %334 = vector.broadcast %313 : vector<1x32xf32> to vector<16x32xf32>
    %335 = arith.addf %333, %334 : vector<16x32xf32>
    %c1_192 = arith.constant 1 : index
    %c0_193 = arith.constant 0 : index
    %c0_194 = arith.constant 0 : index
    %336 = vector.load %arg4[%c1_192, %c0_193, %c0_194] : memref<2x32x128xf32, #tpu.memory_space<vmem>>, vector<1x32x128xf32>
    %337 = vector.shape_cast %336 : vector<1x32x128xf32> to vector<32x128xf32>
    %cst_195 = arith.constant dense<0.000000e+00> : vector<16x128xf32>
    %338 = tpu.matmul %335, %337, %cst_195 {dimension_numbers = #tpu.dot_dimension_numbers<[1], [0], [0], [1], [0, 0, 1, 1], [], []>} : vector<16x32xf32>, vector<32x128xf32>, vector<16x128xf32> -> vector<16x128xf32>
    %c1_196 = arith.constant 1 : index
    %c0_197 = arith.constant 0 : index
    %339 = vector.load %arg6[%c1_196, %c0_197] : memref<2x128xf32, #tpu.memory_space<vmem>>, vector<1x128xf32>
    %340 = vector.broadcast %339 : vector<1x128xf32> to vector<16x128xf32>
    %341 = arith.addf %338, %340 : vector<16x128xf32>
    %cst_198 = arith.constant 5.000000e-01 : f32
    %342 = vector.broadcast %cst_198 : f32 to vector<16x128xf32>
    %343 = arith.mulf %342, %341 : vector<16x128xf32>
    %cst_199 = arith.constant 4.471500e-02 : f32
    %344 = vector.broadcast %cst_199 : f32 to vector<16x128xf32>
    %345 = arith.mulf %344, %341 : vector<16x128xf32>
    %346 = arith.mulf %345, %341 : vector<16x128xf32>
    %347 = arith.mulf %346, %341 : vector<16x128xf32>
    %348 = arith.addf %341, %347 : vector<16x128xf32>
    %cst_200 = arith.constant 0.797884583 : f32
    %349 = vector.broadcast %cst_200 : f32 to vector<16x128xf32>
    %350 = arith.mulf %349, %348 : vector<16x128xf32>
    %351 = math.tanh %350 : vector<16x128xf32>
    %cst_201 = arith.constant 1.000000e+00 : f32
    %352 = vector.broadcast %cst_201 : f32 to vector<16x128xf32>
    %353 = arith.addf %352, %351 : vector<16x128xf32>
    %354 = arith.mulf %343, %353 : vector<16x128xf32>
    %c1_202 = arith.constant 1 : index
    %c0_203 = arith.constant 0 : index
    %c0_204 = arith.constant 0 : index
    %355 = vector.load %arg5[%c1_202, %c0_203, %c0_204] : memref<2x128x32xf32, #tpu.memory_space<vmem>>, vector<1x128x32xf32>
    %356 = vector.shape_cast %355 : vector<1x128x32xf32> to vector<128x32xf32>
    %cst_205 = arith.constant dense<0.000000e+00> : vector<16x32xf32>
    %357 = tpu.matmul %354, %356, %cst_205 {dimension_numbers = #tpu.dot_dimension_numbers<[1], [0], [0], [1], [0, 0, 1, 1], [], []>} : vector<16x128xf32>, vector<128x32xf32>, vector<16x32xf32> -> vector<16x32xf32>
    %c17 = arith.constant 17 : index
    %c0_206 = arith.constant 0 : index
    %358 = vector.load %arg7[%c17, %c0_206] : memref<20x32xf32, #tpu.memory_space<vmem>>, vector<1x32xf32>
    %359 = vector.broadcast %358 : vector<1x32xf32> to vector<16x32xf32>
    %360 = arith.addf %357, %359 : vector<16x32xf32>
    %361 = arith.addf %311, %360 : vector<16x32xf32>
    %362 = vector.shape_cast %361 : vector<16x32xf32> to vector<2x8x32xf32>
    %363 = vector.extract_strided_slice %362 {offsets = [0, 7, 0], sizes = [2, 1, 32], strides = [1, 1, 1]} : vector<2x8x32xf32> to vector<2x1x32xf32>
    %364 = vector.shape_cast %363 : vector<2x1x32xf32> to vector<2x32xf32>
    %c18 = arith.constant 18 : index
    %c0_207 = arith.constant 0 : index
    %365 = vector.load %arg7[%c18, %c0_207] : memref<20x32xf32, #tpu.memory_space<vmem>>, vector<1x32xf32>
    %c19 = arith.constant 19 : index
    %c0_208 = arith.constant 0 : index
    %366 = vector.load %arg7[%c19, %c0_208] : memref<20x32xf32, #tpu.memory_space<vmem>>, vector<1x32xf32>
    %cst_209 = arith.constant dense<0.000000e+00> : vector<2xf32>
    %367 = vector.multi_reduction <add>, %364, %cst_209 [1] : vector<2x32xf32> to vector<2xf32>
    %368 = vector.shape_cast %367 : vector<2xf32> to vector<2x1xf32>
    %cst_210 = arith.constant 3.200000e+01 : f32
    %369 = vector.broadcast %cst_210 : f32 to vector<2x1xf32>
    %370 = arith.divf %368, %369 : vector<2x1xf32>
    %371 = vector.broadcast %370 : vector<2x1xf32> to vector<2x32xf32>
    %372 = arith.subf %364, %371 : vector<2x32xf32>
    %373 = arith.mulf %372, %372 : vector<2x32xf32>
    %cst_211 = arith.constant dense<0.000000e+00> : vector<2xf32>
    %374 = vector.multi_reduction <add>, %373, %cst_211 [1] : vector<2x32xf32> to vector<2xf32>
    %375 = vector.shape_cast %374 : vector<2xf32> to vector<2x1xf32>
    %cst_212 = arith.constant 3.200000e+01 : f32
    %376 = vector.broadcast %cst_212 : f32 to vector<2x1xf32>
    %377 = arith.divf %375, %376 : vector<2x1xf32>
    %378 = vector.broadcast %370 : vector<2x1xf32> to vector<2x32xf32>
    %379 = arith.subf %364, %378 : vector<2x32xf32>
    %cst_213 = arith.constant 9.99999974E-6 : f32
    %380 = vector.broadcast %cst_213 : f32 to vector<2x1xf32>
    %381 = arith.addf %377, %380 : vector<2x1xf32>
    %382 = math.rsqrt %381 : vector<2x1xf32>
    %383 = vector.broadcast %382 : vector<2x1xf32> to vector<2x32xf32>
    %384 = arith.mulf %379, %383 : vector<2x32xf32>
    %385 = vector.broadcast %365 : vector<1x32xf32> to vector<2x32xf32>
    %386 = arith.mulf %384, %385 : vector<2x32xf32>
    %387 = vector.broadcast %366 : vector<1x32xf32> to vector<2x32xf32>
    %388 = arith.addf %386, %387 : vector<2x32xf32>
    %c0_214 = arith.constant 0 : index
    %c0_215 = arith.constant 0 : index
    %389 = vector.load %arg8[%c0_214, %c0_215] : memref<2x32xf32, #tpu.memory_space<vmem>>, vector<2x32xf32>
    tpu.vector_store %arg8[%c0_214, %c0_215], %388 {strides = array<i32>} : memref<2x32xf32, #tpu.memory_space<vmem>>, vector<2x32xf32>,
    return
  }
}

</mosaic_0001>

<bundles_post_ra>
// kernel: text_encoder_forward.1
= control target key start
LH: loop header
LB: loop body
LE: loop exit
PB: predicated region body
PF: predicated region fallthrough
CT: control target
= control target key end

     0   :  { %13 = vsyncpa [#allocation6], 0  ;;  %s8750_s0 = inlined_call_operand.vmem [shape: s32[2,8], index: 0, kind: input, shape index: {}]   ;;  %s8751_s1 = inlined_call_operand.vmem [shape: f32[64,32], index: 1, kind: input, shape index: {}]   ;;  %s8752_s2 = inlined_call_operand.vmem [shape: f32[32,32], index: 2, kind: input, shape index: {}]   ;;  %s8753_s3 = inlined_call_operand.vmem [shape: f32[2,4,32,32], index: 3, kind: input, shape index: {}]   ;;  %s8754_s4 = inlined_call_operand.vmem [shape: f32[2,32,128], index: 4, kind: input, shape index: {}]   ;;  %s8755_s5 = inlined_call_operand.vmem [shape: f32[2,128,32], index: 5, kind: input, shape index: {}]   ;;  %s8756_s6 = inlined_call_operand.vmem [shape: f32[2,128], index: 6, kind: input, shape index: {}]   ;;  %s8757_s7 = inlined_call_operand.hbm [shape: f32[20,32], index: 7, kind: input, shape index: {}]   ;;  %s8758_s8 = inlined_call_operand.hbm [shape: f32[2,32], index: 8, kind: output, shape index: {}]  }
   0x1   :  { %14 = vsyncpa [#allocation4], 0 }
   0x2   :  { %15 = vsyncpa [#allocation5], 0  ;;  %s22_s29 = sshll.u32 %s8750_s0, 4  ;;  %s23_s29 = int_to_ptr.vmem [resolvable:$true] %s22_s29 }
   0x3   :  { %s7416_s30 = scalar_lea.vmem %s23_s29, 32  ;;  %p7421_p1 = scmp.lt.s32.totalorder %s23_s29, %s23_s29 }
   0x4   :  { %p7417_p0 = scmp.ne.s32.totalorder %s23_s29, %s7416_s30  ;;  %p7422_p2 = scmp.lt.s32.totalorder %s7416_s30, %s7416_s30 }
   0x6   :  { %p7423_p3 = por %p7422_p2, %p7421_p1 }
   0x8   :  { %p7424_p4 = pnand %p7423_p3, %p7417_p0 }
   0xa   :  { %7427 = shalt.err (!%p7424_p4)
}
   0xb   :  { %s7478_s9 = smov [#allocation3]   ;;  %s7479_s10 = smov [#allocation7]  }
   0xc   :  { %25 = dma.vmem_to_smem %s23_s29, 32, %s7478_s9, [#allocation6]  }
   0xd   :  { %s43_s11 = sshll.u32 %s7479_s10, 4  ;;  %s7428_s14 = scalar_lea.hbm %s8757_s7, 384  ;;  %s44_s11 = int_to_ptr.vmem [resolvable:$true] %s43_s11 }
   0xe   :  { %p7429_p5 = scmp.ne.s32.totalorder %s8757_s7, %s7428_s14  ;;  %p7432_p6 = scmp.lt.u32.totalorder %s7428_s14, %s8757_s7 }
  0x10   :  { %p7434_p7 = pnand %p7432_p6, %p7429_p5 }
  0x12   :  { %7437 = shalt.err (!%p7434_p7)
}
  0x13   :  { %s7438_s18 = scalar_lea.vmem %s44_s11, 384  ;;  %p7443_p9 = scmp.lt.s32.totalorder %s44_s11, %s44_s11 }
  0x14   :  { %p7439_p8 = scmp.ne.s32.totalorder %s44_s11, %s7438_s18  ;;  %p7444_p10 = scmp.lt.s32.totalorder %s7438_s18, %s7438_s18 }
  0x16   :  { %p7445_p11 = por %p7444_p10, %p7443_p9 }
  0x18   :  { %p7446_p12 = pnand %p7445_p11, %p7439_p8 }
  0x1a   :  { %7449 = shalt.err (!%p7446_p12)
}
  0x1b   :  { %s7480_s19 = smov 128   ;;  %s7481_s20 = smov 8  }
  0x1c   :  { %49 = dma.hbm_to_vmem [thread:$0]  %s8757_s7, 384, %s44_s11, [#allocation4], %s7480_s19, %s7480_s19, %s7481_s20  }
  0x1d   :  { %7472 = dma.done.wait [#allocation6], 32  }
  0x1e   :  { %7473 = vsyncadd [#allocation6], 4294967264 }
  0x1f   :  { %7474 = dma.done.wait [#allocation4], 384  }
  0x20   :  { %7475 = vsyncadd [#allocation4], 4294966912 }
  0x21   :  { %56 = sfence }
  0x22   :  { %s57_s23 = sld [smem:[#allocation3]]  ;;  %s6490_s24 = sld [smem:[#allocation3 + $0x1]]  ;;  %v60_v0 = vld [vmem:[%s8752_s2] sm:$0x1]  ;;  %vm62_vm0 = vcmask 253952   ;;  %vm180_vm1 = vcmask 261120  }
  0x23   :  { %s6491_s25 = sld [smem:[#allocation3 + $0x2]]  ;;  %s6492_s26 = sld [smem:[#allocation3 + $0x3]]  ;;  %v67_v1 = vld [vmem:[%s8752_s2 + $0x1] sm:$0x1]  ;;  %v73_v2 = vld [vmem:[%s8752_s2 + $0x2] sm:$0x1] }
  0x24   :  { %s7557_s29 = sld [smem:[#allocation3 + $0x4]]  ;;  %s7559_s30 = sld [smem:[#allocation3 + $0x5]]  ;;  %v79_v3 = vld [vmem:[%s8752_s2 + $0x3] sm:$0x1]  ;;  %v85_v4 = vld [vmem:[%s8752_s2 + $0x4] sm:$0x1] }
  0x25   :  { %s7564_s10 = sld [smem:[#allocation3 + $0x6]]  ;;  %s7569_s13 = sld [smem:[#allocation3 + $0x7]]  ;;  %v91_v6 = vld [vmem:[%s8752_s2 + $0x5] sm:$0x1]  ;;  %v97_v7 = vld [vmem:[%s8752_s2 + $0x6] sm:$0x1] }
  0x26   :  { %s7571_s14 = sld [smem:[#allocation3 + $0x80]]  ;;  %s7582_s22 = sld [smem:[#allocation3 + $0x81]]  ;;  %v103_v14 = vld [vmem:[%s8752_s2 + $0x7] sm:$0x1]  ;;  %v109_v15 = vld [vmem:[%s8752_s2] sm:$0x1] }
  0x27   :  { %s7599_s19 = sld [smem:[#allocation3 + $0x82]]  ;;  %s7620_s17 = sld [smem:[#allocation3 + $0x83]]  ;;  %v115_v22 = vld [vmem:[%s8752_s2 + $0x1] sm:$0x1]  ;;  %v121_v23 = vld [vmem:[%s8752_s2 + $0x2] sm:$0x1] }
  0x28   :  { %s58_s0 = scalar_lea.vmem %s8751_s1, %s57_s23  ;;  %s65_s9 = scalar_lea.vmem %s8751_s1, %s6490_s24  ;;  %v127_v32 = vld [vmem:[%s8752_s2 + $0x3] sm:$0x1]  ;;  %v133_v35 = vld [vmem:[%s8752_s2 + $0x4] sm:$0x1]  ;;  %v139_v37 = vld [vmem:[%s8752_s2 + $0x5] sm:$0x1] }
  0x29   :  { %v59_v5 = vld [vmem:[%s58_s0] sm:$0x1]  ;;  %s71_s23 = scalar_lea.vmem %s8751_s1, %s6491_s25  ;;  %s77_s24 = scalar_lea.vmem %s8751_s1, %s6492_s26  ;;  %v145_v38 = vld [vmem:[%s8752_s2 + $0x6] sm:$0x1]  ;;  %v151_v40 = vld [vmem:[%s8752_s2 + $0x7] sm:$0x1] }
  0x2a   :  { %v61_v8 = vadd.f32 %v60_v0, %v59_v5  ;;  %v66_v9 = vld [vmem:[%s65_s9] sm:$0x1]  ;;  %s83_s27 = scalar_lea.vmem %s8751_s1, %s7557_s29  ;;  %s89_s9 = scalar_lea.vmem %s8751_s1, %s7559_s30  ;;  %v163_v63 = vld [vmem:[%s8753_s3 + $0x8] sm:$0xff]  ;;  %v164_v0 = vld [vmem:[%s8753_s3 + $0x10] sm:$0xff]  ;;  %vm7486_vm2 = vmmov 0   ;;  %vm1342_vm3 = vcmask 64512  }
  0x2b   :  { %v72_v10 = vld [vmem:[%s71_s23] sm:$0x1]  ;;  %v68_v11 = vadd.f32 %v67_v1, %v66_v9  ;;  %s95_s16 = scalar_lea.vmem %s8751_s1, %s7564_s10  ;;  %s101_s18 = scalar_lea.vmem %s8751_s1, %s7569_s13  ;;  %v167_v5 = vld [vmem:[%s8753_s3 + $0x28] sm:$0xff]  ;;  %vm2937_vm5 = vcmask 130048   ;;  %vm2940_vm6 = vcmask 195584   ;;  %vm6397_vm7 = vcmask 261127  }
  0x2c   :  { %v74_v12 = vadd.f32 %v73_v2, %v72_v10  ;;  %v78_v13 = vld [vmem:[%s77_s24] sm:$0x1]  ;;  %63 = vst.msk [vmem:[#allocation2] sm:$0x1] %vm62_vm0, %v61_v8  ;;  %s107_s21 = scalar_lea.vmem %s8751_s1, %s7571_s14  ;;  %s113_s11 = scalar_lea.vmem %s8751_s1, %s7582_s22  ;;  %v165_v2 = vld [vmem:[%s8753_s3 + $0x18] sm:$0xff] }
  0x2d   :  { %v80_v16 = vadd.f32 %v79_v3, %v78_v13  ;;  %v84_v17 = vld [vmem:[%s83_s27] sm:$0x1]  ;;  %69 = vst.msk [vmem:[#allocation2 + $0x1] sm:$0x1] %vm62_vm0, %v68_v11  ;;  %s6501_s23 = sld [smem:[#allocation3 + $0x84]]  ;;  %s6502_s14 = sld [smem:[#allocation3 + $0x85]]  ;;  %v7167_v3 = vpack.c.bf16 %v165_v2, %v164_v0 }
  0x2e   :  { %v90_v18 = vld [vmem:[%s89_s9] sm:$0x1]  ;;  %75 = vst.msk [vmem:[#allocation2 + $0x2] sm:$0x1] %vm62_vm0, %v74_v12  ;;  %v86_v19 = vadd.f32 %v85_v4, %v84_v17  ;;  %s6503_s26 = sld [smem:[#allocation3 + $0x86]]  ;;  %s119_s29 = scalar_lea.vmem %s8751_s1, %s7599_s19 }
  0x2f   :  { %v92_v20 = vadd.f32 %v91_v6, %v90_v18  ;;  %v96_v21 = vld [vmem:[%s95_s16] sm:$0x1]  ;;  %81 = vst.msk [vmem:[#allocation2 + $0x3] sm:$0x1] %vm62_vm0, %v80_v16  ;;  %s6504_s16 = sld [smem:[#allocation3 + $0x87]]  ;;  %s125_s24 = scalar_lea.vmem %s8751_s1, %s7620_s17 }
  0x30   :  { %v98_v24 = vadd.f32 %v97_v7, %v96_v21  ;;  %v102_v25 = vld [vmem:[%s101_s18] sm:$0x1]  ;;  %87 = vst.msk [vmem:[#allocation2 + $0x4] sm:$0x1] %vm62_vm0, %v86_v19  ;;  %v6506_v16 = vld [vmem:[#allocation7 + $0x1] ss:$0 sm:$0xff] }
  0x31   :  { %v108_v26 = vld [vmem:[%s107_s21] sm:$0x1]  ;;  %93 = vst.msk [vmem:[#allocation2 + $0x5] sm:$0x1] %vm62_vm0, %v92_v20  ;;  %v104_v27 = vadd.f32 %v103_v14, %v102_v25  ;;  %v6505_v14 = vld [vmem:[#allocation7] ss:$0 sm:$0xff] }
  0x32   :  { %v110_v28 = vadd.f32 %v109_v15, %v108_v26  ;;  %v114_v29 = vld [vmem:[%s113_s11] sm:$0x1]  ;;  %99 = vst.msk [vmem:[#allocation2 + $0x6] sm:$0x1] %vm62_vm0, %v98_v24  ;;  %v168_v21 = vld [vmem:[%s8753_s3 + $0x30] sm:$0xff]  ;;  %s7484_s2 = smov 104  }
  0x33   :  { %v116_v30 = vadd.f32 %v115_v22, %v114_v29  ;;  %105 = vst.msk [vmem:[#allocation2 + $0x7] sm:$0x1] %vm62_vm0, %v104_v27  ;;  %v120_v31 = vld [vmem:[%s119_s29] sm:$0x1]  ;;  %s131_s28 = scalar_lea.vmem %s8751_s1, %s6501_s23  ;;  %s137_s12 = scalar_lea.vmem %s8751_s1, %s6502_s14  ;;  %v169_v22 = vld [vmem:[%s8753_s3 + $0x38] sm:$0xff]  ;;  %v171_v27 = vld [vmem:[%s8753_s3 + $0x48] sm:$0xff] }
  0x34   :  { %111 = vst.msk [vmem:[#allocation2 + $0x8] sm:$0x1] %vm62_vm0, %v110_v28  ;;  %v122_v33 = vadd.f32 %v121_v23, %v120_v31  ;;  %v126_v34 = vld [vmem:[%s125_s24] sm:$0x1]  ;;  %s143_s22 = scalar_lea.vmem %s8751_s1, %s6503_s26  ;;  %v7175_v25 = vpack.c.bf16 %v169_v22, %v168_v21  ;;  %v172_v29 = vld [vmem:[%s8753_s3 + $0x50] sm:$0xff]  ;;  %s7490_s14 = smov 16  }
  0x35   :  { %117 = vst.msk [vmem:[#allocation2 + $0x9] sm:$0x1] %vm62_vm0, %v116_v30  ;;  %v128_v36 = vadd.f32 %v127_v32, %v126_v34  ;;  %v132_v39 = vld [vmem:[%s131_s28] sm:$0x1]  ;;  %s149_s24 = scalar_lea.vmem %s8751_s1, %s6504_s16  ;;  %v173_v30 = vld [vmem:[%s8753_s3 + $0x58] sm:$0xff]  ;;  %s7483_s1 = smov 112  }
  0x36   :  { %123 = vst.msk [vmem:[#allocation2 + $0xa] sm:$0x1] %vm62_vm0, %v122_v33  ;;  %v134_v41 = vadd.f32 %v133_v35, %v132_v39  ;;  %v138_v42 = vld [vmem:[%s137_s12] sm:$0x1]  ;;  %v7183_v31 = vpack.c.bf16 %v173_v30, %v172_v29  ;;  %v6507_v32 = vld [vmem:[#allocation7 + $0x2] ss:$0 sm:$0xff] }
  0x37   :  { %129 = vst.msk [vmem:[#allocation2 + $0xb] sm:$0x1] %vm62_vm0, %v128_v36  ;;  %v144_v43 = vld [vmem:[%s143_s22] sm:$0x1]  ;;  %v140_v44 = vadd.f32 %v139_v37, %v138_v42  ;;  %v6510_v36 = vld [vmem:[#allocation7 + $0x3] ss:$0 sm:$0xff] }
  0x38   :  { %v146_v45 = vadd.f32 %v145_v38, %v144_v43  ;;  %v150_v46 = vld [vmem:[%s149_s24] sm:$0x1]  ;;  %135 = vst.msk [vmem:[#allocation2 + $0xc] sm:$0x1] %vm62_vm0, %v134_v41  ;;  %s7482_s24 = smov 120   ;;  %s7491_s26 = smov 24  }
  0x39   :  { %v152_v48 = vadd.f32 %v151_v40, %v150_v46  ;;  %141 = vst.msk [vmem:[#allocation2 + $0xd] sm:$0x1] %vm62_vm0, %v140_v44  ;;  %v162_v62 = vld [vmem:[%s8753_s3] sm:$0xff]  ;;  %v7485_v44 = vmov 0.0   ;;  %v7487_v46 = vmov 1983009808  }
  0x3a   :  { %v154_v47 = vld [vmem:[#allocation2] sm:$0xff]  ;;  %147 = vst.msk [vmem:[#allocation2 + $0xe] sm:$0x1] %vm62_vm0, %v146_v45  ;;  %v7163_v1 = vpack.c.bf16 %v163_v63, %v162_v62  ;;  %6866 = vmatprep.subr.mxu0 %v7485_v44  ;;  %6868 = vmatprep.mubr.msk.f32.mxu0 %vm7486_vm2, %v7485_v44  ;;  %v156_v45 = vlaneseq }
  0x3b   :  { %v181_v49 = vsel %vm180_vm1, %v154_v47, 0.0  ;;  %153 = vst.msk [vmem:[#allocation2 + $0xf] sm:$0x1] %vm62_vm0, %v152_v48  ;;  %v166_v4 = vld [vmem:[%s8753_s3 + $0x20] sm:$0xff] }
  0x3c   :  { %182 = vadd.xlane.f32.xlu0 %v181_v49  ;;  %7164 = vmatprep.subr.bf16.mxu1 %v7163_v1  ;;  %v7171_v6 = vpack.c.bf16 %v167_v5, %v166_v4  ;;  %v170_v26 = vld [vmem:[%s8753_s3 + $0x40] sm:$0xff]  ;;  %v7488_v49 = vmov 1934713408  }
  0x3d   :  { %7166 = vmatpush3.bf16.msra.mxu1 %v7163_v1  ;;  %v7179_v28 = vpack.c.bf16 %v171_v27, %v170_v26 }
  0x3e   :  { %7168 = vmatprep.subr.bf16.mxu1 %v7167_v3 }
  0x41   :  { %7170 = vmatpush3.bf16.msra.mxu1 %v7167_v3 }
  0x42   :  { %v155_v50 = vld [vmem:[#allocation2 + $0x8] sm:$0xff]  ;;  %7172 = vmatprep.subr.bf16.mxu1 %v7171_v6 }
  0x43   :  { %v184_v51 = vsel %vm180_vm1, %v155_v50, 0.0 }
  0x44   :  { %185 = vadd.xlane.f32.xlu0 %v184_v51  ;;  %v7774_v51 = vshrl.u32 %v156_v45, 7 }
  0xc9   :  { %v183_v52 = vpop.xlane.xlu0 %182 }
  0xca   :  { %v188_v53 = vmul.f32 0.03125, %v183_v52 }
  0xcc   :  { %v190_v54 = vsub.f32 %v154_v47, %v188_v53  ;;  %v489_v47 = vunpack.c.l.s4 %v7487_v46 }
  0xce   :  { %v192_v55 = vmul.f32 %v190_v54, %v190_v54  ;;  %v490_v52 = vunpack.c.0.s8 %v489_v47 }
  0xd0   :  { %v194_v56 = vsel %vm180_vm1, %v192_v55, 0.0 }
  0xd1   :  { %195 = vadd.xlane.f32.xlu1 %v194_v56  ;;  %v186_v57 = vpop.xlane.xlu0 %185  ;;  %v7777_v56 = vsub.s32 %v490_v52, %v7774_v51 }
  0xd2   :  { %v189_v58 = vmul.f32 0.03125, %v186_v57 }
  0xd4   :  { %v191_v59 = vsub.f32 %v155_v50, %v189_v58  ;;  %v521_v50 = vunpack.c.l.s4 %v7488_v49 }
  0xd6   :  { %v193_v60 = vmul.f32 %v191_v59, %v191_v59  ;;  %v522_v55 = vunpack.c.0.s8 %v521_v50 }
  0xd8   :  { %v197_v61 = vsel %vm180_vm1, %v193_v60, 0.0  ;;  %v7780_v63 = vsub.s32 %v522_v55, %v7774_v51 }
  0xd9   :  { %198 = vadd.xlane.f32.xlu1 %v197_v61 }
 0x15e   :  { %v196_v7 = vpop.xlane.xlu1 %195 }
 0x15f   :  { %v200_v8 = vmul.f32 0.03125, %v196_v7 }
 0x161   :  { %v202_v9 = vadd.f32 1e-05, %v200_v8 }
 0x163   :  { %7322 = vrsqrt.f32 %v202_v9 }
 0x166   :  { %v199_v10 = vpop.xlane.xlu1 %198 }
 0x167   :  { %v201_v11 = vmul.f32 0.03125, %v199_v10 }
 0x169   :  { %v203_v12 = vadd.f32 1e-05, %v201_v11 }
 0x16b   :  { %7324 = vrsqrt.f32 %v203_v12 }
 0x16d   :  { %v7323_v13 = vpop.eup %7322 }
 0x16e   :  { %v206_v15 = vmul.f32 %v7323_v13, %v190_v54 }
 0x170   :  { %v212_v17 = vmul.f32 %v6505_v14, %v206_v15 }
 0x172   :  { %v218_v18 = vadd.f32 %v6506_v16, %v212_v17 }
 0x174   :  { %6831 = vmatprep.mubr.msk.f32.mxu1 %vm180_vm1, %v218_v18 }
 0x175   :  { %v7325_v19 = vpop.eup %7324 }
 0x176   :  { %v207_v20 = vmul.f32 %v7325_v19, %v191_v59 }
 0x178   :  { %v213_v23 = vmul.f32 %v6505_v14, %v207_v20 }
 0x17a   :  { %v219_v24 = vadd.f32 %v6506_v16, %v213_v23 }
 0x17c   :  { %6832 = vmatmul.mubr.msk.f32.vlgmr.msra.gmra.mrb[0].mxu1 %vm180_vm1, %v219_v24 }
 0x17d   :  { %7174 = vmatpush3.bf16.msra.mxu1 %v7171_v6  ;;  %6842 = vmatprep.mubr.msk.f32.mxu1 %vm180_vm1, %v218_v18 }
 0x17e   :  { %7176 = vmatprep.subr.bf16.mxu1 %v7175_v25 }
 0x181   :  { %7178 = vmatpush3.bf16.msra.mxu1 %v7175_v25 }
 0x182   :  { %7180 = vmatprep.subr.bf16.mxu1 %v7179_v28 }
 0x184   :  { %6843 = vmatmul.mubr.msk.f32.vlgmr.msra.gmra.mrb[2].mxu1 %vm180_vm1, %v219_v24 }
 0x185   :  { %7182 = vmatpush3.bf16.msra.mxu1 %v7179_v28  ;;  %6853 = vmatprep.mubr.msk.f32.mxu1 %vm180_vm1, %v218_v18 }
 0x186   :  { %7184 = vmatprep.subr.bf16.mxu1 %v7183_v31 }
 0x189   :  { %7186 = vmatpush3.bf16.msra.mxu1 %v7183_v31 }
 0x18a   :  { %6856 = vmatprep.subr.mxu1 %v7485_v44 }
 0x18c   :  { %6854 = vmatmul.mubr.msk.f32.vlgmr.msra.gmra.mrb[4].mxu1 %vm180_vm1, %v219_v24 }
 0x18d   :  { %6858 = vmatprep.mubr.msk.f32.mxu1 %vm7486_vm2, %v7485_v44 }
 0x24f   :  { %v6833_v33 = vpop.f32.mrb[0].mxu1 }
 0x250   :  { %v297_v34 = vpop.f32.mrb[1].mxu1  ;;  %v7759_v43 = vadd.f32 %v6833_v33, %v6507_v32 }
 0x251   :  { %v7736_v35 = vadd.f32 %v6507_v32, %v297_v34 }
 0x253   :  { %468 = vrot.lane.b32.xlu1 %v7736_v35, %s7482_s24 }
 0x257   :  { %v6844_v37 = vpop.f32.mrb[2].mxu1 }
 0x258   :  { %v377_v38 = vpop.f32.mrb[3].mxu1  ;;  %v7749_v42 = vadd.f32 %v6844_v37, %v6510_v36 }
 0x259   :  { %v378_v39 = vadd.f32 %v6510_v36, %v377_v38 }
 0x25b   :  { %760 = vrot.lane.b32.xlu0 %v378_v39, %s7482_s24  ;;  %766 = vrot.lane.b32.xlu1 %v378_v39, %s7483_s1 }
 0x25f   :  { %v7742_v40 = vpop.f32.mrb[4].mxu1  ;;  %474 = vrot.lane.b32.xlu0 %v7736_v35, %s7483_s1  ;;  %772 = vrot.lane.b32.xlu1 %v378_v39, %s7484_s2 }
 0x260   :  { %v7747_v41 = vpop.f32.mrb[5].mxu1 }
 0x263   :  { %762 = vrot.lane.b32.xlu0 %v7749_v42, %s7482_s24  ;;  %480 = vrot.lane.b32.xlu1 %v7736_v35, %s7484_s2 }
 0x267   :  { %774 = vrot.lane.b32.xlu0 %v7749_v42, %s7484_s2  ;;  %768 = vrot.lane.b32.xlu1 %v7749_v42, %s7483_s1 }
 0x26b   :  { %476 = vrot.lane.b32.xlu0 %v7759_v43, %s7483_s1  ;;  %470 = vrot.lane.b32.xlu1 %v7759_v43, %s7482_s24 }
 0x26f   :  { %482 = vrot.lane.b32.xlu1 %v7759_v43, %s7484_s2 }
 0x2c5   :  { %v469_v48 = vpop.permute.xlu1 %468 }
 0x2cd   :  { %v761_v53 = vpop.permute.xlu0 %760  ;;  %v767_v54 = vpop.permute.xlu1 %766 }
 0x2ce   :  { %v778_v57 = vcombine.low %v378_v39, %v767_v54  ;;  %v779_v58 = vcombine.high %v378_v39, %v767_v54 }
 0x2d0   :  { %v786_v0 = vrot.slane %v778_v57, %v7777_v56  ;;  %v793_v1 = vrot.slane %v779_v58, %v7777_v56 }
 0x2d1   :  { %v475_v59 = vpop.permute.xlu0 %474  ;;  %v773_v60 = vpop.permute.xlu1 %772 }
 0x2d2   :  { %v794_v61 = vcombine.low %v761_v53, %v773_v60  ;;  %v795_v62 = vcombine.high %v761_v53, %v773_v60  ;;  %v486_v4 = vcombine.low %v7736_v35, %v475_v59  ;;  %v487_v5 = vcombine.high %v7736_v35, %v475_v59 }
 0x2d4   :  { %v802_v2 = vrot.slane %v794_v61, %v7777_v56  ;;  %v809_v3 = vrot.slane %v795_v62, %v7777_v56  ;;  %v494_v18 = vrot.slane %v486_v4, %v7777_v56  ;;  %v501_v19 = vrot.slane %v487_v5, %v7777_v56 }
 0x2d5   :  { %v763_v6 = vpop.permute.xlu0 %762  ;;  %v481_v7 = vpop.permute.xlu1 %480 }
 0x2d6   :  { %v810_v8 = vcombine.low %v786_v0, %v802_v2  ;;  %v811_v9 = vcombine.high %v786_v0, %v802_v2  ;;  %v826_v10 = vcombine.low %v793_v1, %v809_v3  ;;  %v827_v11 = vcombine.high %v793_v1, %v809_v3 }
 0x2d7   :  { %v502_v12 = vcombine.low %v469_v48, %v481_v7  ;;  %v503_v13 = vcombine.high %v469_v48, %v481_v7 }
 0x2d8   :  { %v818_v14 = vrot.slane %v810_v8, %v7780_v63  ;;  %v825_v15 = vrot.slane %v811_v9, %v7780_v63  ;;  %v834_v16 = vrot.slane %v826_v10, %v7780_v63  ;;  %v841_v17 = vrot.slane %v827_v11, %v7780_v63 }
 0x2d9   :  { %v510_v20 = vrot.slane %v502_v12, %v7777_v56  ;;  %v517_v21 = vrot.slane %v503_v13, %v7777_v56  ;;  %v775_v22 = vpop.permute.xlu0 %774  ;;  %v769_v23 = vpop.permute.xlu1 %768 }
 0x2da   :  { %v914_v24 = vcombine.low %v818_v14, %v825_v15  ;;  %v6520_v25 = vcombine.high %v818_v14, %v825_v15  ;;  %v930_v26 = vcombine.low %v834_v16, %v841_v17  ;;  %v6521_v27 = vcombine.high %v834_v16, %v841_v17 }
 0x2db   :  { %v518_v28 = vcombine.low %v494_v18, %v510_v20  ;;  %v519_v29 = vcombine.high %v494_v18, %v510_v20  ;;  %v534_v30 = vcombine.low %v501_v19, %v517_v21  ;;  %v535_v31 = vcombine.high %v501_v19, %v517_v21 }
 0x2dc   :  { %v7797_v32 = vrot.slane %v914_v24, %v7777_v56  ;;  %v7800_v33 = vrot.slane %v6520_v25, %v7777_v56  ;;  %v7803_v34 = vrot.slane %v930_v26, %v7777_v56  ;;  %v7806_v35 = vrot.slane %v6521_v27, %v7777_v56 }
 0x2dd   :  { %v526_v36 = vrot.slane %v518_v28, %v7780_v63  ;;  %v533_v37 = vrot.slane %v519_v29, %v7780_v63  ;;  %v542_v38 = vrot.slane %v534_v30, %v7780_v63  ;;  %v549_v39 = vrot.slane %v535_v31, %v7780_v63  ;;  %v471_v46 = vpop.permute.xlu1 %470  ;;  %v477_v54 = vpop.permute.xlu0 %476 }
 0x2de   :  { %v862_v47 = vcombine.low %v763_v6, %v775_v22  ;;  %v863_v48 = vcombine.high %v763_v6, %v775_v22  ;;  %v846_v58 = vcombine.low %v7749_v42, %v769_v23  ;;  %v847_v59 = vcombine.high %v7749_v42, %v769_v23 }
 0x2df   :  { %v622_v49 = vcombine.low %v526_v36, %v533_v37  ;;  %v6516_v50 = vcombine.high %v526_v36, %v533_v37  ;;  %v638_v52 = vcombine.low %v542_v38, %v549_v39  ;;  %v6517_v53 = vcombine.high %v542_v38, %v549_v39 }
 0x2e0   :  { %v870_v55 = vrot.slane %v862_v47, %v7777_v56  ;;  %v877_v57 = vrot.slane %v863_v48, %v7777_v56  ;;  %v946_v60 = vcombine.low %v7797_v32, %v7800_v33  ;;  %v962_v61 = vcombine.low %v7803_v34, %v7806_v35 }
 0x2e1   :  { %v7821_v62 = vrot.slane %v622_v49, %v7777_v56  ;;  %v7824_v0 = vrot.slane %v6516_v50, %v7777_v56  ;;  %v483_v1 = vpop.permute.xlu1 %482  ;;  %v854_v2 = vrot.slane %v846_v58, %v7777_v56  ;;  %v861_v3 = vrot.slane %v847_v59, %v7777_v56 }
 0x2e2   :  { %v554_v4 = vcombine.low %v7759_v43, %v477_v54  ;;  %v555_v42 = vcombine.high %v7759_v43, %v477_v54  ;;  %v7831_v5 = vrot.slane %v638_v52, %v7777_v56  ;;  %v7834_v6 = vrot.slane %v6517_v53, %v7777_v56 }
 0x2e3   :  { %v570_v7 = vcombine.low %v471_v46, %v483_v1  ;;  %v571_v8 = vcombine.high %v471_v46, %v483_v1  ;;  %v878_v9 = vcombine.low %v854_v2, %v870_v55  ;;  %v879_v10 = vcombine.high %v854_v2, %v870_v55 }
 0x2e4   :  { %v894_v11 = vcombine.low %v861_v3, %v877_v57  ;;  %v895_v12 = vcombine.high %v861_v3, %v877_v57  ;;  %v562_v13 = vrot.slane %v554_v4, %v7777_v56  ;;  %v569_v14 = vrot.slane %v555_v42, %v7777_v56 }
 0x2e5   :  { %v578_v15 = vrot.slane %v570_v7, %v7777_v56  ;;  %v585_v43 = vrot.slane %v571_v8, %v7777_v56  ;;  %v886_v16 = vrot.slane %v878_v9, %v7780_v63  ;;  %v893_v17 = vrot.slane %v879_v10, %v7780_v63 }
 0x2e6   :  { %v902_v18 = vrot.slane %v894_v11, %v7780_v63  ;;  %v909_v19 = vrot.slane %v895_v12, %v7780_v63  ;;  %v654_v50 = vcombine.low %v7821_v62, %v7824_v0  ;;  %v670_v52 = vcombine.low %v7831_v5, %v7834_v6 }
 0x2e7   :  { %v586_v20 = vcombine.low %v562_v13, %v578_v15  ;;  %v587_v21 = vcombine.high %v562_v13, %v578_v15  ;;  %v602_v22 = vcombine.low %v569_v14, %v585_v43  ;;  %v603_v23 = vcombine.high %v569_v14, %v585_v43 }
 0x2e8   :  { %v982_v24 = vcombine.low %v886_v16, %v893_v17  ;;  %v6522_v25 = vcombine.high %v886_v16, %v893_v17  ;;  %v998_v26 = vcombine.low %v902_v18, %v909_v19  ;;  %v6523_v27 = vcombine.high %v902_v18, %v909_v19 }
 0x2e9   :  { %v594_v28 = vrot.slane %v586_v20, %v7780_v63  ;;  %v601_v29 = vrot.slane %v587_v21, %v7780_v63  ;;  %v610_v30 = vrot.slane %v602_v22, %v7780_v63  ;;  %v617_v31 = vrot.slane %v603_v23, %v7780_v63 }
 0x2ea   :  { %v989_v36 = vrot.slane %v982_v24, %v7777_v56  ;;  %v997_v37 = vrot.slane %v6522_v25, %v7777_v56  ;;  %v1005_v38 = vrot.slane %v998_v26, %v7777_v56  ;;  %v1013_v39 = vrot.slane %v6523_v27, %v7777_v56 }
 0x2eb   :  { %v690_v46 = vcombine.low %v594_v28, %v601_v29  ;;  %v6518_v47 = vcombine.high %v594_v28, %v601_v29  ;;  %v706_v48 = vcombine.low %v610_v30, %v617_v31  ;;  %v6519_v49 = vcombine.high %v610_v30, %v617_v31 }
 0x2ec   :  { %v1014_v53 = vcombine.low %v989_v36, %v997_v37  ;;  %v1030_v54 = vcombine.low %v1005_v38, %v1013_v39  ;;  %v954_v1 = vrot.slane %v946_v60, %v7780_v63  ;;  %v970_v2 = vrot.slane %v962_v61, %v7780_v63 }
 0x2ed   :  { %v697_v55 = vrot.slane %v690_v46, %v7777_v56  ;;  %v705_v57 = vrot.slane %v6518_v47, %v7777_v56  ;;  %v713_v58 = vrot.slane %v706_v48, %v7777_v56  ;;  %v721_v59 = vrot.slane %v6519_v49, %v7777_v56 }
 0x2ee   :  { %v947_v3 = vcombine.high %v7797_v32, %v7800_v33  ;;  %v963_v4 = vcombine.high %v7803_v34, %v7806_v35  ;;  %v978_v8 = vcombine.low %v954_v1, %v970_v2  ;;  %v662_v11 = vrot.slane %v654_v50, %v7780_v63 }
 0x2ef   :  { %v722_v42 = vcombine.low %v697_v55, %v705_v57  ;;  %v738_v7 = vcombine.low %v713_v58, %v721_v59  ;;  %v1015_v12 = vcombine.high %v989_v36, %v997_v37  ;;  %v678_v60 = vrot.slane %v670_v52, %v7780_v63 }
 0x2f0   :  { %v961_v9 = vrot.slane %v947_v3, %v7780_v63  ;;  %v977_v10 = vrot.slane %v963_v4, %v7780_v63  ;;  %v655_v61 = vcombine.high %v7821_v62, %v7824_v0  ;;  %v671_v32 = vcombine.high %v7831_v5, %v7834_v6  ;;  %6857 = vmatpush3.xpose.msk.msra.mxu1 %vm1342_vm3, %v978_v8 }
 0x2f1   :  { %v1031_v33 = vcombine.high %v1005_v38, %v1013_v39  ;;  %v1022_v35 = vrot.slane %v1014_v53, %v7780_v63  ;;  %v1038_v13 = vrot.slane %v1030_v54, %v7780_v63  ;;  %6861 = vmatprep.subr.mxu1 %v7485_v44  ;;  %v686_v14 = vcombine.low %v662_v11, %v678_v60 }
 0x2f2   :  { %v980_v34 = vcombine.low %v961_v9, %v977_v10  ;;  %v669_v15 = vrot.slane %v655_v61, %v7780_v63  ;;  %v685_v43 = vrot.slane %v671_v32, %v7780_v63  ;;  %v979_v62 = vcombine.high %v954_v1, %v970_v2 }
 0x2f3   :  { %v1046_v0 = vcombine.low %v1022_v35, %v1038_v13  ;;  %v730_v5 = vrot.slane %v722_v42, %v7780_v63  ;;  %v746_v6 = vrot.slane %v738_v7, %v7780_v63  ;;  %v723_v16 = vcombine.high %v697_v55, %v705_v57  ;;  %6859 = vmatmul.mubr.msk.f32.vlgmr.msra.gmra.mrb[6].mxu1 %vm1342_vm3, %v686_v14 }
 0x2f4   :  { %6867 = vmatpush3.xpose.msk.msra.mxu0 %vm1342_vm3, %v980_v34  ;;  %v739_v17 = vcombine.high %v713_v58, %v721_v59  ;;  %v688_v18 = vcombine.low %v669_v15, %v685_v43  ;;  %6862 = vmatpush3.xpose.msk.msra.mxu1 %vm1342_vm3, %v979_v62  ;;  %v1029_v19 = vrot.slane %v1015_v12, %v7780_v63  ;;  %v159_v37 = vand.u32 127, %v156_v45 }
 0x2f5   :  { %6876 = vmatprep.subr.mxu0 %v7485_v44  ;;  %6863 = vmatprep.mubr.msk.f32.mxu1 %vm7486_vm2, %v7485_v44  ;;  %v1045_v20 = vrot.slane %v1031_v33, %v7780_v63  ;;  %v687_v21 = vcombine.high %v662_v11, %v678_v60  ;;  %v754_v22 = vcombine.low %v730_v5, %v746_v6  ;;  %v7489_v39 = vmov -1e+09  }
 0x2f6   :  { %6871 = vmatprep.subr.mxu1 %v7485_v44  ;;  %v981_v23 = vcombine.high %v961_v9, %v977_v10  ;;  %v737_v24 = vrot.slane %v723_v16, %v7780_v63  ;;  %v753_v25 = vrot.slane %v739_v17, %v7780_v63  ;;  %v689_v27 = vcombine.high %v669_v15, %v685_v43  ;;  %v6513_v43 = vld [vmem:[#allocation7 + $0x4] ss:$0 sm:$0xff] }
 0x2f7   :  { %6869 = vmatmul.mubr.msk.f32.vlgmr.msra.gmra.mrb[0].mxu0 %vm1342_vm3, %v688_v18  ;;  %6864 = vmatmul.mubr.msk.f32.vlgmr.msra.gmra.mrb[8].mxu1 %vm1342_vm3, %v687_v21  ;;  %v1048_v26 = vcombine.low %v1029_v19, %v1045_v20  ;;  %v1047_v28 = vcombine.high %v1022_v35, %v1038_v13  ;;  %v755_v29 = vcombine.high %v730_v5, %v746_v6 }
 0x2f8   :  { %6877 = vmatpush3.xpose.msk.msra.mxu0 %vm1342_vm3, %v1046_v0  ;;  %6878 = vmatprep.mubr.msk.f32.mxu0 %vm7486_vm2, %v7485_v44  ;;  %v756_v30 = vcombine.low %v737_v24, %v753_v25  ;;  %v1049_v31 = vcombine.high %v1029_v19, %v1045_v20  ;;  %v757_v36 = vcombine.high %v737_v24, %v753_v25 }
 0x2f9   :  { %6886 = vmatprep.subr.mxu0 %v7485_v44  ;;  %6872 = vmatpush3.xpose.msk.msra.mxu1 %vm1342_vm3, %v981_v23  ;;  %vm160_vm4 = vcmp.le.s32.totalorder %v159_v37, %v7774_v51  ;;  %v458_v62 = vadd.f32 %v6513_v43, %v7747_v41  ;;  %v7955_v18 = vadd.f32 %v7742_v40, %v6513_v43 }
 0x2fa   :  { %6873 = vmatprep.mubr.msk.f32.mxu1 %vm7486_vm2, %v7485_v44  ;;  %6881 = vmatprep.subr.mxu1 %v7485_v44  ;;  %v7926_v46 = vsel %vm160_vm4, 0.0, %v7489_v39 }
 0x2fb   :  { %6879 = vmatmul.mubr.msk.f32.vlgmr.msra.gmra.mrb[2].mxu0 %vm1342_vm3, %v754_v22 }
 0x2fc   :  { %6887 = vmatpush3.xpose.msk.msra.mxu0 %vm1342_vm3, %v1048_v26  ;;  %6888 = vmatprep.mubr.msk.f32.mxu0 %vm7486_vm2, %v7485_v44 }
 0x2fd   :  { %6874 = vmatmul.mubr.msk.f32.vlgmr.msra.gmra.mrb[10].mxu1 %vm1342_vm3, %v689_v27  ;;  %6896 = vmatprep.subr.mxu0 %v7485_v44 }
 0x2fe   :  { %6882 = vmatpush3.xpose.msk.msra.mxu1 %vm1342_vm3, %v1047_v28  ;;  %6883 = vmatprep.mubr.msk.f32.mxu1 %vm7486_vm2, %v7485_v44 }
 0x2ff   :  { %6891 = vmatprep.subr.mxu1 %v7485_v44  ;;  %6889 = vmatmul.mubr.msk.f32.vlgmr.msra.gmra.mrb[4].mxu0 %vm1342_vm3, %v756_v30 }
 0x300   :  { %6898 = vmatprep.mubr.msk.f32.mxu0 %vm7486_vm2, %v7485_v44 }
 0x301   :  { %6884 = vmatmul.mubr.msk.f32.vlgmr.msra.gmra.mrb[12].mxu1 %vm1342_vm3, %v755_v29 }
 0x302   :  { %6892 = vmatpush3.xpose.msk.msra.mxu1 %vm1342_vm3, %v1049_v31  ;;  %6893 = vmatprep.mubr.msk.f32.mxu1 %vm7486_vm2, %v7485_v44 }
 0x303   :  { %6901 = vmatprep.subr.mxu1 %v7485_v44 }
 0x305   :  { %6894 = vmatmul.mubr.msk.f32.vlgmr.msra.gmra.mrb[14].mxu1 %vm1342_vm3, %v757_v36 }
 0x306   :  { %6903 = vmatprep.mubr.msk.f32.mxu1 %vm7486_vm2, %v7485_v44 }
 0x3c6   :  { %v1415_v38 = vpop.f32.mrb[6].mxu1 }
 0x3c7   :  { %v1951_v47 = vmul.f32 0.35355338, %v1415_v38  ;;  %v6860_v48 = vpop.f32.mrb[7].mxu1 }
 0x3c9   :  { %v1959_v53 = vadd.f32 %v1951_v47, %v7926_v46 }
 0x3ca   :  { %v1567_v49 = vpop.f32.mrb[0].mxu0  ;;  %v1491_v54 = vpop.f32.mrb[8].mxu1 }
 0x3cb   :  { %v1953_v50 = vmul.f32 0.35355338, %v1567_v49  ;;  %v6870_v52 = vpop.f32.mrb[1].mxu0  ;;  %v1952_v55 = vmul.f32 0.35355338, %v1491_v54  ;;  %v6865_v57 = vpop.f32.mrb[9].mxu1 }
 0x3cc   :  { %v1967_v58 = vsel %vm1342_vm3, %v1959_v53, -inf }
 0x3cd   :  { %v1961_v45 = vadd.f32 %v1953_v50, %v7926_v46  ;;  %1968 = vmax.xlane.f32.xlu0 %v1967_v58  ;;  %v1960_v59 = vadd.f32 %v1952_v55, %v7926_v46 }
 0x3ce   :  { %v1719_v51 = vpop.f32.mrb[2].mxu0 }
 0x3cf   :  { %v1955_v1 = vmul.f32 0.35355338, %v1719_v51  ;;  %v6880_v2 = vpop.f32.mrb[3].mxu0  ;;  %v1973_v7 = vsel %vm1342_vm3, %v1961_v45, -inf  ;;  %v1970_v8 = vsel %vm1342_vm3, %v1960_v59, -inf }
 0x3d0   :  { %v1643_v3 = vpop.f32.mrb[10].mxu1  ;;  %1971 = vmax.xlane.f32.xlu1 %v1970_v8 }
 0x3d1   :  { %v1954_v4 = vmul.f32 0.35355338, %v1643_v3  ;;  %v6875_v42 = vpop.f32.mrb[11].mxu1  ;;  %v1963_v9 = vadd.f32 %v1955_v1, %v7926_v46  ;;  %1974 = vmax.xlane.f32.xlu0 %v1973_v7 }
 0x3d2   :  { %v1871_v10 = vpop.f32.mrb[4].mxu0 }
 0x3d3   :  { %v6890_v11 = vpop.f32.mrb[5].mxu0  ;;  %v1979_v12 = vsel %vm1342_vm3, %v1963_v9, -inf  ;;  %v1957_v32 = vmul.f32 0.35355338, %v1871_v10  ;;  %v1962_v33 = vadd.f32 %v1954_v4, %v7926_v46 }
 0x3d4   :  { %v1795_v60 = vpop.f32.mrb[12].mxu1 }
 0x3d5   :  { %v6885_v61 = vpop.f32.mrb[13].mxu1  ;;  %1980 = vmax.xlane.f32.xlu0 %v1979_v12  ;;  %v1976_v13 = vsel %vm1342_vm3, %v1962_v33, -inf  ;;  %v1965_v14 = vadd.f32 %v1957_v32, %v7926_v46  ;;  %v1956_v0 = vmul.f32 0.35355338, %v1795_v60 }
 0x3d7   :  { %v1985_v15 = vsel %vm1342_vm3, %v1965_v14, -inf  ;;  %v7945_v6 = vadd.f32 %v1956_v0, %v7926_v46 }
 0x3d8   :  { %v1947_v34 = vpop.f32.mrb[14].mxu1 }
 0x3d9   :  { %v6895_v35 = vpop.f32.mrb[15].mxu1  ;;  %1977 = vmax.xlane.f32.xlu0 %v1976_v13  ;;  %v1958_v5 = vmul.f32 0.35355338, %v1947_v34  ;;  %v1982_v16 = vsel %vm1342_vm3, %v7945_v6, -inf }
 0x3db   :  { %v7950_v17 = vadd.f32 %v1958_v5, %v7926_v46 }
 0x3dd   :  { %1986 = vmax.xlane.f32.xlu0 %v1985_v15  ;;  %v1988_v41 = vsel %vm1342_vm3, %v7950_v17, -inf }
 0x3e1   :  { %1058 = vrot.lane.b32.xlu1 %v458_v62, %s7483_s1 }
 0x3e5   :  { %1064 = vrot.lane.b32.xlu1 %v458_v62, %s7484_s2 }
 0x3f3   :  { %1052 = vrot.lane.b32.xlu0 %v458_v62, %s7482_s24 }
 0x409   :  { %1983 = vmax.xlane.f32.xlu1 %v1982_v16 }
 0x40d   :  { %1989 = vmax.xlane.f32.xlu1 %v1988_v41 }
 0x41e   :  { %1054 = vrot.lane.b32.xlu1 %v7955_v18, %s7482_s24 }
 0x45a   :  { %v1969_v19 = vpop.xlane.xlu0 %1968 }
 0x45b   :  { %v1991_v20 = vsub.f32 %v1959_v53, %v1969_v19 }
 0x45d   :  { %v1999_v21 = vmul.f32 1.442695, %v1991_v20  ;;  %v1972_v23 = vpop.xlane.xlu1 %1971 }
 0x45e   :  { %v1975_v22 = vpop.xlane.xlu0 %1974  ;;  %v1992_v25 = vsub.f32 %v1960_v59, %v1972_v23 }
 0x45f   :  { %7326 = vpow2.f32 %v1999_v21  ;;  %v1993_v24 = vsub.f32 %v1961_v45, %v1975_v22 }
 0x460   :  { %v2001_v27 = vmul.f32 1.442695, %v1992_v25 }
 0x461   :  { %v2003_v26 = vmul.f32 1.442695, %v1993_v24  ;;  %v1059_v36 = vpop.permute.xlu1 %1058 }
 0x462   :  { %v1981_v28 = vpop.xlane.xlu0 %1980  ;;  %v1070_v50 = vcombine.low %v458_v62, %v1059_v36  ;;  %v1071_v52 = vcombine.high %v458_v62, %v1059_v36 }
 0x463   :  { %7328 = vpow2.f32 %v2003_v26  ;;  %v1995_v29 = vsub.f32 %v1963_v9, %v1981_v28 }
 0x464   :  { %7330 = vpow2.f32 %v2001_v27  ;;  %v1078_v2 = vrot.slane %v1070_v50, %v7777_v56  ;;  %v1085_v3 = vrot.slane %v1071_v52, %v7777_v56 }
 0x465   :  { %v2007_v30 = vmul.f32 1.442695, %v1995_v29  ;;  %v1065_v55 = vpop.permute.xlu1 %1064 }
 0x466   :  { %v1978_v40 = vpop.xlane.xlu0 %1977 }
 0x467   :  { %7332 = vpow2.f32 %v2007_v30  ;;  %v1994_v31 = vsub.f32 %v1962_v33, %v1978_v40 }
 0x469   :  { %v7959_v37 = vpop.eup %7326  ;;  %v2005_v38 = vmul.f32 1.442695, %v1994_v31 }
 0x46a   :  { %v2015_v39 = vsel %vm1342_vm3, %v7959_v37, 0.0  ;;  %v1987_v47 = vpop.xlane.xlu0 %1986 }
 0x46b   :  { %7334 = vpow2.f32 %v2005_v38  ;;  %2016 = vadd.xlane.f32.xlu0 %v2015_v39  ;;  %v1997_v48 = vsub.f32 %v1965_v14, %v1987_v47 }
 0x46d   :  { %v7963_v49 = vpop.eup %7328  ;;  %v2011_v53 = vmul.f32 1.442695, %v1997_v48 }
 0x46e   :  { %v7965_v54 = vpop.eup %7330  ;;  %v2021_v57 = vsel %vm1342_vm3, %v7963_v49, 0.0  ;;  %v1053_v58 = vpop.permute.xlu0 %1052 }
 0x46f   :  { %7336 = vpow2.f32 %v2011_v53  ;;  %2022 = vadd.xlane.f32.xlu0 %v2021_v57  ;;  %v2018_v45 = vsel %vm1342_vm3, %v7965_v54, 0.0  ;;  %v1086_v51 = vcombine.low %v1053_v58, %v1065_v55  ;;  %v1087_v59 = vcombine.high %v1053_v58, %v1065_v55 }
 0x470   :  { %2019 = vadd.xlane.f32.xlu1 %v2018_v45 }
 0x471   :  { %v7971_v1 = vpop.eup %7332  ;;  %v1094_v4 = vrot.slane %v1086_v51, %v7777_v56  ;;  %v1101_v42 = vrot.slane %v1087_v59, %v7777_v56 }
 0x472   :  { %v2027_v7 = vsel %vm1342_vm3, %v7971_v1, 0.0 }
 0x473   :  { %v1102_v8 = vcombine.low %v1078_v2, %v1094_v4  ;;  %v1103_v9 = vcombine.high %v1078_v2, %v1094_v4  ;;  %v1118_v10 = vcombine.low %v1085_v3, %v1101_v42  ;;  %v1119_v11 = vcombine.high %v1085_v3, %v1101_v42 }
 0x474   :  { %2028 = vadd.xlane.f32.xlu1 %v2027_v7 }
 0x475   :  { %v7979_v12 = vpop.eup %7334  ;;  %v1110_v60 = vrot.slane %v1102_v8, %v7780_v63  ;;  %v1117_v61 = vrot.slane %v1103_v9, %v7780_v63  ;;  %v1126_v32 = vrot.slane %v1118_v10, %v7780_v63  ;;  %v1133_v33 = vrot.slane %v1119_v11, %v7780_v63 }
 0x476   :  { %v2024_v34 = vsel %vm1342_vm3, %v7979_v12, 0.0 }
 0x477   :  { %v1206_v35 = vcombine.low %v1110_v60, %v1117_v61  ;;  %v6524_v13 = vcombine.high %v1110_v60, %v1117_v61  ;;  %v1222_v14 = vcombine.low %v1126_v32, %v1133_v33  ;;  %v6525_v15 = vcombine.high %v1126_v32, %v1133_v33 }
 0x478   :  { %2025 = vadd.xlane.f32.xlu1 %v2024_v34 }
 0x479   :  { %v7987_v43 = vpop.eup %7336  ;;  %v1213_v62 = vrot.slane %v1206_v35, %v7777_v56  ;;  %v1221_v0 = vrot.slane %v6524_v13, %v7777_v56  ;;  %v1229_v5 = vrot.slane %v1222_v14, %v7777_v56  ;;  %v1237_v16 = vrot.slane %v6525_v15, %v7777_v56 }
 0x47a   :  { %v2033_v41 = vsel %vm1342_vm3, %v7987_v43, 0.0 }
 0x47b   :  { %2034 = vadd.xlane.f32.xlu0 %v2033_v41  ;;  %v1238_v19 = vcombine.low %v1213_v62, %v1221_v0  ;;  %v1254_v20 = vcombine.low %v1229_v5, %v1237_v16  ;;  %v1239_v21 = vcombine.high %v1213_v62, %v1221_v0  ;;  %v1255_v22 = vcombine.high %v1229_v5, %v1237_v16 }
 0x47d   :  { %v1246_v23 = vrot.slane %v1238_v19, %v7780_v63  ;;  %v1262_v24 = vrot.slane %v1254_v20, %v7780_v63  ;;  %v1253_v25 = vrot.slane %v1239_v21, %v7780_v63  ;;  %v1269_v26 = vrot.slane %v1255_v22, %v7780_v63 }
 0x47f   :  { %v1270_v27 = vcombine.low %v1246_v23, %v1262_v24  ;;  %v1271_v28 = vcombine.high %v1246_v23, %v1262_v24  ;;  %v1272_v29 = vcombine.low %v1253_v25, %v1269_v26  ;;  %v1273_v30 = vcombine.high %v1253_v25, %v1269_v26 }
 0x481   :  { %6897 = vmatpush3.msra.mxu0 %v1270_v27  ;;  %6902 = vmatpush3.msra.mxu1 %v1271_v28 }
 0x482   :  { %6906 = vmatprep.subr.mxu0 %v7485_v44  ;;  %6911 = vmatprep.subr.mxu1 %v7485_v44 }
 0x489   :  { %1066 = vrot.lane.b32.xlu1 %v7955_v18, %s7484_s2 }
 0x496   :  { %v1984_v40 = vpop.xlane.xlu1 %1983 }
 0x497   :  { %v1996_v31 = vsub.f32 %v7945_v6, %v1984_v40 }
 0x499   :  { %v2009_v36 = vmul.f32 1.442695, %v1996_v31 }
 0x49a   :  { %v1990_v38 = vpop.xlane.xlu1 %1989 }
 0x49b   :  { %7338 = vpow2.f32 %v2009_v36  ;;  %v1998_v39 = vsub.f32 %v7950_v17, %v1990_v38 }
 0x49d   :  { %v2013_v47 = vmul.f32 1.442695, %v1998_v39 }
 0x49e   :  { %v1055_v55 = vpop.permute.xlu1 %1054 }
 0x49f   :  { %7340 = vpow2.f32 %v2013_v47 }
 0x4a5   :  { %v8005_v48 = vpop.eup %7338 }
 0x4a6   :  { %v2030_v50 = vsel %vm1342_vm3, %v8005_v48, 0.0 }
 0x4a7   :  { %2031 = vadd.xlane.f32.xlu0 %v2030_v50 }
 0x4a9   :  { %v8009_v52 = vpop.eup %7340 }
 0x4aa   :  { %v2036_v53 = vsel %vm1342_vm3, %v8009_v52, 0.0 }
 0x4ab   :  { %2037 = vadd.xlane.f32.xlu0 %v2036_v53 }
 0x4c1   :  { %1060 = vrot.lane.b32.xlu0 %v7955_v18, %s7483_s1 }
 0x4f8   :  { %v2017_v6 = vpop.xlane.xlu0 %2016 }
 0x4f9   :  { %7342 = vrcp.f32 %v2017_v6 }
 0x4fc   :  { %v2023_v17 = vpop.xlane.xlu0 %2022 }
 0x4fd   :  { %7344 = vrcp.f32 %v2023_v17  ;;  %v2020_v57 = vpop.xlane.xlu1 %2019 }
 0x4fe   :  { %7346 = vrcp.f32 %v2020_v57 }
 0x501   :  { %v2029_v58 = vpop.xlane.xlu1 %2028 }
 0x503   :  { %v7343_v45 = vpop.eup %7342 }
 0x504   :  { %v2047_v51 = vmul.f32 %v7343_v45, %v7959_v37 }
 0x505   :  { %v2026_v59 = vpop.xlane.xlu1 %2025 }
 0x506   :  { %6899 = vmatmul.mubr.msk.f32.vlgmr.msra.gmra.mrb[6].mxu0 %vm1342_vm3, %v2047_v51  ;;  %7348 = vrcp.f32 %v2026_v59 }
 0x507   :  { %v7345_v2 = vpop.eup %7344  ;;  %6907 = vmatpush3.msra.mxu0 %v1272_v29  ;;  %6908 = vmatprep.mubr.msk.f32.mxu0 %vm7486_vm2, %v7485_v44  ;;  %7350 = vrcp.f32 %v2029_v58 }
 0x508   :  { %v7347_v3 = vpop.eup %7346  ;;  %v2049_v4 = vmul.f32 %v7345_v2, %v7963_v49  ;;  %6916 = vmatprep.subr.mxu0 %v7485_v44 }
 0x509   :  { %v2048_v42 = vmul.f32 %v7347_v3, %v7965_v54  ;;  %v2035_v54 = vpop.xlane.xlu0 %2034  ;;  %v1067_v8 = vpop.permute.xlu1 %1066 }
 0x50a   :  { %6909 = vmatmul.mubr.msk.f32.vlgmr.msra.gmra.mrb[8].mxu0 %vm1342_vm3, %v2049_v4  ;;  %v1154_v10 = vcombine.low %v1055_v55, %v1067_v8  ;;  %v1155_v11 = vcombine.high %v1055_v55, %v1067_v8 }
 0x50b   :  { %6904 = vmatmul.mubr.msk.f32.vlgmr.msra.gmra.mrb[16].mxu1 %vm1342_vm3, %v2048_v42  ;;  %6918 = vmatprep.mubr.msk.f32.mxu0 %vm7486_vm2, %v7485_v44 }
 0x50c   :  { %6912 = vmatpush3.msra.mxu1 %v1273_v30  ;;  %6913 = vmatprep.mubr.msk.f32.mxu1 %vm7486_vm2, %v7485_v44  ;;  %v1162_v33 = vrot.slane %v1154_v10, %v7777_v56 }
 0x50d   :  { %6921 = vmatprep.subr.mxu1 %v7485_v44 }
 0x510   :  { %v7349_v37 = vpop.eup %7348 }
 0x511   :  { %v2050_v49 = vmul.f32 %v7349_v37, %v7979_v12  ;;  %v1169_v12 = vrot.slane %v1155_v11, %v7777_v56  ;;  %v7351_v26 = vpop.eup %7350 }
 0x512   :  { %v2051_v55 = vmul.f32 %v7351_v26, %v7971_v1 }
 0x513   :  { %6914 = vmatmul.mubr.msk.f32.vlgmr.msra.gmra.mrb[18].mxu1 %vm1342_vm3, %v2050_v49 }
 0x514   :  { %6923 = vmatprep.mubr.msk.f32.mxu1 %vm7486_vm2, %v7485_v44 }
 0x534   :  { %v2032_v7 = vpop.xlane.xlu0 %2031 }
 0x535   :  { %7352 = vrcp.f32 %v2032_v7 }
 0x536   :  { %7354 = vrcp.f32 %v2035_v54 }
 0x538   :  { %v2038_v9 = vpop.xlane.xlu0 %2037 }
 0x539   :  { %7356 = vrcp.f32 %v2038_v9 }
 0x53c   :  { %v1061_v60 = vpop.permute.xlu0 %1060 }
 0x53d   :  { %v1138_v61 = vcombine.low %v7955_v18, %v1061_v60  ;;  %v1139_v32 = vcombine.high %v7955_v18, %v1061_v60 }
 0x53f   :  { %v1146_v34 = vrot.slane %v1138_v61, %v7777_v56  ;;  %v1153_v35 = vrot.slane %v1139_v32, %v7777_v56  ;;  %v7353_v40 = vpop.eup %7352 }
 0x540   :  { %v7355_v38 = vpop.eup %7354  ;;  %v2052_v17 = vmul.f32 %v7353_v40, %v8005_v48 }
 0x541   :  { %v1170_v13 = vcombine.low %v1146_v34, %v1162_v33  ;;  %v1171_v14 = vcombine.high %v1146_v34, %v1162_v33  ;;  %v1186_v15 = vcombine.low %v1153_v35, %v1169_v12  ;;  %v1187_v62 = vcombine.high %v1153_v35, %v1169_v12 }
 0x542   :  { %v2053_v45 = vmul.f32 %v7355_v38, %v7987_v43 }
 0x543   :  { %v1178_v0 = vrot.slane %v1170_v13, %v7780_v63  ;;  %v1185_v5 = vrot.slane %v1171_v14, %v7780_v63  ;;  %v1194_v18 = vrot.slane %v1186_v15, %v7780_v63  ;;  %v1201_v16 = vrot.slane %v1187_v62, %v7780_v63  ;;  %v7357_v6 = vpop.eup %7356 }
 0x544   :  { %v2054_v51 = vmul.f32 %v7357_v6, %v8009_v52 }
 0x545   :  { %v1274_v41 = vcombine.low %v1178_v0, %v1185_v5  ;;  %v6526_v19 = vcombine.high %v1178_v0, %v1185_v5  ;;  %v1290_v20 = vcombine.low %v1194_v18, %v1201_v16  ;;  %v6527_v21 = vcombine.high %v1194_v18, %v1201_v16 }
 0x547   :  { %v1281_v22 = vrot.slane %v1274_v41, %v7777_v56  ;;  %v1289_v23 = vrot.slane %v6526_v19, %v7777_v56  ;;  %v1297_v24 = vrot.slane %v1290_v20, %v7777_v56  ;;  %v1305_v25 = vrot.slane %v6527_v21, %v7777_v56 }
 0x549   :  { %v1306_v27 = vcombine.low %v1281_v22, %v1289_v23  ;;  %v1322_v28 = vcombine.low %v1297_v24, %v1305_v25  ;;  %v1307_v29 = vcombine.high %v1281_v22, %v1289_v23  ;;  %v1323_v30 = vcombine.high %v1297_v24, %v1305_v25 }
 0x54b   :  { %v1314_v31 = vrot.slane %v1306_v27, %v7780_v63  ;;  %v1330_v36 = vrot.slane %v1322_v28, %v7780_v63  ;;  %v1321_v39 = vrot.slane %v1307_v29, %v7780_v63  ;;  %v1337_v47 = vrot.slane %v1323_v30, %v7780_v63 }
 0x54d   :  { %v1338_v50 = vcombine.low %v1314_v31, %v1330_v36  ;;  %v1339_v53 = vcombine.high %v1314_v31, %v1330_v36  ;;  %v1340_v57 = vcombine.low %v1321_v39, %v1337_v47  ;;  %v1341_v58 = vcombine.high %v1321_v39, %v1337_v47 }
 0x54f   :  { %6917 = vmatpush3.msra.mxu0 %v1338_v50  ;;  %6922 = vmatpush3.msra.mxu1 %v1339_v53 }
 0x550   :  { %6919 = vmatmul.mubr.msk.f32.vlgmr.msra.gmra.mrb[10].mxu0 %vm1342_vm3, %v2051_v55  ;;  %6924 = vmatmul.mubr.msk.f32.vlgmr.msra.gmra.mrb[20].mxu1 %vm1342_vm3, %v2052_v17 }
 0x551   :  { %6926 = vmatprep.subr.mxu0 %v7485_v44  ;;  %6931 = vmatprep.subr.mxu1 %v7485_v44 }
 0x552   :  { %6927 = vmatpush3.msra.mxu0 %v1340_v57  ;;  %6932 = vmatpush3.msra.mxu1 %v1341_v58 }
 0x553   :  { %6928 = vmatprep.mubr.msk.f32.mxu0 %vm7486_vm2, %v7485_v44  ;;  %6933 = vmatprep.mubr.msk.f32.mxu1 %vm7486_vm2, %v7485_v44 }
 0x554   :  { %6929 = vmatmul.mubr.msk.f32.vlgmr.msra.gmra.mrb[12].mxu0 %vm1342_vm3, %v2053_v45  ;;  %6934 = vmatmul.mubr.msk.f32.vlgmr.msra.gmra.mrb[22].mxu1 %vm1342_vm3, %v2054_v51 }
 0x5d9   :  { %v2124_v1 = vpop.f32.mrb[6].mxu0 }
 0x5da   :  { %v6900_v48 = vpop.f32.mrb[7].mxu0 }
 0x5dd   :  { %v2270_v59 = vpop.f32.mrb[8].mxu0 }
 0x5de   :  { %v2197_v2 = vpop.f32.mrb[16].mxu1  ;;  %v2639_v3 = vcombine.low %v2124_v1, %v2270_v59  ;;  %v2640_v43 = vcombine.high %v2124_v1, %v2270_v59  ;;  %v6910_v4 = vpop.f32.mrb[9].mxu0 }
 0x5df   :  { %v6905_v52 = vpop.f32.mrb[17].mxu1 }
 0x5e0   :  { %v2647_v7 = vrot.slane %v2639_v3, %v7777_v56  ;;  %v2654_v8 = vrot.slane %v2640_v43, %v7777_v56  ;;  %v174_v3 = vld [vmem:[%s8753_s3 + $0x60] sm:$0xff]  ;;  %v175_v43 = vld [vmem:[%s8753_s3 + $0x68] sm:$0xff] }
 0x5e6   :  { %v2343_v42 = vpop.f32.mrb[18].mxu1 }
 0x5e7   :  { %v2655_v37 = vcombine.low %v2197_v2, %v2343_v42  ;;  %v2656_v49 = vcombine.high %v2197_v2, %v2343_v42  ;;  %v6915_v54 = vpop.f32.mrb[19].mxu1 }
 0x5e9   :  { %v2663_v9 = vrot.slane %v2655_v37, %v7777_v56  ;;  %v2670_v10 = vrot.slane %v2656_v49, %v7777_v56  ;;  %v7187_v49 = vpack.c.bf16 %v175_v43, %v174_v3 }
 0x5eb   :  { %v2671_v11 = vcombine.low %v2647_v7, %v2663_v9  ;;  %v2672_v60 = vcombine.high %v2647_v7, %v2663_v9  ;;  %v2687_v61 = vcombine.low %v2654_v8, %v2670_v10  ;;  %v2688_v32 = vcombine.high %v2654_v8, %v2670_v10  ;;  %7188 = vmatprep.subr.bf16.mxu0 %v7187_v49  ;;  %v176_v10 = vld [vmem:[%s8753_s3 + $0x70] sm:$0xff] }
 0x5ec   :  { %7190 = vmatpush3.bf16.msra.mxu0 %v7187_v49  ;;  %v3073_v49 = vld [vmem:[%s8754_s4 + $0x10] sm:$0xff] }
 0x5ed   :  { %v2679_v33 = vrot.slane %v2671_v11, %v7780_v63  ;;  %v2686_v12 = vrot.slane %v2672_v60, %v7780_v63  ;;  %v2695_v34 = vrot.slane %v2687_v61, %v7780_v63  ;;  %v2702_v35 = vrot.slane %v2688_v32, %v7780_v63  ;;  %v177_v11 = vld [vmem:[%s8753_s3 + $0x78] sm:$0xff] }
 0x5ef   :  { %v2775_v13 = vcombine.low %v2679_v33, %v2686_v12  ;;  %v6552_v14 = vcombine.high %v2679_v33, %v2686_v12  ;;  %v2791_v15 = vcombine.low %v2695_v34, %v2702_v35  ;;  %v6553_v62 = vcombine.high %v2695_v34, %v2702_v35 }
 0x5f0   :  { %v7191_v12 = vpack.c.bf16 %v177_v11, %v176_v10 }
 0x5f1   :  { %v2782_v0 = vrot.slane %v2775_v13, %v7777_v56  ;;  %v2790_v5 = vrot.slane %v6552_v14, %v7777_v56  ;;  %v2798_v18 = vrot.slane %v2791_v15, %v7777_v56  ;;  %v2806_v16 = vrot.slane %v6553_v62, %v7777_v56 }
 0x5f2   :  { %7192 = vmatprep.subr.bf16.mxu0 %v7191_v12 }
 0x5f3   :  { %v2808_v41 = vcombine.high %v2782_v0, %v2790_v5  ;;  %v2824_v19 = vcombine.high %v2798_v18, %v2806_v16  ;;  %v2807_v20 = vcombine.low %v2782_v0, %v2790_v5  ;;  %v2823_v21 = vcombine.low %v2798_v18, %v2806_v16  ;;  %7194 = vmatpush3.bf16.msra.mxu0 %v7191_v12 }
 0x5f5   :  { %v2822_v22 = vrot.slane %v2808_v41, %v7780_v63  ;;  %v2838_v23 = vrot.slane %v2824_v19, %v7780_v63  ;;  %v8080_v24 = vrot.slane %v2807_v20, %v7780_v63  ;;  %v8083_v25 = vrot.slane %v2823_v21, %v7780_v63 }
 0x5f7   :  { %v2841_v26 = vcombine.low %v2822_v22, %v2838_v23  ;;  %v2840_v27 = vcombine.high %v8080_v24, %v8083_v25  ;;  %v2839_v28 = vcombine.low %v8080_v24, %v8083_v25  ;;  %v2842_v29 = vcombine.high %v2822_v22, %v2838_v23  ;;  %v6556_v25 = vld [vmem:[#allocation7 + $0x5] ss:$0 sm:$0xff] }
 0x5f9   :  { %2921 = vrot.lane.b32.xlu0 %v2841_v26, %s7490_s14  ;;  %2913 = vrot.lane.b32.xlu1 %v2840_v27, %s7481_s20 }
 0x5fd   :  { %2929 = vrot.lane.b32.xlu0 %v2842_v29, %s7491_s26 }
 0x623   :  { %v2416_v30 = vpop.f32.mrb[10].mxu0  ;;  %v2489_v40 = vpop.f32.mrb[20].mxu1 }
 0x624   :  { %v6920_v31 = vpop.f32.mrb[11].mxu0  ;;  %v6925_v36 = vpop.f32.mrb[21].mxu1 }
 0x627   :  { %v2562_v38 = vpop.f32.mrb[12].mxu0  ;;  %v2635_v39 = vpop.f32.mrb[22].mxu1 }
 0x628   :  { %v2707_v47 = vcombine.low %v2416_v30, %v2562_v38  ;;  %v2708_v50 = vcombine.high %v2416_v30, %v2562_v38  ;;  %v2723_v53 = vcombine.low %v2489_v40, %v2635_v39  ;;  %v2724_v6 = vcombine.high %v2489_v40, %v2635_v39  ;;  %v6930_v55 = vpop.f32.mrb[13].mxu0  ;;  %v6935_v17 = vpop.f32.mrb[23].mxu1 }
 0x62a   :  { %v2715_v57 = vrot.slane %v2707_v47, %v7777_v56  ;;  %v2722_v58 = vrot.slane %v2708_v50, %v7777_v56  ;;  %v2731_v45 = vrot.slane %v2723_v53, %v7777_v56  ;;  %v2738_v51 = vrot.slane %v2724_v6, %v7777_v56  ;;  %v7414_v50 = vld [vmem:[#allocation2 + $0x8] sm:$0xff]  ;;  %v7415_v6 = vld [vmem:[#allocation2] sm:$0xff] }
 0x62c   :  { %v2739_v1 = vcombine.low %v2715_v57, %v2731_v45  ;;  %v2740_v48 = vcombine.high %v2715_v57, %v2731_v45  ;;  %v2755_v59 = vcombine.low %v2722_v58, %v2738_v51  ;;  %v2756_v2 = vcombine.high %v2722_v58, %v2738_v51 }
 0x62e   :  { %v2747_v4 = vrot.slane %v2739_v1, %v7780_v63  ;;  %v2754_v52 = vrot.slane %v2740_v48, %v7780_v63  ;;  %v2763_v42 = vrot.slane %v2755_v59, %v7780_v63  ;;  %v2770_v37 = vrot.slane %v2756_v2, %v7780_v63 }
 0x630   :  { %v2843_v54 = vcombine.low %v2747_v4, %v2754_v52  ;;  %v6554_v7 = vcombine.high %v2747_v4, %v2754_v52  ;;  %v2859_v8 = vcombine.low %v2763_v42, %v2770_v37  ;;  %v6555_v9 = vcombine.high %v2763_v42, %v2770_v37  ;;  %v3071_v52 = vld [vmem:[%s8754_s4] sm:$0xff]  ;;  %v3072_v42 = vld [vmem:[%s8754_s4 + $0x8] sm:$0xff] }
 0x631   :  { %v7195_v37 = vpack.c.bf16 %v3072_v42, %v3071_v52 }
 0x632   :  { %v2850_v60 = vrot.slane %v2843_v54, %v7777_v56  ;;  %v2858_v61 = vrot.slane %v6554_v7, %v7777_v56  ;;  %v2866_v32 = vrot.slane %v2859_v8, %v7777_v56  ;;  %v2874_v33 = vrot.slane %v6555_v9, %v7777_v56  ;;  %v3074_v54 = vld [vmem:[%s8754_s4 + $0x18] sm:$0xff]  ;;  %v3179_v8 = vld [vmem:[%s8755_s5] sm:$0xff]  ;;  %v3180_v9 = vld [vmem:[%s8755_s5 + $0x8] sm:$0xff] }
 0x633   :  { %7196 = vmatprep.subr.bf16.mxu1 %v7195_v37  ;;  %v7199_v7 = vpack.c.bf16 %v3074_v54, %v3073_v49  ;;  %v7203_v10 = vpack.c.bf16 %v3180_v9, %v3179_v8 }
 0x634   :  { %v2875_v34 = vcombine.low %v2850_v60, %v2858_v61  ;;  %v2891_v35 = vcombine.low %v2866_v32, %v2874_v33  ;;  %v2876_v13 = vcombine.high %v2850_v60, %v2858_v61  ;;  %v2892_v14 = vcombine.high %v2866_v32, %v2874_v33  ;;  %7198 = vmatpush3.bf16.msra.mxu1 %v7195_v37 }
 0x635   :  { %7200 = vmatprep.subr.bf16.mxu1 %v7199_v7  ;;  %7204 = vmatprep.subr.bf16.mxu0 %v7203_v10 }
 0x636   :  { %v2883_v15 = vrot.slane %v2875_v34, %v7780_v63  ;;  %v2899_v62 = vrot.slane %v2891_v35, %v7780_v63  ;;  %v2890_v0 = vrot.slane %v2876_v13, %v7780_v63  ;;  %v2906_v5 = vrot.slane %v2892_v14, %v7780_v63  ;;  %v6559_v35 = vld [vmem:[#allocation7 + $0x6] ss:$0 sm:$0xff]  ;;  %v6560_v14 = vld [vmem:[#allocation7 + $0x7] ss:$0 sm:$0xff] }
 0x638   :  { %v2908_v18 = vcombine.high %v2883_v15, %v2899_v62  ;;  %v2907_v16 = vcombine.low %v2883_v15, %v2899_v62  ;;  %v2909_v41 = vcombine.low %v2890_v0, %v2906_v5  ;;  %v2910_v19 = vcombine.high %v2890_v0, %v2906_v5  ;;  %7202 = vmatpush3.bf16.msra.mxu1 %v7199_v7 }
 0x63a   :  { %2915 = vrot.lane.b32.xlu1 %v2908_v18, %s7481_s20 }
 0x63e   :  { %2923 = vrot.lane.b32.xlu1 %v2909_v41, %s7490_s14  ;;  %v3181_v41 = vld [vmem:[%s8755_s5 + $0x10] sm:$0xff] }
 0x642   :  { %2931 = vrot.lane.b32.xlu1 %v2910_v19, %s7491_s26  ;;  %v3182_v19 = vld [vmem:[%s8755_s5 + $0x18] sm:$0xff] }
 0x66b   :  { %v2922_v20 = vpop.permute.xlu0 %2921  ;;  %v2914_v21 = vpop.permute.xlu1 %2913 }
 0x66c   :  { %v2935_v22 = vsel %vm1342_vm3, %v2839_v28, %v2914_v21  ;;  %v3183_v21 = vld [vmem:[%s8755_s5 + $0x20] sm:$0xff] }
 0x66d   :  { %v2938_v26 = vsel %vm2937_vm5, %v2935_v22, %v2922_v20  ;;  %v7207_v20 = vpack.c.bf16 %v3182_v19, %v3181_v41  ;;  %v3184_v22 = vld [vmem:[%s8755_s5 + $0x28] sm:$0xff] }
 0x66f   :  { %v2930_v23 = vpop.permute.xlu0 %2929 }
 0x670   :  { %v2941_v27 = vsel %vm2940_vm6, %v2938_v26, %v2930_v23  ;;  %v7211_v23 = vpack.c.bf16 %v3184_v22, %v3183_v21  ;;  %v3185_v26 = vld [vmem:[%s8755_s5 + $0x30] sm:$0xff]  ;;  %v6565_v21 = vld [vmem:[%s8753_s3 + $0x80] sm:$0xff]  ;;  %v6566_v22 = vld [vmem:[%s8753_s3 + $0x88] sm:$0xff] }
 0x671   :  { %6944 = vmatprep.mubr.msk.f32.mxu0 %vm180_vm1, %v2941_v27  ;;  %v3186_v27 = vld [vmem:[%s8755_s5 + $0x38] sm:$0xff] }
 0x6ac   :  { %v2916_v29 = vpop.permute.xlu1 %2915 }
 0x6ad   :  { %v2936_v40 = vsel %vm1342_vm3, %v2907_v16, %v2916_v29  ;;  %v3187_v29 = vld [vmem:[%s8755_s5 + $0x40] sm:$0xff] }
 0x6b0   :  { %v2924_v30 = vpop.permute.xlu1 %2923 }
 0x6b1   :  { %v2939_v31 = vsel %vm2937_vm5, %v2936_v40, %v2924_v30  ;;  %v7215_v30 = vpack.c.bf16 %v3186_v27, %v3185_v26  ;;  %v3188_v40 = vld [vmem:[%s8755_s5 + $0x48] sm:$0xff]  ;;  %v6567_v26 = vld [vmem:[%s8753_s3 + $0x90] sm:$0xff]  ;;  %v6568_v27 = vld [vmem:[%s8753_s3 + $0x98] sm:$0xff] }
 0x6b4   :  { %v2932_v36 = vpop.permute.xlu1 %2931 }
 0x6b5   :  { %v2942_v24 = vsel %vm2940_vm6, %v2939_v31, %v2932_v36  ;;  %v7219_v31 = vpack.c.bf16 %v3188_v40, %v3187_v29  ;;  %v3189_v36 = vld [vmem:[%s8755_s5 + $0x50] sm:$0xff]  ;;  %v7239_v29 = vpack.c.bf16 %v6568_v27, %v6567_v26  ;;  %v6570_v40 = vld [vmem:[%s8753_s3 + $0xa8] sm:$0xff] }
 0x6b6   :  { %6945 = vmatmul.mubr.msk.f32.vlgmr.msra.gmra.mrb[14].mxu0 %vm180_vm1, %v2942_v24  ;;  %v3190_v24 = vld [vmem:[%s8755_s5 + $0x58] sm:$0xff] }
 0x6b7   :  { %7206 = vmatpush3.bf16.msra.mxu0 %v7203_v10 }
 0x6b8   :  { %7208 = vmatprep.subr.bf16.mxu0 %v7207_v20 }
 0x6bb   :  { %7210 = vmatpush3.bf16.msra.mxu0 %v7207_v20 }
 0x6bc   :  { %7212 = vmatprep.subr.bf16.mxu0 %v7211_v23 }
 0x6bf   :  { %7214 = vmatpush3.bf16.msra.mxu0 %v7211_v23  ;;  %v7235_v23 = vpack.c.bf16 %v6566_v22, %v6565_v21 }
 0x6c0   :  { %7216 = vmatprep.subr.bf16.mxu0 %v7215_v30 }
 0x6c1   :  { %7236 = vmatprep.subr.bf16.mxu1 %v7235_v23 }
 0x6c3   :  { %7218 = vmatpush3.bf16.msra.mxu0 %v7215_v30  ;;  %v6569_v30 = vld [vmem:[%s8753_s3 + $0xa0] sm:$0xff] }
 0x6c4   :  { %7220 = vmatprep.subr.bf16.mxu0 %v7219_v31 }
 0x6c7   :  { %7222 = vmatpush3.bf16.msra.mxu0 %v7219_v31  ;;  %v7243_v31 = vpack.c.bf16 %v6570_v40, %v6569_v30 }
 0x789   :  { %v6946_v28 = vpop.f32.mrb[14].mxu0 }
 0x78a   :  { %v3026_v38 = vadd.f32 %v6946_v28, %v6556_v25  ;;  %v3020_v39 = vpop.f32.mrb[15].mxu0  ;;  %v3191_v28 = vld [vmem:[%s8755_s5 + $0x60] sm:$0xff] }
 0x78b   :  { %v3021_v47 = vadd.f32 %v6556_v25, %v3020_v39  ;;  %v7223_v25 = vpack.c.bf16 %v3190_v24, %v3189_v36 }
 0x78c   :  { %v8134_v53 = vadd.f32 %v7414_v50, %v3026_v38  ;;  %v3192_v38 = vld [vmem:[%s8755_s5 + $0x68] sm:$0xff]  ;;  %v3194_v50 = vld [vmem:[%s8755_s5 + $0x78] sm:$0xff] }
 0x78d   :  { %v8136_v55 = vadd.f32 %v7415_v6, %v3021_v47  ;;  %7224 = vmatprep.subr.bf16.mxu0 %v7223_v25  ;;  %v7227_v39 = vpack.c.bf16 %v3192_v38, %v3191_v28  ;;  %v3193_v47 = vld [vmem:[%s8755_s5 + $0x70] sm:$0xff] }
 0x78e   :  { %v3036_v17 = vsel %vm180_vm1, %v8134_v53, 0.0  ;;  %7226 = vmatpush3.bf16.msra.mxu0 %v7223_v25  ;;  %v7231_v6 = vpack.c.bf16 %v3194_v50, %v3193_v47  ;;  %v6581_v50 = vld [vmem:[#allocation7 + $0x9] ss:$0 sm:$0xff] }
 0x78f   :  { %3037 = vadd.xlane.f32.xlu1 %v3036_v17  ;;  %v3033_v57 = vsel %vm180_vm1, %v8136_v55, 0.0  ;;  %7228 = vmatprep.subr.bf16.mxu0 %v7227_v39  ;;  %v6561_v17 = vld [vmem:[%s8756_s6] ss:$0 sm:$0xff] }
 0x790   :  { %3034 = vadd.xlane.f32.xlu0 %v3033_v57 }
 0x792   :  { %7230 = vmatpush3.bf16.msra.mxu0 %v7227_v39 }
 0x793   :  { %7232 = vmatprep.subr.bf16.mxu0 %v7231_v6 }
 0x796   :  { %7234 = vmatpush3.bf16.msra.mxu0 %v7231_v6 }
 0x797   :  { %7036 = vmatprep.subr.mxu0 %v7485_v44 }
 0x81c   :  { %v3038_v58 = vpop.xlane.xlu1 %3037 }
 0x81d   :  { %v3040_v45 = vmul.f32 0.03125, %v3038_v58  ;;  %v3035_v51 = vpop.xlane.xlu0 %3034 }
 0x81e   :  { %v3039_v1 = vmul.f32 0.03125, %v3035_v51 }
 0x81f   :  { %v3042_v48 = vsub.f32 %v8134_v53, %v3040_v45 }
 0x820   :  { %v3041_v59 = vsub.f32 %v8136_v55, %v3039_v1 }
 0x821   :  { %v3044_v43 = vmul.f32 %v3042_v48, %v3042_v48 }
 0x822   :  { %v3043_v2 = vmul.f32 %v3041_v59, %v3041_v59 }
 0x823   :  { %v3048_v4 = vsel %vm180_vm1, %v3044_v43, 0.0 }
 0x824   :  { %v3045_v3 = vsel %vm180_vm1, %v3043_v2, 0.0 }
 0x825   :  { %3046 = vadd.xlane.f32.xlu0 %v3045_v3 }
 0x829   :  { %3049 = vadd.xlane.f32.xlu0 %v3048_v4 }
 0x8b2   :  { %v3047_v11 = vpop.xlane.xlu0 %3046 }
 0x8b3   :  { %v3051_v60 = vmul.f32 0.03125, %v3047_v11 }
 0x8b5   :  { %v3053_v61 = vadd.f32 1e-05, %v3051_v60 }
 0x8b6   :  { %v3050_v32 = vpop.xlane.xlu0 %3049 }
 0x8b7   :  { %7358 = vrsqrt.f32 %v3053_v61  ;;  %v3052_v33 = vmul.f32 0.03125, %v3050_v32  ;;  %v6564_v61 = vld [vmem:[#allocation7 + $0x8] ss:$0 sm:$0xff] }
 0x8b9   :  { %v3054_v12 = vadd.f32 1e-05, %v3052_v33 }
 0x8bb   :  { %7360 = vrsqrt.f32 %v3054_v12 }
 0x8c1   :  { %v7359_v34 = vpop.eup %7358 }
 0x8c2   :  { %v3057_v13 = vmul.f32 %v7359_v34, %v3041_v59 }
 0x8c4   :  { %v3063_v15 = vmul.f32 %v6559_v35, %v3057_v13 }
 0x8c5   :  { %v7361_v62 = vpop.eup %7360 }
 0x8c6   :  { %v3058_v0 = vmul.f32 %v7361_v62, %v3042_v48  ;;  %v3069_v5 = vadd.f32 %v6560_v14, %v3063_v15 }
 0x8c8   :  { %v3064_v18 = vmul.f32 %v6559_v35, %v3058_v0  ;;  %6955 = vmatprep.mubr.msk.f32.mxu1 %vm180_vm1, %v3069_v5 }
 0x8ca   :  { %v3070_v16 = vadd.f32 %v6560_v14, %v3064_v18 }
 0x8cc   :  { %6956 = vmatmul.mubr.msk.f32.vlgmr.msra.gmra.mrb[24].mxu1 %vm180_vm1, %v3070_v16 }
 0x8cd   :  { %7238 = vmatpush3.bf16.msra.mxu1 %v7235_v23 }
 0x8ce   :  { %7240 = vmatprep.subr.bf16.mxu1 %v7239_v29 }
 0x8d1   :  { %7242 = vmatpush3.bf16.msra.mxu1 %v7239_v29 }
 0x8d2   :  { %7244 = vmatprep.subr.bf16.mxu1 %v7243_v31 }
 0x99f   :  { %v6957_v57 = vpop.f32.mrb[24].mxu1 }
 0x9a0   :  { %v3158_v58 = vadd.f32 %v6957_v57, %v6561_v17  ;;  %v3152_v45 = vpop.f32.mrb[25].mxu1 }
 0x9a1   :  { %v3153_v51 = vadd.f32 %v6561_v17, %v3152_v45 }
 0x9a2   :  { %v3164_v1 = vmul.f32 0.044715, %v3158_v58  ;;  %v3162_v10 = vmul.f32 0.5, %v3158_v58 }
 0x9a3   :  { %v3163_v48 = vmul.f32 0.044715, %v3153_v51  ;;  %v3161_v8 = vmul.f32 0.5, %v3153_v51 }
 0x9a4   :  { %v3166_v59 = vmul.f32 %v3164_v1, %v3158_v58  ;;  %v6571_v1 = vld [vmem:[%s8753_s3 + $0xb0] sm:$0xff] }
 0x9a5   :  { %v3165_v2 = vmul.f32 %v3163_v48, %v3153_v51  ;;  %v6572_v48 = vld [vmem:[%s8753_s3 + $0xb8] sm:$0xff] }
 0x9a6   :  { %v3168_v3 = vmul.f32 %v3166_v59, %v3158_v58 }
 0x9a7   :  { %v3167_v43 = vmul.f32 %v3165_v2, %v3153_v51 }
 0x9a8   :  { %v3170_v4 = vadd.f32 %v3168_v3, %v3158_v58  ;;  %v6582_v58 = vld [vmem:[#allocation7 + $0xa] ss:$0 sm:$0xff]  ;;  %v7247_v3 = vpack.c.bf16 %v6572_v48, %v6571_v1 }
 0x9a9   :  { %v3169_v52 = vadd.f32 %v3167_v43, %v3153_v51  ;;  %v6573_v43 = vld [vmem:[%s8753_s3 + $0xc0] sm:$0xff] }
 0x9aa   :  { %v3172_v42 = vmul.f32 0.7978846, %v3170_v4  ;;  %v6574_v4 = vld [vmem:[%s8753_s3 + $0xc8] sm:$0xff] }
 0x9ab   :  { %v3171_v37 = vmul.f32 0.7978846, %v3169_v52  ;;  %v7251_v52 = vpack.c.bf16 %v6574_v4, %v6573_v43 }
 0x9ac   :  { %7362 = vtanh.f32 %v3172_v42  ;;  %v6575_v42 = vld [vmem:[%s8753_s3 + $0xd0] sm:$0xff] }
 0x9ad   :  { %7364 = vtanh.f32 %v3171_v37  ;;  %v6576_v37 = vld [vmem:[%s8753_s3 + $0xd8] sm:$0xff] }
 0x9b6   :  { %v7363_v49 = vpop.eup %7362 }
 0x9b7   :  { %v7365_v54 = vpop.eup %7364  ;;  %v3176_v7 = vadd.f32 1.0, %v7363_v49  ;;  %v7255_v49 = vpack.c.bf16 %v6576_v37, %v6575_v42 }
 0x9b8   :  { %v3175_v9 = vadd.f32 1.0, %v7365_v54  ;;  %v6583_v54 = vld [vmem:[#allocation7 + $0xb] ss:$0 sm:$0xff] }
 0x9b9   :  { %v3178_v60 = vmul.f32 %v3176_v7, %v3162_v10  ;;  %v6586_v10 = vld [vmem:[#allocation7 + $0xc] ss:$0 sm:$0xff] }
 0x9ba   :  { %v3177_v11 = vmul.f32 %v3175_v9, %v3161_v8 }
 0x9bc   :  { %6990 = vmatprep.mubr.f32.mxu0 %v3177_v11 }
 0x9bd   :  { %6991 = vmatmul.mubr.f32.vlgmr.msra.gmra.mrb[16].mxu0 %v3178_v60 }
 0x9be   :  { %7038 = vmatprep.mubr.msk.f32.mxu0 %vm7486_vm2, %v7485_v44 }
 0xa90   :  { %v6992_v32 = vpop.f32.mrb[16].mxu0 }
 0xa91   :  { %v3272_v33 = vadd.f32 %v6992_v32, %v6564_v61  ;;  %v3266_v12 = vpop.f32.mrb[17].mxu0 }
 0xa92   :  { %v3267_v34 = vadd.f32 %v6564_v61, %v3266_v12 }
 0xa93   :  { %v8215_v35 = vadd.f32 %v3272_v33, %v8134_v53 }
 0xa94   :  { %v8218_v13 = vadd.f32 %v3267_v34, %v8136_v55 }
 0xa95   :  { %v3299_v14 = vsel %vm180_vm1, %v8215_v35, 0.0 }
 0xa96   :  { %3300 = vadd.xlane.f32.xlu1 %v3299_v14  ;;  %v3296_v15 = vsel %vm180_vm1, %v8218_v13, 0.0 }
 0xa97   :  { %3297 = vadd.xlane.f32.xlu0 %v3296_v15 }
 0xb23   :  { %v3301_v62 = vpop.xlane.xlu1 %3300 }
 0xb24   :  { %v3303_v0 = vmul.f32 0.03125, %v3301_v62  ;;  %v3298_v5 = vpop.xlane.xlu0 %3297 }
 0xb25   :  { %v3302_v18 = vmul.f32 0.03125, %v3298_v5 }
 0xb26   :  { %v3305_v16 = vsub.f32 %v8215_v35, %v3303_v0 }
 0xb27   :  { %v3304_v53 = vsub.f32 %v8218_v13, %v3302_v18 }
 0xb28   :  { %v3307_v41 = vmul.f32 %v3305_v16, %v3305_v16 }
 0xb29   :  { %v3306_v19 = vmul.f32 %v3304_v53, %v3304_v53 }
 0xb2a   :  { %v3311_v55 = vsel %vm180_vm1, %v3307_v41, 0.0 }
 0xb2b   :  { %3312 = vadd.xlane.f32.xlu1 %v3311_v55  ;;  %v3308_v20 = vsel %vm180_vm1, %v3306_v19, 0.0 }
 0xb2c   :  { %3309 = vadd.xlane.f32.xlu0 %v3308_v20 }
 0xbb8   :  { %v3313_v36 = vpop.xlane.xlu1 %3312 }
 0xbb9   :  { %v3315_v24 = vmul.f32 0.03125, %v3313_v36  ;;  %v3310_v25 = vpop.xlane.xlu0 %3309 }
 0xbba   :  { %v3314_v28 = vmul.f32 0.03125, %v3310_v25 }
 0xbbb   :  { %v3317_v38 = vadd.f32 1e-05, %v3315_v24 }
 0xbbc   :  { %v3316_v39 = vadd.f32 1e-05, %v3314_v28 }
 0xbbd   :  { %7366 = vrsqrt.f32 %v3317_v38 }
 0xbbe   :  { %7368 = vrsqrt.f32 %v3316_v39 }
 0xbc7   :  { %v7367_v47 = vpop.eup %7366 }
 0xbc8   :  { %v7369_v6 = vpop.eup %7368  ;;  %v3321_v17 = vmul.f32 %v7367_v47, %v3305_v16 }
 0xbc9   :  { %v3320_v57 = vmul.f32 %v7369_v6, %v3304_v53 }
 0xbca   :  { %v3327_v45 = vmul.f32 %v6581_v50, %v3321_v17 }
 0xbcb   :  { %v3326_v51 = vmul.f32 %v6581_v50, %v3320_v57 }
 0xbcc   :  { %v3333_v2 = vadd.f32 %v6582_v58, %v3327_v45 }
 0xbcd   :  { %v3332_v59 = vadd.f32 %v6582_v58, %v3326_v51 }
 0xbcf   :  { %7001 = vmatprep.mubr.msk.f32.mxu1 %vm180_vm1, %v3332_v59 }
 0xbd0   :  { %7002 = vmatmul.mubr.msk.f32.vlgmr.msra.gmra.mrb[26].mxu1 %vm180_vm1, %v3333_v2 }
 0xbd1   :  { %7246 = vmatpush3.bf16.msra.mxu1 %v7243_v31  ;;  %7012 = vmatprep.mubr.msk.f32.mxu1 %vm180_vm1, %v3332_v59 }
 0xbd2   :  { %7248 = vmatprep.subr.bf16.mxu1 %v7247_v3 }
 0xbd5   :  { %7250 = vmatpush3.bf16.msra.mxu1 %v7247_v3 }
 0xbd6   :  { %7252 = vmatprep.subr.bf16.mxu1 %v7251_v52 }
 0xbd8   :  { %7013 = vmatmul.mubr.msk.f32.vlgmr.msra.gmra.mrb[28].mxu1 %vm180_vm1, %v3333_v2 }
 0xbd9   :  { %7254 = vmatpush3.bf16.msra.mxu1 %v7251_v52  ;;  %7023 = vmatprep.mubr.msk.f32.mxu1 %vm180_vm1, %v3332_v59 }
 0xbda   :  { %7256 = vmatprep.subr.bf16.mxu1 %v7255_v49 }
 0xbdd   :  { %7258 = vmatpush3.bf16.msra.mxu1 %v7255_v49 }
 0xbde   :  { %7026 = vmatprep.subr.mxu1 %v7485_v44 }
 0xbe0   :  { %7024 = vmatmul.mubr.msk.f32.vlgmr.msra.gmra.mrb[30].mxu1 %vm180_vm1, %v3333_v2 }
 0xbe1   :  { %7028 = vmatprep.mubr.msk.f32.mxu1 %vm7486_vm2, %v7485_v44 }
 0xca3   :  { %v7003_v7 = vpop.f32.mrb[26].mxu1 }
 0xca4   :  { %v3411_v8 = vpop.f32.mrb[27].mxu1  ;;  %v8291_v34 = vadd.f32 %v7003_v7, %v6583_v54 }
 0xca5   :  { %v3412_v9 = vadd.f32 %v6583_v54, %v3411_v8 }
 0xca7   :  { %3582 = vrot.lane.b32.xlu1 %v3412_v9, %s7482_s24 }
 0xcab   :  { %v7014_v11 = vpop.f32.mrb[28].mxu1 }
 0xcac   :  { %v3491_v60 = vpop.f32.mrb[29].mxu1  ;;  %v8282_v12 = vadd.f32 %v7014_v11, %v6586_v10 }
 0xcad   :  { %v3492_v61 = vadd.f32 %v6586_v10, %v3491_v60 }
 0xcaf   :  { %3874 = vrot.lane.b32.xlu0 %v3492_v61, %s7482_s24  ;;  %3880 = vrot.lane.b32.xlu1 %v3492_v61, %s7483_s1 }
 0xcb3   :  { %v8276_v32 = vpop.f32.mrb[30].mxu1  ;;  %3588 = vrot.lane.b32.xlu0 %v3412_v9, %s7483_s1  ;;  %3886 = vrot.lane.b32.xlu1 %v3492_v61, %s7484_s2 }
 0xcb4   :  { %v8280_v33 = vpop.f32.mrb[31].mxu1 }
 0xcb7   :  { %3876 = vrot.lane.b32.xlu0 %v8282_v12, %s7482_s24  ;;  %3594 = vrot.lane.b32.xlu1 %v3412_v9, %s7484_s2 }
 0xcbb   :  { %3888 = vrot.lane.b32.xlu0 %v8282_v12, %s7484_s2  ;;  %3882 = vrot.lane.b32.xlu1 %v8282_v12, %s7483_s1 }
 0xcbf   :  { %3590 = vrot.lane.b32.xlu0 %v8291_v34, %s7483_s1  ;;  %3584 = vrot.lane.b32.xlu1 %v8291_v34, %s7482_s24 }
 0xcc3   :  { %3596 = vrot.lane.b32.xlu1 %v8291_v34, %s7484_s2 }
 0xd19   :  { %v3583_v14 = vpop.permute.xlu1 %3582 }
 0xd21   :  { %v3875_v15 = vpop.permute.xlu0 %3874  ;;  %v3881_v62 = vpop.permute.xlu1 %3880 }
 0xd22   :  { %v3892_v0 = vcombine.low %v3492_v61, %v3881_v62  ;;  %v3893_v5 = vcombine.high %v3492_v61, %v3881_v62 }
 0xd24   :  { %v3900_v19 = vrot.slane %v3892_v0, %v7777_v56  ;;  %v3907_v55 = vrot.slane %v3893_v5, %v7777_v56 }
 0xd25   :  { %v3589_v18 = vpop.permute.xlu0 %3588  ;;  %v3887_v16 = vpop.permute.xlu1 %3886 }
 0xd26   :  { %v3908_v53 = vcombine.low %v3875_v15, %v3887_v16  ;;  %v3909_v41 = vcombine.high %v3875_v15, %v3887_v16  ;;  %v3600_v22 = vcombine.low %v3412_v9, %v3589_v18  ;;  %v3601_v23 = vcombine.high %v3412_v9, %v3589_v18 }
 0xd28   :  { %v3916_v20 = vrot.slane %v3908_v53, %v7777_v56  ;;  %v3923_v21 = vrot.slane %v3909_v41, %v7777_v56  ;;  %v3608_v47 = vrot.slane %v3600_v22, %v7777_v56  ;;  %v3615_v50 = vrot.slane %v3601_v23, %v7777_v56 }
 0xd29   :  { %v3595_v26 = vpop.permute.xlu1 %3594  ;;  %v3877_v31 = vpop.permute.xlu0 %3876 }
 0xd2a   :  { %v3924_v27 = vcombine.low %v3900_v19, %v3916_v20  ;;  %v3925_v29 = vcombine.high %v3900_v19, %v3916_v20  ;;  %v3940_v30 = vcombine.low %v3907_v55, %v3923_v21  ;;  %v3941_v40 = vcombine.high %v3907_v55, %v3923_v21 }
 0xd2b   :  { %v3616_v36 = vcombine.low %v3583_v14, %v3595_v26  ;;  %v3617_v24 = vcombine.high %v3583_v14, %v3595_v26 }
 0xd2c   :  { %v3932_v25 = vrot.slane %v3924_v27, %v7780_v63  ;;  %v3939_v28 = vrot.slane %v3925_v29, %v7780_v63  ;;  %v3948_v38 = vrot.slane %v3940_v30, %v7780_v63  ;;  %v3955_v39 = vrot.slane %v3941_v40, %v7780_v63 }
 0xd2d   :  { %v3624_v6 = vrot.slane %v3616_v36, %v7777_v56  ;;  %v3631_v17 = vrot.slane %v3617_v24, %v7777_v56  ;;  %v3883_v57 = vpop.permute.xlu1 %3882  ;;  %v3889_v37 = vpop.permute.xlu0 %3888 }
 0xd2e   :  { %v4028_v58 = vcombine.low %v3932_v25, %v3939_v28  ;;  %v6596_v45 = vcombine.high %v3932_v25, %v3939_v28  ;;  %v4044_v51 = vcombine.low %v3948_v38, %v3955_v39  ;;  %v6597_v1 = vcombine.high %v3948_v38, %v3955_v39 }
 0xd2f   :  { %v3632_v48 = vcombine.low %v3608_v47, %v3624_v6  ;;  %v3633_v59 = vcombine.high %v3608_v47, %v3624_v6  ;;  %v3648_v2 = vcombine.low %v3615_v50, %v3631_v17  ;;  %v3649_v3 = vcombine.high %v3615_v50, %v3631_v17 }
 0xd30   :  { %v8312_v43 = vrot.slane %v4028_v58, %v7777_v56  ;;  %v8315_v4 = vrot.slane %v6596_v45, %v7777_v56  ;;  %v8318_v52 = vrot.slane %v4044_v51, %v7777_v56  ;;  %v8321_v42 = vrot.slane %v6597_v1, %v7777_v56 }
 0xd31   :  { %v3640_v49 = vrot.slane %v3632_v48, %v7780_v63  ;;  %v3647_v54 = vrot.slane %v3633_v59, %v7780_v63  ;;  %v3656_v7 = vrot.slane %v3648_v2, %v7780_v63  ;;  %v3663_v8 = vrot.slane %v3649_v3, %v7780_v63  ;;  %v3585_v9 = vpop.permute.xlu1 %3584  ;;  %v3591_v22 = vpop.permute.xlu0 %3590 }
 0xd32   :  { %v4060_v10 = vcombine.low %v8312_v43, %v8315_v4  ;;  %v4061_v11 = vcombine.high %v8312_v43, %v8315_v4  ;;  %v3976_v62 = vcombine.low %v3877_v31, %v3889_v37  ;;  %v3977_v0 = vcombine.high %v3877_v31, %v3889_v37 }
 0xd33   :  { %v3736_v60 = vcombine.low %v3640_v49, %v3647_v54  ;;  %v6592_v61 = vcombine.high %v3640_v49, %v3647_v54  ;;  %v3752_v14 = vcombine.low %v3656_v7, %v3663_v8  ;;  %v6593_v15 = vcombine.high %v3656_v7, %v3663_v8 }
 0xd34   :  { %v3960_v5 = vcombine.low %v8282_v12, %v3883_v57  ;;  %v3961_v18 = vcombine.high %v8282_v12, %v3883_v57  ;;  %v4076_v16 = vcombine.low %v8318_v52, %v8321_v42  ;;  %v4077_v53 = vcombine.high %v8318_v52, %v8321_v42 }
 0xd35   :  { %v8338_v41 = vrot.slane %v3736_v60, %v7777_v56  ;;  %v8341_v19 = vrot.slane %v6592_v61, %v7777_v56  ;;  %v3984_v55 = vrot.slane %v3976_v62, %v7777_v56  ;;  %v3991_v20 = vrot.slane %v3977_v0, %v7777_v56  ;;  %v3597_v23 = vpop.permute.xlu1 %3596 }
 0xd36   :  { %v3968_v21 = vrot.slane %v3960_v5, %v7777_v56  ;;  %v3975_v12 = vrot.slane %v3961_v18, %v7777_v56  ;;  %v8348_v26 = vrot.slane %v3752_v14, %v7777_v56  ;;  %v8351_v27 = vrot.slane %v6593_v15, %v7777_v56 }
 0xd37   :  { %v3768_v29 = vcombine.low %v8338_v41, %v8341_v19  ;;  %v3769_v30 = vcombine.high %v8338_v41, %v8341_v19  ;;  %v3668_v25 = vcombine.low %v8291_v34, %v3591_v22  ;;  %v3669_v28 = vcombine.high %v8291_v34, %v3591_v22 }
 0xd38   :  { %v3992_v40 = vcombine.low %v3968_v21, %v3984_v55  ;;  %v3993_v31 = vcombine.high %v3968_v21, %v3984_v55  ;;  %v4008_v36 = vcombine.low %v3975_v12, %v3991_v20  ;;  %v4009_v24 = vcombine.high %v3975_v12, %v3991_v20 }
 0xd39   :  { %v3684_v38 = vcombine.low %v3585_v9, %v3597_v23  ;;  %v3685_v39 = vcombine.high %v3585_v9, %v3597_v23  ;;  %v3676_v57 = vrot.slane %v3668_v25, %v7777_v56  ;;  %v3683_v58 = vrot.slane %v3669_v28, %v7777_v56 }
 0xd3a   :  { %v4000_v47 = vrot.slane %v3992_v40, %v7780_v63  ;;  %v4007_v50 = vrot.slane %v3993_v31, %v7780_v63  ;;  %v4016_v6 = vrot.slane %v4008_v36, %v7780_v63  ;;  %v4023_v17 = vrot.slane %v4009_v24, %v7780_v63 }
 0xd3b   :  { %v3692_v45 = vrot.slane %v3684_v38, %v7777_v56  ;;  %v3699_v51 = vrot.slane %v3685_v39, %v7777_v56  ;;  %v3784_v14 = vcombine.low %v8348_v26, %v8351_v27  ;;  %v3785_v15 = vcombine.high %v8348_v26, %v8351_v27 }
 0xd3c   :  { %v4096_v1 = vcombine.low %v4000_v47, %v4007_v50  ;;  %v6598_v34 = vcombine.high %v4000_v47, %v4007_v50  ;;  %v4112_v48 = vcombine.low %v4016_v6, %v4023_v17  ;;  %v6599_v59 = vcombine.high %v4016_v6, %v4023_v17 }
 0xd3d   :  { %v3700_v2 = vcombine.low %v3676_v57, %v3692_v45  ;;  %v3701_v3 = vcombine.high %v3676_v57, %v3692_v45  ;;  %v3716_v52 = vcombine.low %v3683_v58, %v3699_v51  ;;  %v3717_v42 = vcombine.high %v3683_v58, %v3699_v51 }
 0xd3e   :  { %v4103_v37 = vrot.slane %v4096_v1, %v7777_v56  ;;  %v4111_v49 = vrot.slane %v6598_v34, %v7777_v56  ;;  %v4119_v54 = vrot.slane %v4112_v48, %v7777_v56  ;;  %v4127_v7 = vrot.slane %v6599_v59, %v7777_v56 }
 0xd3f   :  { %v3708_v8 = vrot.slane %v3700_v2, %v7780_v63  ;;  %v3715_v9 = vrot.slane %v3701_v3, %v7780_v63  ;;  %v3724_v60 = vrot.slane %v3716_v52, %v7780_v63  ;;  %v3731_v61 = vrot.slane %v3717_v42, %v7780_v63 }
 0xd40   :  { %v4128_v62 = vcombine.low %v4103_v37, %v4111_v49  ;;  %v4144_v0 = vcombine.low %v4119_v54, %v4127_v7  ;;  %v4068_v55 = vrot.slane %v4060_v10, %v7780_v63  ;;  %v4084_v20 = vrot.slane %v4076_v16, %v7780_v63 }
 0xd41   :  { %v3804_v5 = vcombine.low %v3708_v8, %v3715_v9  ;;  %v6594_v18 = vcombine.high %v3708_v8, %v3715_v9  ;;  %v3820_v41 = vcombine.low %v3724_v60, %v3731_v61  ;;  %v6595_v19 = vcombine.high %v3724_v60, %v3731_v61 }
 0xd42   :  { %v4075_v21 = vrot.slane %v4061_v11, %v7780_v63  ;;  %v4091_v12 = vrot.slane %v4077_v53, %v7780_v63  ;;  %v4092_v40 = vcombine.low %v4068_v55, %v4084_v20  ;;  %v3776_v10 = vrot.slane %v3768_v29, %v7780_v63 }
 0xd43   :  { %v3811_v22 = vrot.slane %v3804_v5, %v7777_v56  ;;  %v3819_v23 = vrot.slane %v6594_v18, %v7777_v56  ;;  %v3827_v26 = vrot.slane %v3820_v41, %v7777_v56  ;;  %v3835_v27 = vrot.slane %v6595_v19, %v7777_v56 }
 0xd44   :  { %v4094_v31 = vcombine.low %v4075_v21, %v4091_v12  ;;  %v3792_v16 = vrot.slane %v3784_v14, %v7780_v63  ;;  %v4129_v36 = vcombine.high %v4103_v37, %v4111_v49  ;;  %v4145_v4 = vcombine.high %v4119_v54, %v4127_v7  ;;  %7027 = vmatpush3.xpose.msk.msra.mxu1 %vm1342_vm3, %v4092_v40 }
 0xd45   :  { %v3836_v24 = vcombine.low %v3811_v22, %v3819_v23  ;;  %v3852_v43 = vcombine.low %v3827_v26, %v3835_v27  ;;  %v3783_v53 = vrot.slane %v3769_v30, %v7780_v63  ;;  %7031 = vmatprep.subr.mxu1 %v7485_v44  ;;  %v4093_v25 = vcombine.high %v4068_v55, %v4084_v20 }
 0xd46   :  { %7037 = vmatpush3.xpose.msk.msra.mxu0 %vm1342_vm3, %v4094_v31  ;;  %v3800_v11 = vcombine.low %v3776_v10, %v3792_v16  ;;  %v3799_v28 = vrot.slane %v3785_v15, %v7780_v63  ;;  %v4136_v29 = vrot.slane %v4128_v62, %v7780_v63  ;;  %v4152_v38 = vrot.slane %v4144_v0, %v7780_v63 }
 0xd47   :  { %7046 = vmatprep.subr.mxu0 %v7485_v44  ;;  %v3844_v39 = vrot.slane %v3836_v24, %v7780_v63  ;;  %v3860_v47 = vrot.slane %v3852_v43, %v7780_v63  ;;  %v3837_v50 = vcombine.high %v3811_v22, %v3819_v23  ;;  %v3853_v6 = vcombine.high %v3827_v26, %v3835_v27 }
 0xd48   :  { %7029 = vmatmul.mubr.msk.f32.vlgmr.msra.gmra.mrb[32].mxu1 %vm1342_vm3, %v3800_v11  ;;  %v3802_v30 = vcombine.low %v3783_v53, %v3799_v28  ;;  %v4160_v17 = vcombine.low %v4136_v29, %v4152_v38  ;;  %v4143_v57 = vrot.slane %v4129_v36, %v7780_v63  ;;  %v4159_v58 = vrot.slane %v4145_v4, %v7780_v63 }
 0xd49   :  { %7032 = vmatpush3.xpose.msk.msra.mxu1 %vm1342_vm3, %v4093_v25  ;;  %7033 = vmatprep.mubr.msk.f32.mxu1 %vm7486_vm2, %v7485_v44  ;;  %v3801_v45 = vcombine.high %v3776_v10, %v3792_v16  ;;  %v3868_v51 = vcombine.low %v3844_v39, %v3860_v47  ;;  %v4095_v1 = vcombine.high %v4075_v21, %v4091_v12 }
 0xd4a   :  { %7039 = vmatmul.mubr.msk.f32.vlgmr.msra.gmra.mrb[18].mxu0 %vm1342_vm3, %v3802_v30  ;;  %7041 = vmatprep.subr.mxu1 %v7485_v44  ;;  %v3851_v34 = vrot.slane %v3837_v50, %v7780_v63  ;;  %v3867_v48 = vrot.slane %v3853_v6, %v7780_v63  ;;  %v4162_v59 = vcombine.low %v4143_v57, %v4159_v58 }
 0xd4b   :  { %7047 = vmatpush3.xpose.msk.msra.mxu0 %vm1342_vm3, %v4160_v17  ;;  %7048 = vmatprep.mubr.msk.f32.mxu0 %vm7486_vm2, %v7485_v44  ;;  %v3803_v2 = vcombine.high %v3783_v53, %v3799_v28  ;;  %v4161_v3 = vcombine.high %v4136_v29, %v4152_v38  ;;  %v3869_v52 = vcombine.high %v3844_v39, %v3860_v47  ;;  %v6589_v29 = vld [vmem:[#allocation7 + $0xd] ss:$0 sm:$0xff] }
 0xd4c   :  { %7034 = vmatmul.mubr.msk.f32.vlgmr.msra.gmra.mrb[34].mxu1 %vm1342_vm3, %v3801_v45  ;;  %7056 = vmatprep.subr.mxu0 %v7485_v44  ;;  %v3870_v42 = vcombine.low %v3851_v34, %v3867_v48  ;;  %v4163_v37 = vcombine.high %v4143_v57, %v4159_v58  ;;  %v3871_v49 = vcombine.high %v3851_v34, %v3867_v48 }
 0xd4d   :  { %7042 = vmatpush3.xpose.msk.msra.mxu1 %vm1342_vm3, %v4095_v1  ;;  %7043 = vmatprep.mubr.msk.f32.mxu1 %vm7486_vm2, %v7485_v44  ;;  %v3572_v38 = vadd.f32 %v6589_v29, %v8280_v33  ;;  %v8472_v17 = vadd.f32 %v8276_v32, %v6589_v29 }
 0xd4e   :  { %7051 = vmatprep.subr.mxu1 %v7485_v44  ;;  %7049 = vmatmul.mubr.msk.f32.vlgmr.msra.gmra.mrb[20].mxu0 %vm1342_vm3, %v3868_v51 }
 0xd4f   :  { %7057 = vmatpush3.xpose.msk.msra.mxu0 %vm1342_vm3, %v4162_v59  ;;  %7058 = vmatprep.mubr.msk.f32.mxu0 %vm7486_vm2, %v7485_v44 }
 0xd50   :  { %7044 = vmatmul.mubr.msk.f32.vlgmr.msra.gmra.mrb[36].mxu1 %vm1342_vm3, %v3803_v2  ;;  %7066 = vmatprep.subr.mxu0 %v7485_v44 }
 0xd51   :  { %7052 = vmatpush3.xpose.msk.msra.mxu1 %vm1342_vm3, %v4161_v3  ;;  %7053 = vmatprep.mubr.msk.f32.mxu1 %vm7486_vm2, %v7485_v44 }
 0xd52   :  { %7061 = vmatprep.subr.mxu1 %v7485_v44  ;;  %7059 = vmatmul.mubr.msk.f32.vlgmr.msra.gmra.mrb[22].mxu0 %vm1342_vm3, %v3870_v42 }
 0xd53   :  { %7068 = vmatprep.mubr.msk.f32.mxu0 %vm7486_vm2, %v7485_v44 }
 0xd54   :  { %7054 = vmatmul.mubr.msk.f32.vlgmr.msra.gmra.mrb[38].mxu1 %vm1342_vm3, %v3869_v52 }
 0xd55   :  { %7062 = vmatpush3.xpose.msk.msra.mxu1 %vm1342_vm3, %v4163_v37  ;;  %7063 = vmatprep.mubr.msk.f32.mxu1 %vm7486_vm2, %v7485_v44 }
 0xd56   :  { %7071 = vmatprep.subr.mxu1 %v7485_v44 }
 0xd58   :  { %7064 = vmatmul.mubr.msk.f32.vlgmr.msra.gmra.mrb[40].mxu1 %vm1342_vm3, %v3871_v49 }
 0xd59   :  { %7073 = vmatprep.mubr.msk.f32.mxu1 %vm7486_vm2, %v7485_v44 }
 0xe1b   :  { %v4528_v54 = vpop.f32.mrb[32].mxu1 }
 0xe1c   :  { %v5064_v7 = vmul.f32 0.35355338, %v4528_v54  ;;  %v7030_v8 = vpop.f32.mrb[33].mxu1 }
 0xe1d   :  { %v4680_v9 = vpop.f32.mrb[18].mxu0 }
 0xe1e   :  { %v5066_v60 = vmul.f32 0.35355338, %v4680_v9  ;;  %v7040_v61 = vpop.f32.mrb[19].mxu0  ;;  %v5072_v14 = vadd.f32 %v5064_v7, %v7926_v46 }
 0xe1f   :  { %v4604_v15 = vpop.f32.mrb[34].mxu1 }
 0xe20   :  { %v5065_v62 = vmul.f32 0.35355338, %v4604_v15  ;;  %v7035_v0 = vpop.f32.mrb[35].mxu1  ;;  %v5080_v5 = vsel %vm1342_vm3, %v5072_v14, -inf  ;;  %v5074_v18 = vadd.f32 %v5066_v60, %v7926_v46 }
 0xe21   :  { %5081 = vmax.xlane.f32.xlu0 %v5080_v5  ;;  %v4832_v41 = vpop.f32.mrb[20].mxu0 }
 0xe22   :  { %v5073_v19 = vadd.f32 %v5065_v62, %v7926_v46  ;;  %v5068_v55 = vmul.f32 0.35355338, %v4832_v41  ;;  %v7050_v20 = vpop.f32.mrb[21].mxu0  ;;  %v5086_v23 = vsel %vm1342_vm3, %v5074_v18, -inf }
 0xe23   :  { %v4756_v21 = vpop.f32.mrb[36].mxu1 }
 0xe24   :  { %v5067_v12 = vmul.f32 0.35355338, %v4756_v21  ;;  %v7045_v22 = vpop.f32.mrb[37].mxu1  ;;  %v5083_v26 = vsel %vm1342_vm3, %v5073_v19, -inf  ;;  %v5076_v27 = vadd.f32 %v5068_v55, %v7926_v46 }
 0xe25   :  { %5087 = vmax.xlane.f32.xlu0 %v5086_v23  ;;  %5084 = vmax.xlane.f32.xlu1 %v5083_v26  ;;  %v4984_v40 = vpop.f32.mrb[22].mxu0 }
 0xe26   :  { %v7060_v31 = vpop.f32.mrb[23].mxu0  ;;  %v5092_v10 = vsel %vm1342_vm3, %v5076_v27, -inf  ;;  %v5070_v24 = vmul.f32 0.35355338, %v4984_v40  ;;  %v5075_v43 = vadd.f32 %v5067_v12, %v7926_v46 }
 0xe27   :  { %v4908_v16 = vpop.f32.mrb[38].mxu1 }
 0xe28   :  { %v7055_v36 = vpop.f32.mrb[39].mxu1  ;;  %v5089_v53 = vsel %vm1342_vm3, %v5075_v43, -inf  ;;  %v5078_v25 = vadd.f32 %v5070_v24, %v7926_v46  ;;  %v5069_v39 = vmul.f32 0.35355338, %v4908_v16 }
 0xe29   :  { %5093 = vmax.xlane.f32.xlu0 %v5092_v10 }
 0xe2a   :  { %v5098_v28 = vsel %vm1342_vm3, %v5078_v25, -inf  ;;  %v8462_v50 = vadd.f32 %v5069_v39, %v7926_v46 }
 0xe2b   :  { %v5060_v4 = vpop.f32.mrb[40].mxu1 }
 0xe2c   :  { %v7065_v11 = vpop.f32.mrb[41].mxu1  ;;  %v5071_v47 = vmul.f32 0.35355338, %v5060_v4  ;;  %v5095_v6 = vsel %vm1342_vm3, %v8462_v50, -inf }
 0xe2d   :  { %5090 = vmax.xlane.f32.xlu0 %v5089_v53 }
 0xe2e   :  { %v8467_v30 = vadd.f32 %v5071_v47, %v7926_v46 }
 0xe30   :  { %v5101_v33 = vsel %vm1342_vm3, %v8467_v30, -inf }
 0xe31   :  { %5099 = vmax.xlane.f32.xlu0 %v5098_v28 }
 0xe36   :  { %4172 = vrot.lane.b32.xlu1 %v3572_v38, %s7483_s1 }
 0xe3a   :  { %4178 = vrot.lane.b32.xlu1 %v3572_v38, %s7484_s2 }
 0xe47   :  { %4166 = vrot.lane.b32.xlu0 %v3572_v38, %s7482_s24 }
 0xe5e   :  { %5096 = vmax.xlane.f32.xlu1 %v5095_v6 }
 0xe62   :  { %5102 = vmax.xlane.f32.xlu1 %v5101_v33 }
 0xe73   :  { %4168 = vrot.lane.b32.xlu1 %v8472_v17, %s7482_s24 }
 0xeae   :  { %v5082_v57 = vpop.xlane.xlu0 %5081 }
 0xeaf   :  { %v5104_v58 = vsub.f32 %v5072_v14, %v5082_v57 }
 0xeb1   :  { %v5112_v45 = vmul.f32 1.442695, %v5104_v58 }
 0xeb2   :  { %v5088_v51 = vpop.xlane.xlu0 %5087  ;;  %v5085_v1 = vpop.xlane.xlu1 %5084 }
 0xeb3   :  { %7370 = vpow2.f32 %v5112_v45  ;;  %v5106_v34 = vsub.f32 %v5074_v18, %v5088_v51  ;;  %v5105_v46 = vsub.f32 %v5073_v19, %v5085_v1 }
 0xeb5   :  { %v5116_v48 = vmul.f32 1.442695, %v5106_v34  ;;  %v5114_v59 = vmul.f32 1.442695, %v5105_v46 }
 0xeb6   :  { %v5094_v2 = vpop.xlane.xlu0 %5093  ;;  %v4173_v37 = vpop.permute.xlu1 %4172 }
 0xeb7   :  { %7372 = vpow2.f32 %v5116_v48  ;;  %v5108_v3 = vsub.f32 %v5076_v27, %v5094_v2  ;;  %v4184_v61 = vcombine.low %v3572_v38, %v4173_v37  ;;  %v4185_v14 = vcombine.high %v3572_v38, %v4173_v37 }
 0xeb8   :  { %7374 = vpow2.f32 %v5114_v59 }
 0xeb9   :  { %v5120_v52 = vmul.f32 1.442695, %v5108_v3  ;;  %v4192_v21 = vrot.slane %v4184_v61, %v7777_v56  ;;  %v4199_v12 = vrot.slane %v4185_v14, %v7777_v56 }
 0xeba   :  { %v5091_v32 = vpop.xlane.xlu0 %5090  ;;  %v4179_v0 = vpop.permute.xlu1 %4178 }
 0xebb   :  { %7376 = vpow2.f32 %v5120_v52  ;;  %v5107_v42 = vsub.f32 %v5075_v43, %v5091_v32 }
 0xebd   :  { %v8476_v49 = vpop.eup %7370  ;;  %v5118_v54 = vmul.f32 1.442695, %v5107_v42 }
 0xebe   :  { %v5128_v7 = vsel %vm1342_vm3, %v8476_v49, 0.0  ;;  %v5100_v8 = vpop.xlane.xlu0 %5099 }
 0xebf   :  { %7378 = vpow2.f32 %v5118_v54  ;;  %5129 = vadd.xlane.f32.xlu0 %v5128_v7  ;;  %v5110_v9 = vsub.f32 %v5078_v25, %v5100_v8 }
 0xec1   :  { %v8480_v60 = vpop.eup %7372  ;;  %v5124_v15 = vmul.f32 1.442695, %v5110_v9 }
 0xec2   :  { %v8482_v62 = vpop.eup %7374  ;;  %v5134_v5 = vsel %vm1342_vm3, %v8480_v60, 0.0  ;;  %v4167_v18 = vpop.permute.xlu0 %4166 }
 0xec3   :  { %7380 = vpow2.f32 %v5124_v15  ;;  %5135 = vadd.xlane.f32.xlu0 %v5134_v5  ;;  %v5131_v41 = vsel %vm1342_vm3, %v8482_v62, 0.0  ;;  %v4200_v19 = vcombine.low %v4167_v18, %v4179_v0  ;;  %v4201_v55 = vcombine.high %v4167_v18, %v4179_v0 }
 0xec4   :  { %5132 = vadd.xlane.f32.xlu1 %v5131_v41 }
 0xec5   :  { %v8488_v20 = vpop.eup %7376  ;;  %v4208_v22 = vrot.slane %v4200_v19, %v7777_v56  ;;  %v4215_v23 = vrot.slane %v4201_v55, %v7777_v56 }
 0xec6   :  { %v5140_v26 = vsel %vm1342_vm3, %v8488_v20, 0.0 }
 0xec7   :  { %v4216_v27 = vcombine.low %v4192_v21, %v4208_v22  ;;  %v4217_v40 = vcombine.high %v4192_v21, %v4208_v22  ;;  %v4232_v31 = vcombine.low %v4199_v12, %v4215_v23  ;;  %v4233_v10 = vcombine.high %v4199_v12, %v4215_v23 }
 0xec8   :  { %5141 = vadd.xlane.f32.xlu1 %v5140_v26 }
 0xec9   :  { %v8496_v16 = vpop.eup %7378  ;;  %v4224_v36 = vrot.slane %v4216_v27, %v7780_v63  ;;  %v4231_v24 = vrot.slane %v4217_v40, %v7780_v63  ;;  %v4240_v43 = vrot.slane %v4232_v31, %v7780_v63  ;;  %v4247_v4 = vrot.slane %v4233_v10, %v7780_v63 }
 0xeca   :  { %v5137_v11 = vsel %vm1342_vm3, %v8496_v16, 0.0 }
 0xecb   :  { %v4320_v53 = vcombine.low %v4224_v36, %v4231_v24  ;;  %v6600_v25 = vcombine.high %v4224_v36, %v4231_v24  ;;  %v4336_v28 = vcombine.low %v4240_v43, %v4247_v4  ;;  %v6601_v29 = vcombine.high %v4240_v43, %v4247_v4 }
 0xecc   :  { %5138 = vadd.xlane.f32.xlu1 %v5137_v11 }
 0xecd   :  { %v8504_v38 = vpop.eup %7380  ;;  %v4327_v39 = vrot.slane %v4320_v53, %v7777_v56  ;;  %v4335_v47 = vrot.slane %v6600_v25, %v7777_v56  ;;  %v4343_v6 = vrot.slane %v4336_v28, %v7777_v56  ;;  %v4351_v33 = vrot.slane %v6601_v29, %v7777_v56 }
 0xece   :  { %v5146_v57 = vsel %vm1342_vm3, %v8504_v38, 0.0 }
 0xecf   :  { %5147 = vadd.xlane.f32.xlu0 %v5146_v57  ;;  %v4352_v58 = vcombine.low %v4327_v39, %v4335_v47  ;;  %v4368_v45 = vcombine.low %v4343_v6, %v4351_v33  ;;  %v4353_v51 = vcombine.high %v4327_v39, %v4335_v47  ;;  %v4369_v1 = vcombine.high %v4343_v6, %v4351_v33 }
 0xed1   :  { %v4360_v34 = vrot.slane %v4352_v58, %v7780_v63  ;;  %v4376_v46 = vrot.slane %v4368_v45, %v7780_v63  ;;  %v4367_v48 = vrot.slane %v4353_v51, %v7780_v63  ;;  %v4383_v59 = vrot.slane %v4369_v1, %v7780_v63 }
 0xed3   :  { %v4384_v2 = vcombine.low %v4360_v34, %v4376_v46  ;;  %v4385_v3 = vcombine.high %v4360_v34, %v4376_v46  ;;  %v4386_v52 = vcombine.low %v4367_v48, %v4383_v59  ;;  %v4387_v32 = vcombine.high %v4367_v48, %v4383_v59 }
 0xed5   :  { %7067 = vmatpush3.msra.mxu0 %v4384_v2  ;;  %7072 = vmatpush3.msra.mxu1 %v4385_v3 }
 0xed6   :  { %7076 = vmatprep.subr.mxu0 %v7485_v44  ;;  %7081 = vmatprep.subr.mxu1 %v7485_v44 }
 0xedd   :  { %4180 = vrot.lane.b32.xlu1 %v8472_v17, %s7484_s2 }
 0xeeb   :  { %v5097_v42 = vpop.xlane.xlu1 %5096 }
 0xeec   :  { %v5109_v37 = vsub.f32 %v8462_v50, %v5097_v42 }
 0xeee   :  { %v5122_v54 = vmul.f32 1.442695, %v5109_v37 }
 0xeef   :  { %v5103_v7 = vpop.xlane.xlu1 %5102 }
 0xef0   :  { %7382 = vpow2.f32 %v5122_v54  ;;  %v5111_v8 = vsub.f32 %v8467_v30, %v5103_v7 }
 0xef2   :  { %v5126_v9 = vmul.f32 1.442695, %v5111_v8 }
 0xef3   :  { %v4169_v5 = vpop.permute.xlu1 %4168 }
 0xef4   :  { %7384 = vpow2.f32 %v5126_v9 }
 0xefa   :  { %v8522_v61 = vpop.eup %7382 }
 0xefb   :  { %v5143_v14 = vsel %vm1342_vm3, %v8522_v61, 0.0 }
 0xefc   :  { %5144 = vadd.xlane.f32.xlu0 %v5143_v14 }
 0xefe   :  { %v8526_v15 = vpop.eup %7384 }
 0xeff   :  { %v5149_v0 = vsel %vm1342_vm3, %v8526_v15, 0.0 }
 0xf00   :  { %5150 = vadd.xlane.f32.xlu0 %v5149_v0 }
 0xf16   :  { %4174 = vrot.lane.b32.xlu0 %v8472_v17, %s7483_s1 }
 0xf4c   :  { %v5130_v50 = vpop.xlane.xlu0 %5129 }
 0xf4d   :  { %7386 = vrcp.f32 %v5130_v50 }
 0xf50   :  { %v5136_v30 = vpop.xlane.xlu0 %5135 }
 0xf51   :  { %7388 = vrcp.f32 %v5136_v30  ;;  %v5133_v18 = vpop.xlane.xlu1 %5132 }
 0xf52   :  { %7390 = vrcp.f32 %v5133_v18 }
 0xf55   :  { %v5142_v41 = vpop.xlane.xlu1 %5141 }
 0xf57   :  { %v7387_v19 = vpop.eup %7386 }
 0xf58   :  { %v5160_v55 = vmul.f32 %v7387_v19, %v8476_v49 }
 0xf59   :  { %v5139_v21 = vpop.xlane.xlu1 %5138 }
 0xf5a   :  { %7069 = vmatmul.mubr.msk.f32.vlgmr.msra.gmra.mrb[24].mxu0 %vm1342_vm3, %v5160_v55  ;;  %7392 = vrcp.f32 %v5139_v21 }
 0xf5b   :  { %v7389_v12 = vpop.eup %7388  ;;  %7077 = vmatpush3.msra.mxu0 %v4386_v52  ;;  %7078 = vmatprep.mubr.msk.f32.mxu0 %vm7486_vm2, %v7485_v44  ;;  %7394 = vrcp.f32 %v5142_v41 }
 0xf5c   :  { %v7391_v22 = vpop.eup %7390  ;;  %v5162_v23 = vmul.f32 %v7389_v12, %v8480_v60  ;;  %7086 = vmatprep.subr.mxu0 %v7485_v44 }
 0xf5d   :  { %v5161_v26 = vmul.f32 %v7391_v22, %v8482_v62  ;;  %v5148_v62 = vpop.xlane.xlu0 %5147  ;;  %v4181_v40 = vpop.permute.xlu1 %4180 }
 0xf5e   :  { %7079 = vmatmul.mubr.msk.f32.vlgmr.msra.gmra.mrb[26].mxu0 %vm1342_vm3, %v5162_v23  ;;  %v4268_v10 = vcombine.low %v4169_v5, %v4181_v40  ;;  %v4269_v36 = vcombine.high %v4169_v5, %v4181_v40 }
 0xf5f   :  { %7074 = vmatmul.mubr.msk.f32.vlgmr.msra.gmra.mrb[42].mxu1 %vm1342_vm3, %v5161_v26  ;;  %7088 = vmatprep.mubr.msk.f32.mxu0 %vm7486_vm2, %v7485_v44 }
 0xf60   :  { %7082 = vmatpush3.msra.mxu1 %v4387_v32  ;;  %7083 = vmatprep.mubr.msk.f32.mxu1 %vm7486_vm2, %v7485_v44  ;;  %v4276_v11 = vrot.slane %v4268_v10, %v7777_v56 }
 0xf61   :  { %7091 = vmatprep.subr.mxu1 %v7485_v44 }
 0xf64   :  { %v7393_v49 = vpop.eup %7392 }
 0xf65   :  { %v5163_v60 = vmul.f32 %v7393_v49, %v8496_v16  ;;  %v4283_v16 = vrot.slane %v4269_v36, %v7777_v56  ;;  %v7395_v2 = vpop.eup %7394 }
 0xf66   :  { %v5164_v30 = vmul.f32 %v7395_v2, %v8488_v20 }
 0xf67   :  { %7084 = vmatmul.mubr.msk.f32.vlgmr.msra.gmra.mrb[44].mxu1 %vm1342_vm3, %v5163_v60 }
 0xf68   :  { %7093 = vmatprep.mubr.msk.f32.mxu1 %vm7486_vm2, %v7485_v44 }
 0xf89   :  { %v5145_v27 = vpop.xlane.xlu0 %5144 }
 0xf8a   :  { %7396 = vrcp.f32 %v5145_v27 }
 0xf8b   :  { %7398 = vrcp.f32 %v5148_v62 }
 0xf8d   :  { %v5151_v31 = vpop.xlane.xlu0 %5150 }
 0xf8e   :  { %7400 = vrcp.f32 %v5151_v31 }
 0xf91   :  { %v4175_v24 = vpop.permute.xlu0 %4174 }
 0xf92   :  { %v4252_v43 = vcombine.low %v8472_v17, %v4175_v24  ;;  %v4253_v4 = vcombine.high %v8472_v17, %v4175_v24 }
 0xf94   :  { %v4260_v53 = vrot.slane %v4252_v43, %v7777_v56  ;;  %v4267_v25 = vrot.slane %v4253_v4, %v7777_v56  ;;  %v7397_v37 = vpop.eup %7396 }
 0xf95   :  { %v7399_v8 = vpop.eup %7398  ;;  %v5165_v18 = vmul.f32 %v7397_v37, %v8522_v61 }
 0xf96   :  { %v4284_v28 = vcombine.low %v4260_v53, %v4276_v11  ;;  %v4285_v29 = vcombine.high %v4260_v53, %v4276_v11  ;;  %v4300_v39 = vcombine.low %v4267_v25, %v4283_v16  ;;  %v4301_v47 = vcombine.high %v4267_v25, %v4283_v16 }
 0xf97   :  { %v5166_v55 = vmul.f32 %v7399_v8, %v8504_v38 }
 0xf98   :  { %v4292_v6 = vrot.slane %v4284_v28, %v7780_v63  ;;  %v4299_v33 = vrot.slane %v4285_v29, %v7780_v63  ;;  %v4308_v17 = vrot.slane %v4300_v39, %v7780_v63  ;;  %v4315_v57 = vrot.slane %v4301_v47, %v7780_v63  ;;  %v7401_v5 = vpop.eup %7400 }
 0xf99   :  { %v5167_v21 = vmul.f32 %v7401_v5, %v8526_v15 }
 0xf9a   :  { %v4388_v58 = vcombine.low %v4292_v6, %v4299_v33  ;;  %v6602_v45 = vcombine.high %v4292_v6, %v4299_v33  ;;  %v4404_v51 = vcombine.low %v4308_v17, %v4315_v57  ;;  %v6603_v1 = vcombine.high %v4308_v17, %v4315_v57 }
 0xf9c   :  { %v4395_v34 = vrot.slane %v4388_v58, %v7777_v56  ;;  %v4403_v46 = vrot.slane %v6602_v45, %v7777_v56  ;;  %v4411_v48 = vrot.slane %v4404_v51, %v7777_v56  ;;  %v4419_v59 = vrot.slane %v6603_v1, %v7777_v56 }
 0xf9e   :  { %v4420_v3 = vcombine.low %v4395_v34, %v4403_v46  ;;  %v4436_v52 = vcombine.low %v4411_v48, %v4419_v59  ;;  %v4421_v32 = vcombine.high %v4395_v34, %v4403_v46  ;;  %v4437_v42 = vcombine.high %v4411_v48, %v4419_v59 }
 0xfa0   :  { %v4428_v54 = vrot.slane %v4420_v3, %v7780_v63  ;;  %v4444_v7 = vrot.slane %v4436_v52, %v7780_v63  ;;  %v4435_v9 = vrot.slane %v4421_v32, %v7780_v63  ;;  %v4451_v14 = vrot.slane %v4437_v42, %v7780_v63 }
 0xfa2   :  { %v4452_v0 = vcombine.low %v4428_v54, %v4444_v7  ;;  %v4453_v50 = vcombine.high %v4428_v54, %v4444_v7  ;;  %v4454_v41 = vcombine.low %v4435_v9, %v4451_v14  ;;  %v4455_v19 = vcombine.high %v4435_v9, %v4451_v14 }
 0xfa4   :  { %7087 = vmatpush3.msra.mxu0 %v4452_v0  ;;  %7092 = vmatpush3.msra.mxu1 %v4453_v50 }
 0xfa5   :  { %7089 = vmatmul.mubr.msk.f32.vlgmr.msra.gmra.mrb[28].mxu0 %vm1342_vm3, %v5164_v30  ;;  %7094 = vmatmul.mubr.msk.f32.vlgmr.msra.gmra.mrb[46].mxu1 %vm1342_vm3, %v5165_v18 }
 0xfa6   :  { %7096 = vmatprep.subr.mxu0 %v7485_v44  ;;  %7101 = vmatprep.subr.mxu1 %v7485_v44 }
 0xfa7   :  { %7097 = vmatpush3.msra.mxu0 %v4454_v41  ;;  %7102 = vmatpush3.msra.mxu1 %v4455_v19 }
 0xfa8   :  { %7098 = vmatprep.mubr.msk.f32.mxu0 %vm7486_vm2, %v7485_v44  ;;  %7103 = vmatprep.mubr.msk.f32.mxu1 %vm7486_vm2, %v7485_v44 }
 0xfa9   :  { %7099 = vmatmul.mubr.msk.f32.vlgmr.msra.gmra.mrb[30].mxu0 %vm1342_vm3, %v5166_v55  ;;  %7104 = vmatmul.mubr.msk.f32.vlgmr.msra.gmra.mrb[48].mxu1 %vm1342_vm3, %v5167_v21 }
0x102d   :  { %v5237_v20 = vpop.f32.mrb[24].mxu0 }
0x102e   :  { %v7070_v61 = vpop.f32.mrb[25].mxu0 }
0x1031   :  { %v5383_v12 = vpop.f32.mrb[26].mxu0 }
0x1032   :  { %v5310_v22 = vpop.f32.mrb[42].mxu1  ;;  %v5752_v23 = vcombine.low %v5237_v20, %v5383_v12  ;;  %v5753_v38 = vcombine.high %v5237_v20, %v5383_v12  ;;  %v7080_v26 = vpop.f32.mrb[27].mxu0 }
0x1033   :  { %v7075_v15 = vpop.f32.mrb[43].mxu1 }
0x1034   :  { %v5760_v40 = vrot.slane %v5752_v23, %v7777_v56  ;;  %v5767_v44 = vrot.slane %v5753_v38, %v7777_v56  ;;  %v6577_v23 = vld [vmem:[%s8753_s3 + $0xe0] sm:$0xff]  ;;  %v6578_v38 = vld [vmem:[%s8753_s3 + $0xe8] sm:$0xff] }
0x103a   :  { %v5456_v49 = vpop.f32.mrb[44].mxu1 }
0x103b   :  { %v5768_v60 = vcombine.low %v5310_v22, %v5456_v49  ;;  %v5769_v62 = vcombine.high %v5310_v22, %v5456_v49  ;;  %v7085_v27 = vpop.f32.mrb[45].mxu1 }
0x103d   :  { %v5776_v31 = vrot.slane %v5768_v60, %v7777_v56  ;;  %v5783_v10 = vrot.slane %v5769_v62, %v7777_v56  ;;  %v7259_v62 = vpack.c.bf16 %v6578_v38, %v6577_v23  ;;  %v6639_v23 = vld [vmem:[%s8754_s4 + $0x30] sm:$0xff]  ;;  %v6640_v38 = vld [vmem:[%s8754_s4 + $0x38] sm:$0xff] }
0x103f   :  { %v5784_v36 = vcombine.low %v5760_v40, %v5776_v31  ;;  %v5785_v24 = vcombine.high %v5760_v40, %v5776_v31  ;;  %v5800_v43 = vcombine.low %v5767_v44, %v5783_v10  ;;  %v5801_v4 = vcombine.high %v5767_v44, %v5783_v10  ;;  %7260 = vmatprep.subr.bf16.mxu0 %v7259_v62  ;;  %v6579_v10 = vld [vmem:[%s8753_s3 + $0xf0] sm:$0xff] }
0x1040   :  { %7262 = vmatpush3.bf16.msra.mxu0 %v7259_v62 }
0x1041   :  { %v5792_v11 = vrot.slane %v5784_v36, %v7780_v63  ;;  %v5799_v16 = vrot.slane %v5785_v24, %v7780_v63  ;;  %v5808_v53 = vrot.slane %v5800_v43, %v7780_v63  ;;  %v5815_v25 = vrot.slane %v5801_v4, %v7780_v63  ;;  %v6580_v36 = vld [vmem:[%s8753_s3 + $0xf8] sm:$0xff] }
0x1043   :  { %v5888_v28 = vcombine.low %v5792_v11, %v5799_v16  ;;  %v6628_v29 = vcombine.high %v5792_v11, %v5799_v16  ;;  %v5904_v39 = vcombine.low %v5808_v53, %v5815_v25  ;;  %v6629_v47 = vcombine.high %v5808_v53, %v5815_v25 }
0x1044   :  { %v7263_v16 = vpack.c.bf16 %v6580_v36, %v6579_v10 }
0x1045   :  { %v5895_v6 = vrot.slane %v5888_v28, %v7777_v56  ;;  %v5903_v33 = vrot.slane %v6628_v29, %v7777_v56  ;;  %v5911_v17 = vrot.slane %v5904_v39, %v7777_v56  ;;  %v5919_v57 = vrot.slane %v6629_v47, %v7777_v56 }
0x1046   :  { %7264 = vmatprep.subr.bf16.mxu0 %v7263_v16 }
0x1047   :  { %v5921_v58 = vcombine.high %v5895_v6, %v5903_v33  ;;  %v5937_v45 = vcombine.high %v5911_v17, %v5919_v57  ;;  %v5920_v51 = vcombine.low %v5895_v6, %v5903_v33  ;;  %v5936_v1 = vcombine.low %v5911_v17, %v5919_v57  ;;  %7266 = vmatpush3.bf16.msra.mxu0 %v7263_v16 }
0x1049   :  { %v5935_v34 = vrot.slane %v5921_v58, %v7780_v63  ;;  %v5951_v46 = vrot.slane %v5937_v45, %v7780_v63  ;;  %v8597_v48 = vrot.slane %v5920_v51, %v7780_v63  ;;  %v8600_v59 = vrot.slane %v5936_v1, %v7780_v63 }
0x104b   :  { %v5954_v2 = vcombine.low %v5935_v34, %v5951_v46  ;;  %v5953_v3 = vcombine.high %v8597_v48, %v8600_v59  ;;  %v5952_v52 = vcombine.low %v8597_v48, %v8600_v59  ;;  %v5955_v32 = vcombine.high %v5935_v34, %v5951_v46  ;;  %v6632_v48 = vld [vmem:[#allocation7 + $0xe] ss:$0 sm:$0xff] }
0x104d   :  { %6034 = vrot.lane.b32.xlu0 %v5954_v2, %s7490_s14  ;;  %6026 = vrot.lane.b32.xlu1 %v5953_v3, %s7481_s20 }
0x1051   :  { %6042 = vrot.lane.b32.xlu0 %v5955_v32, %s7491_s26 }
0x1078   :  { %v5529_v42 = vpop.f32.mrb[28].mxu0  ;;  %v5602_v37 = vpop.f32.mrb[46].mxu1 }
0x1079   :  { %v7090_v54 = vpop.f32.mrb[29].mxu0  ;;  %v7095_v7 = vpop.f32.mrb[47].mxu1 }
0x107c   :  { %v5675_v8 = vpop.f32.mrb[30].mxu0  ;;  %v5748_v9 = vpop.f32.mrb[48].mxu1 }
0x107d   :  { %v5820_v14 = vcombine.low %v5529_v42, %v5675_v8  ;;  %v5821_v0 = vcombine.high %v5529_v42, %v5675_v8  ;;  %v5836_v50 = vcombine.low %v5602_v37, %v5748_v9  ;;  %v5837_v5 = vcombine.high %v5602_v37, %v5748_v9  ;;  %v7100_v30 = vpop.f32.mrb[31].mxu0  ;;  %v7105_v18 = vpop.f32.mrb[49].mxu1 }
0x107f   :  { %v5828_v41 = vrot.slane %v5820_v14, %v7777_v56  ;;  %v5835_v19 = vrot.slane %v5821_v0, %v7777_v56  ;;  %v5844_v55 = vrot.slane %v5836_v50, %v7777_v56  ;;  %v5851_v21 = vrot.slane %v5837_v5, %v7777_v56 }
0x1081   :  { %v5852_v20 = vcombine.low %v5828_v41, %v5844_v55  ;;  %v5853_v61 = vcombine.high %v5828_v41, %v5844_v55  ;;  %v5868_v12 = vcombine.low %v5835_v19, %v5851_v21  ;;  %v5869_v22 = vcombine.high %v5835_v19, %v5851_v21 }
0x1083   :  { %v5860_v26 = vrot.slane %v5852_v20, %v7780_v63  ;;  %v5867_v15 = vrot.slane %v5853_v61, %v7780_v63  ;;  %v5876_v49 = vrot.slane %v5868_v12, %v7780_v63  ;;  %v5883_v60 = vrot.slane %v5869_v22, %v7780_v63  ;;  %v6637_v61 = vld [vmem:[%s8754_s4 + $0x20] sm:$0xff]  ;;  %v6638_v12 = vld [vmem:[%s8754_s4 + $0x28] sm:$0xff] }
0x1084   :  { %v7267_v22 = vpack.c.bf16 %v6638_v12, %v6637_v61 }
0x1085   :  { %v5956_v27 = vcombine.low %v5860_v26, %v5867_v15  ;;  %v6630_v40 = vcombine.high %v5860_v26, %v5867_v15  ;;  %v5972_v44 = vcombine.low %v5876_v49, %v5883_v60  ;;  %v6631_v31 = vcombine.high %v5876_v49, %v5883_v60  ;;  %v6644_v15 = vld [vmem:[%s8755_s5 + $0x80] sm:$0xff]  ;;  %v6645_v49 = vld [vmem:[%s8755_s5 + $0x88] sm:$0xff] }
0x1086   :  { %v7271_v26 = vpack.c.bf16 %v6640_v38, %v6639_v23  ;;  %7268 = vmatprep.subr.bf16.mxu1 %v7267_v22  ;;  %v7275_v60 = vpack.c.bf16 %v6645_v49, %v6644_v15  ;;  %v6660_v49 = vld [vmem:[#allocation7 + $0x11] ss:$0 sm:$0xff] }
0x1087   :  { %v5963_v24 = vrot.slane %v5956_v27, %v7777_v56  ;;  %v5971_v43 = vrot.slane %v6630_v40, %v7777_v56  ;;  %v5979_v4 = vrot.slane %v5972_v44, %v7777_v56  ;;  %v5987_v11 = vrot.slane %v6631_v31, %v7777_v56  ;;  %7270 = vmatpush3.bf16.msra.mxu1 %v7267_v22 }
0x1088   :  { %7272 = vmatprep.subr.bf16.mxu1 %v7271_v26  ;;  %7276 = vmatprep.subr.bf16.mxu0 %v7275_v60 }
0x1089   :  { %v5988_v53 = vcombine.low %v5963_v24, %v5971_v43  ;;  %v6004_v25 = vcombine.low %v5979_v4, %v5987_v11  ;;  %v5989_v28 = vcombine.high %v5963_v24, %v5971_v43  ;;  %v6005_v29 = vcombine.high %v5979_v4, %v5987_v11  ;;  %v6635_v24 = vld [vmem:[#allocation7 + $0xf] ss:$0 sm:$0xff]  ;;  %v6636_v4 = vld [vmem:[#allocation7 + $0x10] ss:$0 sm:$0xff] }
0x108b   :  { %v5996_v39 = vrot.slane %v5988_v53, %v7780_v63  ;;  %v6012_v47 = vrot.slane %v6004_v25, %v7780_v63  ;;  %v6003_v6 = vrot.slane %v5989_v28, %v7780_v63  ;;  %v6019_v33 = vrot.slane %v6005_v29, %v7780_v63  ;;  %7274 = vmatpush3.bf16.msra.mxu1 %v7271_v26 }
0x108d   :  { %v6021_v17 = vcombine.high %v5996_v39, %v6012_v47  ;;  %v6020_v57 = vcombine.low %v5996_v39, %v6012_v47  ;;  %v6022_v58 = vcombine.low %v6003_v6, %v6019_v33  ;;  %v6023_v56 = vcombine.high %v6003_v6, %v6019_v33  ;;  %v6646_v39 = vld [vmem:[%s8755_s5 + $0x90] sm:$0xff]  ;;  %v6647_v47 = vld [vmem:[%s8755_s5 + $0x98] sm:$0xff]  ;;  %v6648_v33 = vld [vmem:[%s8755_s5 + $0xa0] sm:$0xff] }
0x108e   :  { %v7279_v6 = vpack.c.bf16 %v6647_v47, %v6646_v39 }
0x108f   :  { %6028 = vrot.lane.b32.xlu1 %v6021_v17, %s7481_s20  ;;  %v6649_v17 = vld [vmem:[%s8755_s5 + $0xa8] sm:$0xff] }
0x1093   :  { %6036 = vrot.lane.b32.xlu1 %v6022_v58, %s7490_s14  ;;  %v6650_v58 = vld [vmem:[%s8755_s5 + $0xb0] sm:$0xff] }
0x1097   :  { %6044 = vrot.lane.b32.xlu1 %v6023_v56, %s7491_s26  ;;  %v6651_v56 = vld [vmem:[%s8755_s5 + $0xb8] sm:$0xff] }
0x10bf   :  { %v6035_v45 = vpop.permute.xlu0 %6034  ;;  %v6027_v51 = vpop.permute.xlu1 %6026 }
0x10c0   :  { %v6048_v1 = vsel %vm1342_vm3, %v5952_v52, %v6027_v51  ;;  %v7287_v51 = vpack.c.bf16 %v6651_v56, %v6650_v58 }
0x10c1   :  { %v6050_v63 = vsel %vm2937_vm5, %v6048_v1, %v6035_v45  ;;  %v6652_v45 = vld [vmem:[%s8755_s5 + $0xc0] sm:$0xff]  ;;  %v6653_v1 = vld [vmem:[%s8755_s5 + $0xc8] sm:$0xff] }
0x10c3   :  { %v6043_v34 = vpop.permute.xlu0 %6042 }
0x10c4   :  { %v6052_v46 = vsel %vm2940_vm6, %v6050_v63, %v6043_v34  ;;  %v7291_v34 = vpack.c.bf16 %v6653_v1, %v6652_v45  ;;  %v6654_v63 = vld [vmem:[%s8755_s5 + $0xd0] sm:$0xff] }
0x10c5   :  { %7114 = vmatprep.mubr.msk.f32.mxu0 %vm180_vm1, %v6052_v46  ;;  %v6655_v46 = vld [vmem:[%s8755_s5 + $0xd8] sm:$0xff] }
0x1101   :  { %v6029_v2 = vpop.permute.xlu1 %6028 }
0x1102   :  { %v6049_v32 = vsel %vm1342_vm3, %v6020_v57, %v6029_v2  ;;  %v7283_v57 = vpack.c.bf16 %v6649_v17, %v6648_v33  ;;  %v7295_v2 = vpack.c.bf16 %v6655_v46, %v6654_v63 }
0x1105   :  { %v6037_v3 = vpop.permute.xlu1 %6036 }
0x1106   :  { %v6051_v42 = vsel %vm2937_vm5, %v6049_v32, %v6037_v3  ;;  %v6656_v3 = vld [vmem:[%s8755_s5 + $0xe0] sm:$0xff]  ;;  %v6657_v32 = vld [vmem:[%s8755_s5 + $0xe8] sm:$0xff] }
0x1109   :  { %v6045_v37 = vpop.permute.xlu1 %6044 }
0x110a   :  { %v6053_v54 = vsel %vm2940_vm6, %v6051_v42, %v6045_v37  ;;  %v7299_v42 = vpack.c.bf16 %v6657_v32, %v6656_v3  ;;  %v6658_v37 = vld [vmem:[%s8755_s5 + $0xf0] sm:$0xff] }
0x110b   :  { %7115 = vmatmul.mubr.msk.f32.vlgmr.msra.gmra.mrb[32].mxu0 %vm180_vm1, %v6053_v54  ;;  %v6659_v54 = vld [vmem:[%s8755_s5 + $0xf8] sm:$0xff]  ;;  %s7492_s5 = smov [#allocation8]  }
0x110c   :  { %7278 = vmatpush3.bf16.msra.mxu0 %v7275_v60 }
0x110d   :  { %7280 = vmatprep.subr.bf16.mxu0 %v7279_v6 }
0x1110   :  { %7282 = vmatpush3.bf16.msra.mxu0 %v7279_v6 }
0x1111   :  { %7284 = vmatprep.subr.bf16.mxu0 %v7283_v57 }
0x1114   :  { %7286 = vmatpush3.bf16.msra.mxu0 %v7283_v57 }
0x1115   :  { %7288 = vmatprep.subr.bf16.mxu0 %v7287_v51 }
0x1118   :  { %7290 = vmatpush3.bf16.msra.mxu0 %v7287_v51  ;;  %v6661_v51 = vld [vmem:[#allocation7 + $0x12] ss:$0 sm:$0xff] }
0x1119   :  { %7292 = vmatprep.subr.bf16.mxu0 %v7291_v34 }
0x111c   :  { %7294 = vmatpush3.bf16.msra.mxu0 %v7291_v34  ;;  %v6662_v34 = vld [vmem:[#allocation7 + $0x13] ss:$0 sm:$0xff] }
0x111d   :  { %7296 = vmatprep.subr.bf16.mxu0 %v7295_v2 }
0x1120   :  { %7298 = vmatpush3.bf16.msra.mxu0 %v7295_v2 }
0x1121   :  { %7300 = vmatprep.subr.bf16.mxu0 %v7299_v42 }
0x1124   :  { %7302 = vmatpush3.bf16.msra.mxu0 %v7299_v42 }
0x11de   :  { %v7116_v59 = vpop.f32.mrb[32].mxu0 }
0x11df   :  { %v6137_v52 = vadd.f32 %v7116_v59, %v6632_v48  ;;  %v6131_v7 = vpop.f32.mrb[33].mxu0  ;;  %v6641_v59 = vld [vmem:[%s8756_s6 + $0x1] ss:$0 sm:$0xff]  ;;  %s6464_s6 = sshll.u32 %s7492_s5, 4  ;;  %s6465_s6 = int_to_ptr.vmem [resolvable:$true] %s6464_s6 }
0x11e0   :  { %v6132_v8 = vadd.f32 %v6632_v48, %v6131_v7  ;;  %v7303_v48 = vpack.c.bf16 %v6659_v54, %v6658_v37  ;;  %s7450_s9 = scalar_lea.vmem %s6465_s6, 32  ;;  %p7455_p0 = scmp.lt.s32.totalorder %s6465_s6, %s6465_s6 }
0x11e1   :  { %v8652_v9 = vadd.f32 %v6137_v52, %v8215_v35  ;;  %p7451_p13 = scmp.ne.s32.totalorder %s6465_s6, %s7450_s9  ;;  %p7456_p1 = scmp.lt.s32.totalorder %s7450_s9, %s7450_s9 }
0x11e2   :  { %v8655_v14 = vadd.f32 %v6132_v8, %v8218_v13  ;;  %7304 = vmatprep.subr.bf16.mxu0 %v7303_v48 }
0x11e3   :  { %v6147_v0 = vsel %vm180_vm1, %v8652_v9, 0.0  ;;  %7306 = vmatpush3.bf16.msra.mxu0 %v7303_v48  ;;  %p7457_p2 = por %p7456_p1, %p7455_p0 }
0x11e4   :  { %6148 = vadd.xlane.f32.xlu1 %v6147_v0  ;;  %v6144_v50 = vsel %vm180_vm1, %v8655_v14, 0.0 }
0x11e5   :  { %6145 = vadd.xlane.f32.xlu0 %v6144_v50  ;;  %p7458_p3 = pnand %p7457_p2, %p7451_p13 }
0x1271   :  { %v6149_v5 = vpop.xlane.xlu1 %6148 }
0x1272   :  { %v6151_v30 = vmul.f32 0.03125, %v6149_v5  ;;  %v6146_v18 = vpop.xlane.xlu0 %6145 }
0x1273   :  { %v6150_v41 = vmul.f32 0.03125, %v6146_v18 }
0x1274   :  { %v6153_v19 = vsub.f32 %v8652_v9, %v6151_v30 }
0x1275   :  { %v6152_v35 = vsub.f32 %v8655_v14, %v6150_v41 }
0x1276   :  { %v6155_v21 = vmul.f32 %v6153_v19, %v6153_v19 }
0x1277   :  { %v6154_v55 = vmul.f32 %v6152_v35, %v6152_v35 }
0x1278   :  { %v6159_v20 = vsel %vm180_vm1, %v6155_v21, 0.0 }
0x1279   :  { %v6156_v13 = vsel %vm180_vm1, %v6154_v55, 0.0 }
0x127a   :  { %6157 = vadd.xlane.f32.xlu0 %v6156_v13 }
0x127e   :  { %6160 = vadd.xlane.f32.xlu0 %v6159_v20 }
0x1307   :  { %v6158_v62 = vpop.xlane.xlu0 %6157 }
0x1308   :  { %v6162_v27 = vmul.f32 0.03125, %v6158_v62 }
0x130a   :  { %v6164_v40 = vadd.f32 1e-05, %v6162_v27 }
0x130b   :  { %v6161_v44 = vpop.xlane.xlu0 %6160 }
0x130c   :  { %7402 = vrsqrt.f32 %v6164_v40  ;;  %v6163_v31 = vmul.f32 0.03125, %v6161_v44 }
0x130e   :  { %v6165_v10 = vadd.f32 1e-05, %v6163_v31 }
0x1310   :  { %7404 = vrsqrt.f32 %v6165_v10 }
0x1316   :  { %v7403_v36 = vpop.eup %7402 }
0x1317   :  { %v6168_v43 = vmul.f32 %v7403_v36, %v6152_v35 }
0x1319   :  { %v6174_v11 = vmul.f32 %v6635_v24, %v6168_v43 }
0x131a   :  { %v7405_v16 = vpop.eup %7404 }
0x131b   :  { %v6169_v53 = vmul.f32 %v7405_v16, %v6153_v19  ;;  %v6180_v25 = vadd.f32 %v6636_v4, %v6174_v11 }
0x131d   :  { %v6175_v28 = vmul.f32 %v6635_v24, %v6169_v53  ;;  %7125 = vmatprep.mubr.msk.f32.mxu1 %vm180_vm1, %v6180_v25 }
0x131f   :  { %v6181_v29 = vadd.f32 %v6636_v4, %v6175_v28 }
0x1321   :  { %7126 = vmatmul.mubr.msk.f32.vlgmr.msra.gmra.mrb[50].mxu1 %vm180_vm1, %v6181_v29 }
0x13f4   :  { %v7127_v52 = vpop.f32.mrb[50].mxu1 }
0x13f5   :  { %v6270_v7 = vadd.f32 %v7127_v52, %v6641_v59  ;;  %v6264_v8 = vpop.f32.mrb[51].mxu1 }
0x13f6   :  { %v6265_v0 = vadd.f32 %v6641_v59, %v6264_v8 }
0x13f7   :  { %v6276_v50 = vmul.f32 0.044715, %v6270_v7  ;;  %v6274_v38 = vmul.f32 0.5, %v6270_v7 }
0x13f8   :  { %v6275_v5 = vmul.f32 0.044715, %v6265_v0  ;;  %v6273_v22 = vmul.f32 0.5, %v6265_v0 }
0x13f9   :  { %v6278_v30 = vmul.f32 %v6276_v50, %v6270_v7 }
0x13fa   :  { %v6277_v18 = vmul.f32 %v6275_v5, %v6265_v0 }
0x13fb   :  { %v6280_v41 = vmul.f32 %v6278_v30, %v6270_v7 }
0x13fc   :  { %v6279_v19 = vmul.f32 %v6277_v18, %v6265_v0 }
0x13fd   :  { %v6282_v35 = vadd.f32 %v6280_v41, %v6270_v7 }
0x13fe   :  { %v6281_v55 = vadd.f32 %v6279_v19, %v6265_v0 }
0x13ff   :  { %v6284_v13 = vmul.f32 0.7978846, %v6282_v35 }
0x1400   :  { %v6283_v21 = vmul.f32 0.7978846, %v6281_v55 }
0x1401   :  { %7406 = vtanh.f32 %v6284_v13 }
0x1402   :  { %7408 = vtanh.f32 %v6283_v21 }
0x140b   :  { %v7407_v20 = vpop.eup %7406 }
0x140c   :  { %v7409_v61 = vpop.eup %7408  ;;  %v6288_v12 = vadd.f32 1.0, %v7407_v20 }
0x140d   :  { %v6287_v23 = vadd.f32 1.0, %v7409_v61 }
0x140e   :  { %v6290_v15 = vmul.f32 %v6288_v12, %v6274_v38 }
0x140f   :  { %v6289_v26 = vmul.f32 %v6287_v23, %v6273_v22 }
0x1411   :  { %7160 = vmatprep.mubr.f32.mxu0 %v6289_v26 }
0x1412   :  { %7161 = vmatmul.mubr.f32.vlgmr.msra.gmra.mrb[34].mxu0 %v6290_v15 }
0x14e5   :  { %v7162_v60 = vpop.f32.mrb[34].mxu0 }
0x14e6   :  { %v6385_v62 = vadd.f32 %v7162_v60, %v6660_v49  ;;  %v6379_v27 = vpop.f32.mrb[35].mxu0 }
0x14e7   :  { %v6380_v40 = vadd.f32 %v6660_v49, %v6379_v27 }
0x14e8   :  { %v6389_v44 = vadd.f32 %v6385_v62, %v8652_v9 }
0x14e9   :  { %v6388_v31 = vadd.f32 %v6380_v40, %v8655_v14 }
0x14ea   :  { %v6394_v10 = vrot.slane %v6389_v44, 7 }
0x14eb   :  { %v6398_v36 = vsel %vm6397_vm7, %v6388_v31, 0.0 }
0x14ec   :  { %6399 = vadd.xlane.f32.xlu1 %v6398_v36  ;;  %v6401_v24 = vsel %vm62_vm0, %v6394_v10, 0.0 }
0x14ed   :  { %6402 = vadd.xlane.f32.xlu0 %v6401_v24 }
0x1579   :  { %v6400_v43 = vpop.xlane.xlu1 %6399 }
0x157a   :  { %v6404_v4 = vmul.f32 0.03125, %v6400_v43  ;;  %v6403_v11 = vpop.xlane.xlu0 %6402 }
0x157b   :  { %v6405_v16 = vmul.f32 0.03125, %v6403_v11 }
0x157c   :  { %v6411_v53 = vsub.f32 %v6388_v31, %v6404_v4 }
0x157d   :  { %v6408_v25 = vrot.slane %v6405_v16, 1 }
0x157e   :  { %v6413_v28 = vmul.f32 %v6411_v53, %v6411_v53 }
0x157f   :  { %v6412_v29 = vsub.f32 %v6389_v44, %v6408_v25 }
0x1580   :  { %v6420_v9 = vsel %vm6397_vm7, %v6413_v28, 0.0 }
0x1581   :  { %6421 = vadd.xlane.f32.xlu1 %v6420_v9  ;;  %v6414_v39 = vmul.f32 %v6412_v29, %v6412_v29 }
0x1583   :  { %v6417_v14 = vrot.slane %v6414_v39, 7 }
0x1585   :  { %v6423_v47 = vsel %vm62_vm0, %v6417_v14, 0.0 }
0x1586   :  { %6424 = vadd.xlane.f32.xlu0 %v6423_v47 }
0x160e   :  { %v6422_v6 = vpop.xlane.xlu1 %6421 }
0x160f   :  { %v6426_v33 = vmul.f32 0.03125, %v6422_v6 }
0x1611   :  { %v6428_v17 = vadd.f32 1e-05, %v6426_v33 }
0x1613   :  { %7410 = vrsqrt.f32 %v6428_v17  ;;  %v6425_v57 = vpop.xlane.xlu0 %6424 }
0x1614   :  { %v6427_v58 = vmul.f32 0.03125, %v6425_v57 }
0x1616   :  { %v6429_v56 = vadd.f32 1e-05, %v6427_v58 }
0x1618   :  { %7412 = vrsqrt.f32 %v6429_v56 }
0x161d   :  { %v7411_v45 = vpop.eup %7410 }
0x161e   :  { %v6437_v1 = vmul.f32 %v7411_v45, %v6411_v53 }
0x1620   :  { %v6443_v63 = vmul.f32 %v6661_v51, %v6437_v1 }
0x1622   :  { %v7413_v46 = vpop.eup %7412  ;;  %v6449_v2 = vadd.f32 %v6662_v34, %v6443_v63 }
0x1623   :  { %v6434_v3 = vrot.slane %v7413_v46, 1 }
0x1624   :  { %6456 = vst.msk [vmem:[#allocation8 - $0x7] sm:$0x80] %vm6397_vm7, %v6449_v2 }
0x1625   :  { %v6438_v32 = vmul.f32 %v6434_v3, %v6412_v29 }
0x1627   :  { %v6444_v42 = vmul.f32 %v6661_v51, %v6438_v32 }
0x1629   :  { %v6450_v37 = vadd.f32 %v6662_v34, %v6444_v42 }
0x162b   :  { %v6453_v54 = vrot.slane %v6450_v37, 7 }
0x162d   :  { %6457 = vst.msk [vmem:[#allocation8 + $0x1] sm:$0x1] %vm62_vm0, %v6453_v54 }
0x162e   :  { %7461 = shalt.err (!%p7458_p3)
}
0x162f   :  { %s7462_s11 = scalar_lea.hbm %s8758_s8, 32 }
0x1630   :  { %p7463_p4 = scmp.ne.s32.totalorder %s8758_s8, %s7462_s11  ;;  %p7466_p5 = scmp.lt.u32.totalorder %s7462_s11, %s8758_s8 }
0x1632   :  { %p7468_p6 = pnand %p7466_p5, %p7463_p4 }
0x1634   :  { %7471 = shalt.err (!%p7468_p6)
}
0x1635   :  { %6467 = dma.vmem_to_hbm [thread:$0]  %s6465_s6, 32, %s8758_s8, [#allocation5]  }
0x1636   :  { %7476 = dma.done.wait [#allocation5], 32  }
0x1637   :  { %7477 = vsyncadd [#allocation5], 4294967264 }
0x1638   :  { %6471 = vsyncpa [#allocation4], 1 }
0x1639   :  { %6472 = vsyncpa [#allocation5], 1 }
0x163a   :  { %6473 = vsyncpa [#allocation6], 1 }

</bundles_post_ra>
